<compile_context>
chip_gen: v7x
topology: tpu7x:2x2x1
jax: 0.10.0
libtpu: 0.0.40
codegen_flags: <defaults>
</compile_context>

<pallas_src>
import functools

import jax
import jax.numpy as jnp
from jax.experimental import pallas as pl
from jax.experimental.pallas import tpu as pltpu


# ----------------------------- fused Pallas kernel ---------------------------

def _wf_kernel(res_ref, x_ref, wpre_ref, w1_ref, wpost_ref, shift_ref, out_ref,
               fused_ref, *tap_scratch, fuse_taps: bool):
    """Processes `bt` batch images per grid step.

    res_ref:   (bt, Hp, Wp, Cin)  zero-padded `res`              (compute dtype)
    x_ref:     (bt, Hp, Wp, Cd)   zero-padded `x`                (compute dtype)
    wpre_ref:  (Cin, Cd)          1x1 pre_conv weight * fw[0]    (compute dtype)
    w1_ref:    (1, Cd)            fw[1] broadcast per channel    (f32)
    wpost_ref: (9*Cd, Cd)         3x3 weight taps * BN scale     (compute dtype)
    shift_ref: (1, Cd)            folded BN shift                (f32)
    out_ref:   (bt, H, W, Cd)                                    (f32)
    fused_ref: (Hp, Wp, Cd)       VMEM scratch for the fused activation
    tap_scratch[0] (iff fuse_taps): (H, W, 9*Cd) im2col VMEM scratch
    """
    patch_ref = tap_scratch[0] if fuse_taps else None
    bt, Hp, Wp, Cin = res_ref.shape
    H, W, Cd = out_ref.shape[1], out_ref.shape[2], out_ref.shape[3]
    n_rows = Hp * Wp

    w1 = w1_ref[...]        # (1, Cd) f32
    shift = shift_ref[...]  # (1, Cd) f32

    for b in range(bt):     # static unroll over the images of this block
        # ---- Stage 1: 1x1 pre_conv (MXU) + weighted skip-add (VPU) -> VMEM scratch.
        # The zero-padded border stays exactly zero (both convs are bias-free), which
        # provides the 3x3 conv's zero padding with no extra tensors.  Wp is a sublane
        # multiple, so these reshapes are layout-preserving (no relayout copies).
        # (The ~10% of rows that are pure padding stay in the matmul for alignment.)
        res2d = res_ref[b].reshape(n_rows, Cin)
        x2d = x_ref[b].reshape(n_rows, Cd)
        fused = jnp.dot(res2d, wpre_ref[...], preferred_element_type=jnp.float32)
        fused = fused + x2d.astype(jnp.float32) * w1
        fused_ref[...] = fused.astype(fused_ref.dtype).reshape(Hp, Wp, Cd)

        # ---- Stage 2: 3x3 conv.
        if fuse_taps:
            # Deep-K path: pack the 9 shifted taps lane-dense into the im2col scratch
            # (aligned lane-offset stores), then ONE K = 9*Cd MXU matmul with f32
            # accumulation -- accumulation stays inside the MXU result path.
            for dy in range(3):
                for dx in range(3):
                    t = 3 * dy + dx
                    patch_ref[:, :, t * Cd:(t + 1) * Cd] = \
                        fused_ref[dy:dy + H, dx:dx + W, :]
            acc = jnp.dot(patch_ref[...].reshape(H * W, 9 * Cd), wpost_ref[...],
                          preferred_element_type=jnp.float32)
        else:
            # v5e-friendly path: 9 separate K=Cd matmuls accumulated in f32.
            acc = jnp.zeros((H * W, Cd), jnp.float32)
            for dy in range(3):
                for dx in range(3):
                    t = 3 * dy + dx
                    tap = fused_ref[dy:dy + H, dx:dx + W, :].reshape(H * W, Cd)
                    acc = acc + jnp.dot(tap, wpost_ref[t * Cd:(t + 1) * Cd, :],
                                        preferred_element_type=jnp.float32)

        # ---- Stage 3: folded-BN shift + ReLU6 epilogue, lane-dense f32 store.
        y = jnp.clip(acc + shift, 0.0, 6.0)
        out_ref[b] = y.reshape(H, W, Cd).astype(out_ref.dtype)


# ----------------------------- wrapper ----------------------------------------

def wf_forward(x_nchw, res_nchw, params, *, eps=1e-8, bn_eps=1e-5,
               compute_dtype=jnp.bfloat16, batch_block=1, fuse_taps=True):
    """WF forward.  NCHW in / NCHW out (PyTorch layout); NHWC + lane-dense channels inside."""
    x = jnp.transpose(x_nchw, (0, 2, 3, 1)).astype(jnp.float32)      # NCHW -> NHWC
    res = jnp.transpose(res_nchw, (0, 2, 3, 1)).astype(jnp.float32)
    B, H, W, Cd = x.shape
    Cin = res.shape[-1]

    # Learnable fusion weights: ReLU then normalize (2 scalars, plain JAX).
    w = jnp.maximum(params["weights"].astype(jnp.float32), 0.0)
    fw = w / (jnp.sum(w) + eps)

    # Fold fw[0] into the 1x1 weight (before the bf16 cast).  fw[1] stays an f32 (1, Cd)
    # row applied inside the kernel (pre-scaling x in the wrapper just moves the multiply
    # into an un-hidden XLA op).
    wpre = (params["pre_w"].reshape(Cin, Cd) * fw[0]).astype(compute_dtype)
    w1_vec = jnp.broadcast_to(fw[1], (1, Cd)).astype(jnp.float32)

    # Fold inference-mode BatchNorm into the 3x3 conv: per-channel scale into the weights
    # (before the bf16 cast), shift into the f32 epilogue.  Layout (9*Cd, Cd) matches the
    # kernel's im2col lane order (tap-major, then c_in).
    bn = params["post_bn"]
    scale = bn["gamma"] * jax.lax.rsqrt(bn["var"] + bn_eps)
    shift = (bn["beta"] - bn["mean"] * scale).reshape(1, Cd).astype(jnp.float32)
    wpost = (params["post_w"] * scale[None, None, None, :]).reshape(9 * Cd, Cd)
    wpost = wpost.astype(compute_dtype)

    # Zero-pad H by 1 and W up to a sublane multiple (>= W+2): the conv's zero padding
    # comes for free AND every in-kernel reshape stays layout-preserving.
    sub = 16 if jnp.dtype(compute_dtype).itemsize < 4 else 8
    Hp = H + 2
    Wp = pl.cdiv(W + 2, sub) * sub
    pad = ((0, 0), (1, 1), (1, Wp - W - 1), (0, 0))
    res_p = jnp.pad(res, pad).astype(compute_dtype)
    x_p = jnp.pad(x, pad).astype(compute_dtype)

    # Grid: `batch_block` images per step.  Default 1 => B "parallel" steps (keeps both
    # v7x TensorCores busy); raise it for large B to amortize per-step pipeline overhead.
    bt = batch_block if (batch_block > 0 and B % batch_block == 0) else 1
    grid = (B // bt,)

    scratch_shapes = [pltpu.VMEM((Hp, Wp, Cd), compute_dtype)]            # fused activation
    if fuse_taps:
        scratch_shapes.append(pltpu.VMEM((H, W, 9 * Cd), compute_dtype))  # im2col patches

    out = pl.pallas_call(
        functools.partial(_wf_kernel, fuse_taps=fuse_taps),
        out_shape=jax.ShapeDtypeStruct((B, H, W, Cd), jnp.float32),
        grid=grid,
        in_specs=[
            pl.BlockSpec((bt, Hp, Wp, Cin), lambda i: (i, 0, 0, 0)),   # res (padded)
            pl.BlockSpec((bt, Hp, Wp, Cd), lambda i: (i, 0, 0, 0)),    # x   (padded)
            pl.BlockSpec((Cin, Cd), lambda i: (0, 0)),                 # folded 1x1 weight
            pl.BlockSpec((1, Cd), lambda i: (0, 0)),                   # fw[1]
            pl.BlockSpec((9 * Cd, Cd), lambda i: (0, 0)),              # folded 3x3 weight
            pl.BlockSpec((1, Cd), lambda i: (0, 0)),                   # folded BN shift
        ],
        out_specs=pl.BlockSpec((bt, H, W, Cd), lambda i: (i, 0, 0, 0)),
        scratch_shapes=scratch_shapes,
        compiler_params=pltpu.CompilerParams(dimension_semantics=("parallel",)),
    )(res_p, x_p, wpre, w1_vec, wpost, shift)

    return jnp.transpose(out, (0, 3, 1, 2))                            # NHWC -> NCHW


# ----------------------------- pure-JAX reference -----------------------------

def wf_reference(x_nchw, res_nchw, params, eps=1e-8, bn_eps=1e-5):
    x = jnp.transpose(x_nchw, (0, 2, 3, 1)).astype(jnp.float32)
    res = jnp.transpose(res_nchw, (0, 2, 3, 1)).astype(jnp.float32)
    Cin, Cd = res.shape[-1], x.shape[-1]
    w = jnp.maximum(params["weights"], 0.0)
    fw = w / (jnp.sum(w) + eps)
    pre = jax.lax.conv_general_dilated(
        res, params["pre_w"].reshape(1, 1, Cin, Cd), (1, 1), "VALID",
        dimension_numbers=("NHWC", "HWIO", "NHWC"))
    fused = fw[0] * pre + fw[1] * x
    conv = jax.lax.conv_general_dilated(
        fused, params["post_w"], (1, 1), ((1, 1), (1, 1)),
        dimension_numbers=("NHWC", "HWIO", "NHWC"))
    bn = params["post_bn"]
    s = bn["gamma"] * jax.lax.rsqrt(bn["var"] + bn_eps)
    y = jnp.clip((conv - bn["mean"]) * s + bn["beta"], 0.0, 6.0)
    return jnp.transpose(y, (0, 3, 1, 2))


# ----------------------------- deterministic parameters -----------------------

def init_wf_params(key, in_ch, dec_ch):
    k1, k2, k3, k4, k5, k6 = jax.random.split(key, 6)
    return dict(
        weights=jnp.ones((2,), jnp.float32),               # nn.Parameter(torch.ones(2))
        pre_w=jax.random.normal(k1, (in_ch, dec_ch), jnp.float32) / jnp.sqrt(float(in_ch)),
        post_w=jax.random.normal(k2, (3, 3, dec_ch, dec_ch), jnp.float32)
               / jnp.sqrt(9.0 * dec_ch),
        post_bn=dict(                                       # inference-mode running stats
            gamma=1.0 + 0.05 * jax.random.normal(k3, (dec_ch,), jnp.float32),
            beta=0.05 * jax.random.normal(k4, (dec_ch,), jnp.float32),
            mean=0.05 * jax.random.normal(k5, (dec_ch,), jnp.float32),
            var=1.0 + 0.1 * jnp.abs(jax.random.normal(k6, (dec_ch,), jnp.float32)),
        ),
    )


# ----------------------------- main --------------------------------------------

if __name__ == "__main__":
    # WF defaults: in_channels = decode_channels = 128; small spatial / batch for the demo.
    B, C_IN, C_DEC, H, W = 2, 128, 128, 16, 16

    key = jax.random.PRNGKey(0)
    kx, kr, kp = jax.random.split(key, 3)
    x = jax.random.normal(kx, (B, C_DEC, H, W), jnp.float32)
    res = jax.random.normal(kr, (B, C_IN, H, W), jnp.float32)
    params = init_wf_params(kp, C_IN, C_DEC)

    fwd = jax.jit(wf_forward)
    out = fwd(x, res, params)
    jax.block_until_ready(out)

    assert out.shape == (B, C_DEC, H, W), out.shape
    assert bool(jnp.all(jnp.isfinite(out)))

    ref = wf_reference(x, res, params)
    max_err = float(jnp.max(jnp.abs(out - ref)))
    # bf16 MXU operands with f32 accumulation: observed error is O(1e-2) at most.
    assert max_err < 5e-2, f"max abs err vs reference = {max_err}"

    print("KERNEL_OK")
</pallas_src>

<mosaic_0001>
module attributes {stable_mosaic.version = 11 : i64} {
  func.func @_wf_kernel(%arg0: i32, %arg1: memref<1x18x32x128xbf16, #tpu.memory_space<vmem>>, %arg2: memref<1x18x32x128xbf16, #tpu.memory_space<vmem>>, %arg3: memref<128x128xbf16, #tpu.memory_space<vmem>>, %arg4: memref<1x128xf32, #tpu.memory_space<vmem>>, %arg5: memref<1152x128xbf16, #tpu.memory_space<vmem>>, %arg6: memref<1x128xf32, #tpu.memory_space<vmem>>, %arg7: memref<1x16x16x128xf32, #tpu.memory_space<vmem>>, %arg8: memref<18x32x128xbf16, #tpu.memory_space<vmem>>, %arg9: memref<16x16x1152xbf16, #tpu.memory_space<vmem>>) attributes {dimension_semantics = [#tpu.dimension_semantics<parallel>], iteration_bounds = array<i64: 2>, scalar_prefetch = 0 : i64, scratch_operands = 2 : i64, tpu.core_type = #tpu.core_type<tc>, window_params = [{transform_indices = @transform_0, window_bounds = array<i64: 1, 18, 32, 128>}, {transform_indices = @transform_1, window_bounds = array<i64: 1, 18, 32, 128>}, {pipeline_mode = #tpu.pipeline_mode<synchronous>, transform_indices = @transform_2, window_bounds = array<i64: 128, 128>}, {pipeline_mode = #tpu.pipeline_mode<synchronous>, transform_indices = @transform_3, window_bounds = array<i64: 1, 128>}, {pipeline_mode = #tpu.pipeline_mode<synchronous>, transform_indices = @transform_4, window_bounds = array<i64: 1152, 128>}, {pipeline_mode = #tpu.pipeline_mode<synchronous>, transform_indices = @transform_5, window_bounds = array<i64: 1, 128>}, {transform_indices = @transform_6, window_bounds = array<i64: 1, 16, 16, 128>}]} {
    %c0 = arith.constant 0 : index
    %c0_0 = arith.constant 0 : index
    %0 = vector.load %arg4[%c0, %c0_0] : memref<1x128xf32, #tpu.memory_space<vmem>>, vector<1x128xf32>
    %c0_1 = arith.constant 0 : index
    %c0_2 = arith.constant 0 : index
    %1 = vector.load %arg6[%c0_1, %c0_2] : memref<1x128xf32, #tpu.memory_space<vmem>>, vector<1x128xf32>
    %c0_3 = arith.constant 0 : index
    %c0_4 = arith.constant 0 : index
    %c0_5 = arith.constant 0 : index
    %c0_6 = arith.constant 0 : index
    %2 = vector.load %arg1[%c0_3, %c0_4, %c0_5, %c0_6] : memref<1x18x32x128xbf16, #tpu.memory_space<vmem>>, vector<1x18x32x128xbf16>
    %3 = vector.shape_cast %2 : vector<1x18x32x128xbf16> to vector<18x32x128xbf16>
    %4 = vector.shape_cast %3 : vector<18x32x128xbf16> to vector<576x128xbf16>
    %c0_7 = arith.constant 0 : index
    %c0_8 = arith.constant 0 : index
    %c0_9 = arith.constant 0 : index
    %c0_10 = arith.constant 0 : index
    %5 = vector.load %arg2[%c0_7, %c0_8, %c0_9, %c0_10] : memref<1x18x32x128xbf16, #tpu.memory_space<vmem>>, vector<1x18x32x128xbf16>
    %6 = vector.shape_cast %5 : vector<1x18x32x128xbf16> to vector<18x32x128xbf16>
    %7 = vector.shape_cast %6 : vector<18x32x128xbf16> to vector<576x128xbf16>
    %c0_11 = arith.constant 0 : index
    %c0_12 = arith.constant 0 : index
    %8 = vector.load %arg3[%c0_11, %c0_12] : memref<128x128xbf16, #tpu.memory_space<vmem>>, vector<128x128xbf16>
    %cst = arith.constant dense<0.000000e+00> : vector<576x128xf32>
    %9 = tpu.matmul %4, %8, %cst {dimension_numbers = #tpu.dot_dimension_numbers<[1], [0], [0], [1], [0, 0, 1, 1], [], []>} : vector<576x128xbf16>, vector<128x128xbf16>, vector<576x128xf32> -> vector<576x128xf32>
    %10 = arith.extf %7 : vector<576x128xbf16> to vector<576x128xf32>
    %11 = vector.broadcast %0 : vector<1x128xf32> to vector<576x128xf32>
    %12 = arith.mulf %10, %11 : vector<576x128xf32>
    %13 = arith.addf %9, %12 : vector<576x128xf32>
    %14 = arith.truncf %13 : vector<576x128xf32> to vector<576x128xbf16>
    %15 = vector.shape_cast %14 : vector<576x128xbf16> to vector<18x32x128xbf16>
    %c0_13 = arith.constant 0 : index
    %c0_14 = arith.constant 0 : index
    %c0_15 = arith.constant 0 : index
    %16 = vector.load %arg8[%c0_13, %c0_14, %c0_15] : memref<18x32x128xbf16, #tpu.memory_space<vmem>>, vector<18x32x128xbf16>
    tpu.vector_store %arg8[%c0_13, %c0_14, %c0_15], %15 {strides = array<i32>} : memref<18x32x128xbf16, #tpu.memory_space<vmem>>, vector<18x32x128xbf16>,
    %c0_16 = arith.constant 0 : index
    %c0_17 = arith.constant 0 : index
    %c0_18 = arith.constant 0 : index
    %17 = vector.load %arg8[%c0_16, %c0_17, %c0_18] : memref<18x32x128xbf16, #tpu.memory_space<vmem>>, vector<16x16x128xbf16>
    %c0_19 = arith.constant 0 : index
    %c0_20 = arith.constant 0 : index
    %c0_21 = arith.constant 0 : index
    %18 = vector.load %arg9[%c0_19, %c0_20, %c0_21] : memref<16x16x1152xbf16, #tpu.memory_space<vmem>>, vector<16x16x128xbf16>
    tpu.vector_store %arg9[%c0_19, %c0_20, %c0_21], %17 {strides = array<i32>} : memref<16x16x1152xbf16, #tpu.memory_space<vmem>>, vector<16x16x128xbf16>,
    %c0_22 = arith.constant 0 : index
    %c1 = arith.constant 1 : index
    %c0_23 = arith.constant 0 : index
    %19 = vector.load %arg8[%c0_22, %c1, %c0_23] : memref<18x32x128xbf16, #tpu.memory_space<vmem>>, vector<16x16x128xbf16>
    %c0_24 = arith.constant 0 : index
    %c0_25 = arith.constant 0 : index
    %c128 = arith.constant 128 : index
    %20 = vector.load %arg9[%c0_24, %c0_25, %c128] : memref<16x16x1152xbf16, #tpu.memory_space<vmem>>, vector<16x16x128xbf16>
    tpu.vector_store %arg9[%c0_24, %c0_25, %c128], %19 {strides = array<i32>} : memref<16x16x1152xbf16, #tpu.memory_space<vmem>>, vector<16x16x128xbf16>,
    %c0_26 = arith.constant 0 : index
    %c2 = arith.constant 2 : index
    %c0_27 = arith.constant 0 : index
    %21 = vector.load %arg8[%c0_26, %c2, %c0_27] : memref<18x32x128xbf16, #tpu.memory_space<vmem>>, vector<16x16x128xbf16>
    %c0_28 = arith.constant 0 : index
    %c0_29 = arith.constant 0 : index
    %c256 = arith.constant 256 : index
    %22 = vector.load %arg9[%c0_28, %c0_29, %c256] : memref<16x16x1152xbf16, #tpu.memory_space<vmem>>, vector<16x16x128xbf16>
    tpu.vector_store %arg9[%c0_28, %c0_29, %c256], %21 {strides = array<i32>} : memref<16x16x1152xbf16, #tpu.memory_space<vmem>>, vector<16x16x128xbf16>,
    %c1_30 = arith.constant 1 : index
    %c0_31 = arith.constant 0 : index
    %c0_32 = arith.constant 0 : index
    %23 = vector.load %arg8[%c1_30, %c0_31, %c0_32] : memref<18x32x128xbf16, #tpu.memory_space<vmem>>, vector<16x16x128xbf16>
    %c0_33 = arith.constant 0 : index
    %c0_34 = arith.constant 0 : index
    %c384 = arith.constant 384 : index
    %24 = vector.load %arg9[%c0_33, %c0_34, %c384] : memref<16x16x1152xbf16, #tpu.memory_space<vmem>>, vector<16x16x128xbf16>
    tpu.vector_store %arg9[%c0_33, %c0_34, %c384], %23 {strides = array<i32>} : memref<16x16x1152xbf16, #tpu.memory_space<vmem>>, vector<16x16x128xbf16>,
    %c1_35 = arith.constant 1 : index
    %c1_36 = arith.constant 1 : index
    %c0_37 = arith.constant 0 : index
    %25 = vector.load %arg8[%c1_35, %c1_36, %c0_37] : memref<18x32x128xbf16, #tpu.memory_space<vmem>>, vector<16x16x128xbf16>
    %c0_38 = arith.constant 0 : index
    %c0_39 = arith.constant 0 : index
    %c512 = arith.constant 512 : index
    %26 = vector.load %arg9[%c0_38, %c0_39, %c512] : memref<16x16x1152xbf16, #tpu.memory_space<vmem>>, vector<16x16x128xbf16>
    tpu.vector_store %arg9[%c0_38, %c0_39, %c512], %25 {strides = array<i32>} : memref<16x16x1152xbf16, #tpu.memory_space<vmem>>, vector<16x16x128xbf16>,
    %c1_40 = arith.constant 1 : index
    %c2_41 = arith.constant 2 : index
    %c0_42 = arith.constant 0 : index
    %27 = vector.load %arg8[%c1_40, %c2_41, %c0_42] : memref<18x32x128xbf16, #tpu.memory_space<vmem>>, vector<16x16x128xbf16>
    %c0_43 = arith.constant 0 : index
    %c0_44 = arith.constant 0 : index
    %c640 = arith.constant 640 : index
    %28 = vector.load %arg9[%c0_43, %c0_44, %c640] : memref<16x16x1152xbf16, #tpu.memory_space<vmem>>, vector<16x16x128xbf16>
    tpu.vector_store %arg9[%c0_43, %c0_44, %c640], %27 {strides = array<i32>} : memref<16x16x1152xbf16, #tpu.memory_space<vmem>>, vector<16x16x128xbf16>,
    %c2_45 = arith.constant 2 : index
    %c0_46 = arith.constant 0 : index
    %c0_47 = arith.constant 0 : index
    %29 = vector.load %arg8[%c2_45, %c0_46, %c0_47] : memref<18x32x128xbf16, #tpu.memory_space<vmem>>, vector<16x16x128xbf16>
    %c0_48 = arith.constant 0 : index
    %c0_49 = arith.constant 0 : index
    %c768 = arith.constant 768 : index
    %30 = vector.load %arg9[%c0_48, %c0_49, %c768] : memref<16x16x1152xbf16, #tpu.memory_space<vmem>>, vector<16x16x128xbf16>
    tpu.vector_store %arg9[%c0_48, %c0_49, %c768], %29 {strides = array<i32>} : memref<16x16x1152xbf16, #tpu.memory_space<vmem>>, vector<16x16x128xbf16>,
    %c2_50 = arith.constant 2 : index
    %c1_51 = arith.constant 1 : index
    %c0_52 = arith.constant 0 : index
    %31 = vector.load %arg8[%c2_50, %c1_51, %c0_52] : memref<18x32x128xbf16, #tpu.memory_space<vmem>>, vector<16x16x128xbf16>
    %c0_53 = arith.constant 0 : index
    %c0_54 = arith.constant 0 : index
    %c896 = arith.constant 896 : index
    %32 = vector.load %arg9[%c0_53, %c0_54, %c896] : memref<16x16x1152xbf16, #tpu.memory_space<vmem>>, vector<16x16x128xbf16>
    tpu.vector_store %arg9[%c0_53, %c0_54, %c896], %31 {strides = array<i32>} : memref<16x16x1152xbf16, #tpu.memory_space<vmem>>, vector<16x16x128xbf16>,
    %c2_55 = arith.constant 2 : index
    %c2_56 = arith.constant 2 : index
    %c0_57 = arith.constant 0 : index
    %33 = vector.load %arg8[%c2_55, %c2_56, %c0_57] : memref<18x32x128xbf16, #tpu.memory_space<vmem>>, vector<16x16x128xbf16>
    %c0_58 = arith.constant 0 : index
    %c0_59 = arith.constant 0 : index
    %c1024 = arith.constant 1024 : index
    %34 = vector.load %arg9[%c0_58, %c0_59, %c1024] : memref<16x16x1152xbf16, #tpu.memory_space<vmem>>, vector<16x16x128xbf16>
    tpu.vector_store %arg9[%c0_58, %c0_59, %c1024], %33 {strides = array<i32>} : memref<16x16x1152xbf16, #tpu.memory_space<vmem>>, vector<16x16x128xbf16>,
    %c0_60 = arith.constant 0 : index
    %c0_61 = arith.constant 0 : index
    %c0_62 = arith.constant 0 : index
    %35 = vector.load %arg9[%c0_60, %c0_61, %c0_62] : memref<16x16x1152xbf16, #tpu.memory_space<vmem>>, vector<16x16x1152xbf16>
    %36 = vector.shape_cast %35 : vector<16x16x1152xbf16> to vector<256x1152xbf16>
    %c0_63 = arith.constant 0 : index
    %c0_64 = arith.constant 0 : index
    %37 = vector.load %arg5[%c0_63, %c0_64] : memref<1152x128xbf16, #tpu.memory_space<vmem>>, vector<1152x128xbf16>
    %cst_65 = arith.constant dense<0.000000e+00> : vector<256x128xf32>
    %38 = tpu.matmul %36, %37, %cst_65 {dimension_numbers = #tpu.dot_dimension_numbers<[1], [0], [0], [1], [0, 0, 1, 1], [], []>} : vector<256x1152xbf16>, vector<1152x128xbf16>, vector<256x128xf32> -> vector<256x128xf32>
    %39 = vector.broadcast %1 : vector<1x128xf32> to vector<256x128xf32>
    %40 = arith.addf %38, %39 : vector<256x128xf32>
    %cst_66 = arith.constant 0.000000e+00 : f32
    %cst_67 = arith.constant 6.000000e+00 : f32
    %41 = vector.broadcast %cst_66 : f32 to vector<256x128xf32>
    %42 = arith.maximumf %41, %40 : vector<256x128xf32>
    %43 = vector.broadcast %cst_67 : f32 to vector<256x128xf32>
    %44 = arith.minimumf %43, %42 : vector<256x128xf32>
    %45 = vector.shape_cast %44 : vector<256x128xf32> to vector<16x16x128xf32>
    %c0_68 = arith.constant 0 : index
    %c0_69 = arith.constant 0 : index
    %c0_70 = arith.constant 0 : index
    %c0_71 = arith.constant 0 : index
    %46 = vector.load %arg7[%c0_68, %c0_69, %c0_70, %c0_71] : memref<1x16x16x128xf32, #tpu.memory_space<vmem>>, vector<1x16x16x128xf32>
    %47 = vector.shape_cast %46 : vector<1x16x16x128xf32> to vector<16x16x128xf32>
    %48 = vector.shape_cast %45 : vector<16x16x128xf32> to vector<1x16x16x128xf32>
    tpu.vector_store %arg7[%c0_68, %c0_69, %c0_70, %c0_71], %48 {strides = array<i32>} : memref<1x16x16x128xf32, #tpu.memory_space<vmem>>, vector<1x16x16x128xf32>,
    return
  }
  func.func @transform_0(%arg0: i32) -> (i32, i32, i32, i32) {
    %c0_i32 = arith.constant 0 : i32
    %c0_i32_0 = arith.constant 0 : i32
    %c0_i32_1 = arith.constant 0 : i32
    %c0_i32_2 = arith.constant 0 : i32
    return %arg0, %c0_i32, %c0_i32_0, %c0_i32_1 : i32, i32, i32, i32
  }
  func.func @transform_1(%arg0: i32) -> (i32, i32, i32, i32) {
    %c0_i32 = arith.constant 0 : i32
    %c0_i32_0 = arith.constant 0 : i32
    %c0_i32_1 = arith.constant 0 : i32
    %c0_i32_2 = arith.constant 0 : i32
    return %arg0, %c0_i32, %c0_i32_0, %c0_i32_1 : i32, i32, i32, i32
  }
  func.func @transform_2(%arg0: i32) -> (i32, i32) {
    %c0_i32 = arith.constant 0 : i32
    %c0_i32_0 = arith.constant 0 : i32
    %c0_i32_1 = arith.constant 0 : i32
    return %c0_i32, %c0_i32_0 : i32, i32
  }
  func.func @transform_3(%arg0: i32) -> (i32, i32) {
    %c0_i32 = arith.constant 0 : i32
    %c0_i32_0 = arith.constant 0 : i32
    %c0_i32_1 = arith.constant 0 : i32
    return %c0_i32, %c0_i32_0 : i32, i32
  }
  func.func @transform_4(%arg0: i32) -> (i32, i32) {
    %c0_i32 = arith.constant 0 : i32
    %c0_i32_0 = arith.constant 0 : i32
    %c0_i32_1 = arith.constant 0 : i32
    return %c0_i32, %c0_i32_0 : i32, i32
  }
  func.func @transform_5(%arg0: i32) -> (i32, i32) {
    %c0_i32 = arith.constant 0 : i32
    %c0_i32_0 = arith.constant 0 : i32
    %c0_i32_1 = arith.constant 0 : i32
    return %c0_i32, %c0_i32_0 : i32, i32
  }
  func.func @transform_6(%arg0: i32) -> (i32, i32, i32, i32) {
    %c0_i32 = arith.constant 0 : i32
    %c0_i32_0 = arith.constant 0 : i32
    %c0_i32_1 = arith.constant 0 : i32
    %c0_i32_2 = arith.constant 0 : i32
    return %arg0, %c0_i32, %c0_i32_0, %c0_i32_1 : i32, i32, i32, i32
  }
}

</mosaic_0001>

<bundles_post_ra>
// kernel: wf_forward.1
= control target key start
LH: loop header
LB: loop body
LE: loop exit
PB: predicated region body
PF: predicated region fallthrough
CT: control target
= control target key end

     0   :  { %11 = vsyncpa [#allocation5], 0  ;;  %s6743_s0 = inlined_call_operand.vmem [shape: bf16[2,18,32,128], index: 0, kind: input, shape index: {}]   ;;  %s6744_s1 = inlined_call_operand.vmem [shape: bf16[2,18,32,128], index: 1, kind: input, shape index: {}]   ;;  %s6745_s2 = inlined_call_operand.vmem [shape: bf16[128,128], index: 2, kind: input, shape index: {}]   ;;  %s6746_s3 = inlined_call_operand.vmem [shape: f32[1,128], index: 3, kind: input, shape index: {}]   ;;  %s6747_s4 = inlined_call_operand.vmem [shape: bf16[1152,128], index: 4, kind: input, shape index: {}]   ;;  %s6748_s5 = inlined_call_operand.vmem [shape: f32[1,128], index: 5, kind: input, shape index: {}]   ;;  %s6749_s6 = inlined_call_operand.hbm [shape: f32[2,16,16,128], index: 6, kind: output, shape index: {}]  }
   0x1   :  { %13 = vsyncpa [#allocation5 + $0x1], 0  ;;  %s5479_s21 = smov 0   ;;  %s5481_s22 = smov 0  }
   0x2   :  { %s5483_s23 = smov 0   ;;  %s5485_s24 = smov 0  }
   0x3 LB: > { %s5500_s25 = sadd.s32 4294967295, %s5439_s24   ;;  %s4255_s26 = sadd.s32 4294967294, %s5439_s24   ;;  %s5439_s24 = sphi %s5485_s24, %s6839_s24   ;;  %s5435_s23 = sphi %s5483_s23, %s6838_s23   ;;  %s5431_s22 = sphi %s5481_s22, %s6837_s22   ;;  %s5427_s21 = sphi %s5479_s21, %s6836_s21  }
   0x4   : > { %s5504_s27 = sadd.s32 1, %s5439_s24   ;;  %s162_s28 = sadd.s32 1, %s5435_s23 }
   0x5   : > { %s159_s29 = ssub.s32 %s5439_s24, %s5504_s27  ;;  %p172_p0 = scmp.ne.s32.totalorder %s5435_s23, %s5431_s22 }
   0x6   : > { %p160_p1 = scmp.eq.s32.totalorder %s159_s29, 0  ;;  %p173_p2 = scmp.eq.s32.totalorder %s5500_s25, 1 }
   0x7   : > { %p178_p3 = scmp.ne.s32.totalorder %s5431_s22, %s5427_s21  ;;  %p179_p4 = scmp.eq.s32.totalorder %s4255_s26, 1 }
   0x8   : > { %s5515_s30 = scalar_select %p160_p1, %s5435_s23, %s162_s28  }
   0x9   : > { %p5517_p5 = por %p173_p2, %p172_p0  ;;  %p5521_p6 = por %p179_p4, %p178_p3 }
   0xa   : > { %p4258_p7 = scmp.ge.s32.totalorder %s5439_s24, 1  ;;  %p225_p8 = scmp.lt.s32.totalorder %s5439_s24, 3 }
   0xc   : > { %p226_p9 = pnand %p4258_p7, %p225_p8 }
   0xe   : > { %229 = sbr.rel (%p226_p9) target bundleno = 903 (0x387), region = 44 }
  0x15   : > { %v5259_v0 = vld [vmem:[%s6745_s2] sm:$0xff]   ;;  %p260_p10 = scmp.lt.s32.totalorder %s5500_s25, 1  ;;  %v5260_v1 = vld [vmem:[%s6745_s2 + $0x8] sm:$0xff]   ;;  %v5261_v2 = vld [vmem:[%s6745_s2 + $0x10] sm:$0xff]   ;;  %vm1304_vm0 = vsmask.f32 7424 }
  0x16   : > { %5081 = vmatprep.subr.bf16.mxu0 %v5259_v0  ;;  %v5262_v3 = vld [vmem:[%s6745_s2 + $0x18] sm:$0xff]   ;;  %v5263_v5 = vld [vmem:[%s6745_s2 + $0x20] sm:$0xff]   ;;  %v5264_v6 = vld [vmem:[%s6745_s2 + $0x28] sm:$0xff]   ;;  %vm1593_vm1 = vcmask 1046528   ;;  %s257_s29 = sand.u32 1, %s5431_s22   ;;  %s4385_s12 = sshll.u32 %s5500_s25, 12 }
  0x17   : > { %s5535_s13 = scalar_select %p260_p10, %s5500_s25, 1  ;;  %5082 = vmatpush3.bf16.msra.mxu0 %v5259_v0  ;;  %v5265_v7 = vld [vmem:[%s6745_s2 + $0x30] sm:$0xff]   ;;  %v5266_v8 = vld [vmem:[%s6745_s2 + $0x38] sm:$0xff]   ;;  %v5301_v13 = vld [vmem:[%s6747_s4 + $0x40] sm:$0xff]  }
  0x18   : > { %5083 = vmatprep.subr.bf16.mxu0 %v5260_v1  ;;  %v5302_v14 = vld [vmem:[%s6747_s4] sm:$0xff]   ;;  %4609 = vmatprep.subr.bf16.mxu1 %v5301_v13  ;;  %v5303_v16 = vld [vmem:[%s6747_s4 + $0x48] sm:$0xff]   ;;  %v5305_v19 = vld [vmem:[%s6747_s4 + $0x50] sm:$0xff]   ;;  %s4259_s9 = sshll.u32 %s257_s29, 8  ;;  %s6702_s15 = scalar_lea.sflag [#allocation5], %s257_s29 }
  0x19   : > { %s5217_s16 = smul.u32 288, %s5535_s13  ;;  %4610 = vmatpush3.bf16.msra.mxu1 %v5302_v14  ;;  %v5304_v18 = vld [vmem:[%s6747_s4 + $0x8] sm:$0xff]   ;;  %v5306_v20 = vld [vmem:[%s6747_s4 + $0x140] sm:$0xff]   ;;  %v5307_v38 = vld [vmem:[%s6747_s4 + $0x10] sm:$0xff]   ;;  %s6597_s10 = scalar_lea.vmem [#allocation4], %s4259_s9 }
  0x1a   : > { %4611 = vmatprep.subr.bf16.mxu1 %v5303_v16  ;;  %v5308_v37 = vld [vmem:[%s6747_s4 + $0x100] sm:$0xff]   ;;  %v5310_v39 = vld [vmem:[%s6747_s4 + $0x148] sm:$0xff]   ;;  %v5309_v40 = vld [vmem:[%s6747_s4 + $0x58] sm:$0xff]   ;;  %s4181_s14 = sshll.u32 %s6597_s10, 4  ;;  %s5441_s17 = smov [#allocation4]   ;;  %s6696_s14 = int_to_ptr.vmem [resolvable:$true] %s4181_s14 }
  0x1b   : > { %s5546_s19 = scalar_lea.vmem %s6743_s0, %s5217_s16  ;;  %5084 = vmatpush3.bf16.msra.mxu0 %v5260_v1  ;;  %v5312_v41 = vld [vmem:[%s6747_s4 + $0x108] sm:$0xff]   ;;  %v5311_v42 = vld [vmem:[%s6747_s4 + $0x18] sm:$0xff]   ;;  %v5314_v45 = vld [vmem:[%s6747_s4 + $0x150] sm:$0xff]   ;;  %s5703_s11 = scalar_lea.vmem %s6744_s1, %s5217_s16 }
  0x1c   : > { %5085 = vmatprep.subr.bf16.mxu0 %v5261_v2  ;;  %v5267_v4 = vld [vmem:[%s5546_s19] sm:$0xff]   ;;  %v5268_v9 = vld [vmem:[%s5546_s19 + $0x8] sm:$0xff]   ;;  %v5269_v10 = vld [vmem:[%s5546_s19 + $0x10] sm:$0xff]   ;;  %s6694_s16 = scalar_lea.hbm %s6749_s6, %s4385_s12  ;;  %s5377_s25 = scalar_lea.vmem %s6696_s14, 4096 }
  0x1d   : > { %5097 = vmatprep.mubr.bf16.mxu0 %v5267_v4  ;;  %v5270_v11 = vld [vmem:[%s5546_s19 + $0x18] sm:$0xff]   ;;  %v5271_v12 = vld [vmem:[%s5546_s19 + $0x20] sm:$0xff]   ;;  %v5272_v15 = vld [vmem:[%s5546_s19 + $0x28] sm:$0xff]   ;;  %4612 = vmatpush3.bf16.msra.mxu1 %v5304_v18  ;;  %p5378_p11 = scmp.ne.s32.totalorder %s6696_s14, %s5377_s25  ;;  %s5381_s18 = sshll.u32 %s5441_s17, 4  ;;  %s5382_s18 = int_to_ptr.vmem [resolvable:$false] %s5381_s18 }
  0x1e   : > { %v5273_v17 = vld [vmem:[%s5546_s19 + $0x30] sm:$0xff]   ;;  %4613 = vmatprep.subr.bf16.mxu1 %v5305_v19  ;;  %v5274_v21 = vld [vmem:[%s5546_s19 + $0x38] sm:$0xff]   ;;  %v5275_v22 = vld [vmem:[%s5546_s19 + $0x40] sm:$0xff]   ;;  %s5383_s20 = scalar_lea.vmem %s5382_s18, 8192  ;;  %p5384_p0 = scmp.lt.s32.totalorder %s6696_s14, %s5382_s18 }
  0x1f   : > { %5086 = vmatpush3.bf16.msra.mxu0 %v5261_v2  ;;  %v5276_v23 = vld [vmem:[%s5546_s19 + $0x48] sm:$0xff]   ;;  %v5277_v24 = vld [vmem:[%s5546_s19 + $0x50] sm:$0xff]   ;;  %v5278_v25 = vld [vmem:[%s5546_s19 + $0x58] sm:$0xff]   ;;  %p5379_p12 = pnand %p5378_p11, %p5517_p5  ;;  %p5385_p1 = scmp.lt.s32.totalorder %s5383_s20, %s5377_s25 }
  0x20   : > { %5087 = vmatprep.subr.bf16.mxu0 %v5262_v3  ;;  %v5279_v26 = vld [vmem:[%s5546_s19 + $0x60] sm:$0xff]   ;;  %v5280_v27 = vld [vmem:[%s5546_s19 + $0x68] sm:$0xff]   ;;  %v5281_v28 = vld [vmem:[%s5546_s19 + $0x70] sm:$0xff]  }
  0x21   : > { %v5282_v29 = vld [vmem:[%s5546_s19 + $0x78] sm:$0xff]   ;;  %v5283_v30 = vld [vmem:[%s5546_s19 + $0x80] sm:$0xff]   ;;  %v5284_v31 = vld [vmem:[%s5546_s19 + $0x88] sm:$0xff]   ;;  %4614 = vmatpush3.bf16.msra.mxu1 %v5307_v38  ;;  %p5380_p13 = pneg %p5379_p12  ;;  %p5386_p2 = por %p5385_p1, %p5384_p0 }
  0x22   : > { %v5285_v32 = vld [vmem:[%s5546_s19 + $0x90] sm:$0xff]   ;;  %v5286_v33 = vld [vmem:[%s5546_s19 + $0x98] sm:$0xff]   ;;  %v5287_v34 = vld [vmem:[%s5546_s19 + $0xa0] sm:$0xff]   ;;  %4615 = vmatprep.subr.bf16.mxu1 %v5309_v40 }
  0x23   : > { %5088 = vmatpush3.bf16.msra.mxu0 %v5262_v3  ;;  %v5288_v35 = vld [vmem:[%s5546_s19 + $0xa8] sm:$0xff]   ;;  %v5289_v36 = vld [vmem:[%s5546_s19 + $0xb0] sm:$0xff]   ;;  %v5290_v43 = vld [vmem:[%s5546_s19 + $0xb8] sm:$0xff]   ;;  %p5387_p3 = pnand %p5386_p2, %p5380_p13 }
  0x24   : > { %5089 = vmatprep.subr.bf16.mxu0 %v5263_v5  ;;  %v5291_v44 = vld [vmem:[%s5546_s19 + $0xc0] sm:$0xff]   ;;  %v5316_v47 = vld [vmem:[%s6747_s4 + $0x110] sm:$0xff]   ;;  %v5318_v49 = vld [vmem:[%s6747_s4 + $0x158] sm:$0xff]  }
  0x25   : > { %4616 = vmatpush3.bf16.msra.mxu1 %v5311_v42  ;;  %v5313_v46 = vld [vmem:[%s6747_s4 + $0x60] sm:$0xff]   ;;  %v5317_v50 = vld [vmem:[%s6747_s4 + $0x68] sm:$0xff]   ;;  %v5320_v51 = vld [vmem:[%s6747_s4 + $0x118] sm:$0xff]  }
  0x26   : > { %v5315_v48 = vld [vmem:[%s6747_s4 + $0x20] sm:$0xff]   ;;  %4617 = vmatprep.subr.bf16.mxu1 %v5313_v46  ;;  %v5319_v52 = vld [vmem:[%s6747_s4 + $0x28] sm:$0xff]   ;;  %v5293_v54 = vld [vmem:[%s5546_s19 + $0xd0] sm:$0xff]  }
  0x27   : > { %5090 = vmatpush3.bf16.msra.mxu0 %v5263_v5  ;;  %v5292_v53 = vld [vmem:[%s5546_s19 + $0xc8] sm:$0xff]   ;;  %v5322_v55 = vld [vmem:[%s6747_s4 + $0x160] sm:$0xff]   ;;  %v5321_v56 = vld [vmem:[%s6747_s4 + $0x70] sm:$0xff]  }
  0x28   : > { %5091 = vmatprep.subr.bf16.mxu0 %v5264_v6  ;;  %v5324_v57 = vld [vmem:[%s6747_s4 + $0x120] sm:$0xff]   ;;  %v5323_v58 = vld [vmem:[%s6747_s4 + $0x30] sm:$0xff]   ;;  %v5326_v59 = vld [vmem:[%s6747_s4 + $0x168] sm:$0xff]  }
  0x29   : > { %4618 = vmatpush3.bf16.msra.mxu1 %v5315_v48  ;;  %v5325_v60 = vld [vmem:[%s6747_s4 + $0x78] sm:$0xff]   ;;  %v5328_v61 = vld [vmem:[%s6747_s4 + $0x128] sm:$0xff]   ;;  %v5295_v0 = vld [vmem:[%s5546_s19 + $0xe0] sm:$0xff]  }
  0x2a   : > { %4619 = vmatprep.subr.bf16.mxu1 %v5317_v50  ;;  %v5327_v62 = vld [vmem:[%s6747_s4 + $0x38] sm:$0xff]   ;;  %v5332_v1 = vld [vmem:[%s6747_s4 + $0x170] sm:$0xff]   ;;  %v5331_v5 = vld [vmem:[%s6747_s4 + $0xc0] sm:$0xff]  }
  0x2b   : > { %5092 = vmatpush3.bf16.msra.mxu0 %v5264_v6  ;;  %v5294_v63 = vld [vmem:[%s5546_s19 + $0xd8] sm:$0xff]   ;;  %v5334_v2 = vld [vmem:[%s6747_s4 + $0x130] sm:$0xff]   ;;  %v5296_v6 = vld [vmem:[%s5546_s19 + $0xe8] sm:$0xff]  }
  0x2c   : > { %5093 = vmatprep.subr.bf16.mxu0 %v5265_v7  ;;  %v5335_v3 = vld [vmem:[%s6747_s4 + $0x178] sm:$0xff]   ;;  %v4530_v13 = vld [vmem:[%s5703_s11 + $0x8] sm:$0xff]   ;;  %v4387_v14 = vld [vmem:[%s5703_s11] sm:$0xff]  }
  0x2d   : > { %4620 = vmatpush3.bf16.msra.mxu1 %v5319_v52  ;;  %v5336_v4 = vld [vmem:[%s6747_s4 + $0x138] sm:$0xff]   ;;  %v4392_v16 = vunpack.c.l.bf16 %v4530_v13  ;;  %v5715_v18 = vld [vmem:[%s6746_s3] ss:$0 sm:$0xff]  ;;  %v4388_v19 = vunpack.c.l.bf16 %v4387_v14  ;;  %v4534_v46 = vld [vmem:[%s5703_s11 + $0x28] sm:$0xff]  }
  0x2e   : > { %4621 = vmatprep.subr.bf16.mxu1 %v5321_v56  ;;  %v4533_v48 = vld [vmem:[%s5703_s11 + $0x20] sm:$0xff]  }
  0x2f   : > { %5094 = vmatpush3.bf16.msra.mxu0 %v5265_v7  ;;  %v5297_v7 = vld [vmem:[%s5546_s19 + $0xf0] sm:$0xff]  }
  0x30   : > { %5095 = vmatprep.subr.bf16.mxu0 %v5266_v8 }
  0x31   : > { %4622 = vmatpush3.bf16.msra.mxu1 %v5323_v58  ;;  %v4404_v58 = vunpack.c.l.bf16 %v4533_v48 }
  0x32   : > { %4623 = vmatprep.subr.bf16.mxu1 %v5325_v60 }
  0x33   : > { %5096 = vmatpush3.bf16.msra.mxu0 %v5266_v8  ;;  %v5298_v8 = vld [vmem:[%s5546_s19 + $0xf8] sm:$0xff]  }
  0x34   : > { %4833 = vmatprep.subr.bf16.mxu0 %v5306_v20  ;;  %v4389_v20 = vunpack.c.h.bf16 %v4387_v14 }
  0x35   : > { %4624 = vmatpush3.bf16.msra.mxu1 %v5327_v62 }
  0x36   : > { %5098 = vmatmul.mubr.bf16.vlgmr.msra.gmra.mrb[0].mxu0 %v5268_v9  ;;  %4721 = vmatprep.subr.bf16.mxu1 %v5331_v5  ;;  %v5299_v9 = vld [vmem:[%s5546_s19 + $0x100] sm:$0xff]  }
  0x37   : > { %5101 = vmatprep.mubr.bf16.mxu0 %v5269_v10  ;;  %4834 = vmatpush3.bf16.msra.mxu0 %v5308_v37  ;;  %v5300_v10 = vld [vmem:[%s5546_s19 + $0x108] sm:$0xff]  }
  0x38   : > { %4835 = vmatprep.subr.bf16.mxu0 %v5310_v39 }
  0x3b   : > { %4836 = vmatpush3.bf16.msra.mxu0 %v5312_v41 }
  0x3c   : > { %4837 = vmatprep.subr.bf16.mxu0 %v5314_v45 }
  0x3e   : > { %5102 = vmatmul.mubr.bf16.gmra.mrb[4].mxu0 %v5270_v11  ;;  %v5329_v11 = vld [vmem:[%s5546_s19 + $0x110] sm:$0xff]  }
  0x3f   : > { %5105 = vmatprep.mubr.bf16.mxu0 %v5271_v12  ;;  %4838 = vmatpush3.bf16.msra.mxu0 %v5316_v47  ;;  %v5330_v12 = vld [vmem:[%s5546_s19 + $0x118] sm:$0xff]  }
  0x40   : > { %4839 = vmatprep.subr.bf16.mxu0 %v5318_v49 }
  0x43   : > { %4840 = vmatpush3.bf16.msra.mxu0 %v5320_v51 }
  0x44   : > { %4841 = vmatprep.subr.bf16.mxu0 %v5322_v55  ;;  %v4409_v55 = vunpack.c.h.bf16 %v4534_v46 }
  0x46   : > { %5106 = vmatmul.mubr.bf16.gmra.mrb[8].mxu0 %v5272_v15  ;;  %v5710_v15 = vld [vmem:[%s6747_s4 + $0x200] sm:$0xff]  }
  0x47   : > { %5109 = vmatprep.mubr.bf16.mxu0 %v5273_v17  ;;  %4842 = vmatpush3.bf16.msra.mxu0 %v5324_v57  ;;  %v4393_v17 = vunpack.c.h.bf16 %v4530_v13 }
  0x48   : > { %4843 = vmatprep.subr.bf16.mxu0 %v5326_v59  ;;  %v4405_v59 = vunpack.c.h.bf16 %v4533_v48 }
  0x4b   : > { %4844 = vmatpush3.bf16.msra.mxu0 %v5328_v61 }
  0x4c   : > { %4845 = vmatprep.subr.bf16.mxu0 %v5332_v1  ;;  %v522_v1 = vmul.f32 %v4409_v55, %v5715_v18 }
  0x4e   : > { %5110 = vmatmul.mubr.bf16.gmra.mrb[12].mxu0 %v5274_v21  ;;  %v513_v21 = vmul.f32 %v4392_v16, %v5715_v18  ;;  %v5333_v16 = vld [vmem:[%s6747_s4 + $0x80] sm:$0xff]  }
  0x4f   : > { %5113 = vmatprep.mubr.bf16.mxu0 %v5275_v22  ;;  %4846 = vmatpush3.bf16.msra.mxu0 %v5334_v2  ;;  %v514_v22 = vmul.f32 %v4393_v17, %v5715_v18 }
  0x50   : > { %4847 = vmatprep.subr.bf16.mxu0 %v5335_v3 }
  0x53   : > { %4848 = vmatpush3.bf16.msra.mxu0 %v5336_v4  ;;  %v4536_v4 = vld [vmem:[%s5703_s11 + $0x38] sm:$0xff]  }
  0x54   : > { %5169 = vmatprep.subr.bf16.mxu0 %v5710_v15  ;;  %v4416_v14 = vunpack.c.l.bf16 %v4536_v4  ;;  %v4417_v17 = vunpack.c.h.bf16 %v4536_v4 }
  0x56   : > { %5114 = vmatmul.mubr.bf16.gmra.mrb[16].mxu0 %v5276_v23 }
  0x57   : > { %5117 = vmatprep.mubr.bf16.mxu0 %v5277_v24  ;;  %v511_v24 = vmul.f32 %v4388_v19, %v5715_v18 }
  0x5e   : > { %5118 = vmatmul.mubr.bf16.gmra.mrb[20].mxu0 %v5278_v25  ;;  %v512_v25 = vmul.f32 %v4389_v20, %v5715_v18 }
  0x5f   : > { %5121 = vmatprep.mubr.bf16.mxu0 %v5279_v26  ;;  %v4532_v26 = vld [vmem:[%s5703_s11 + $0x18] sm:$0xff]  }
  0x66   : > { %5122 = vmatmul.mubr.bf16.gmra.mrb[24].mxu0 %v5280_v27 }
  0x67   : > { %5125 = vmatprep.mubr.bf16.mxu0 %v5281_v28  ;;  %v4531_v28 = vld [vmem:[%s5703_s11 + $0x10] sm:$0xff]  }
  0x68   : > { %v4396_v37 = vunpack.c.l.bf16 %v4531_v28  ;;  %v4397_v38 = vunpack.c.h.bf16 %v4531_v28 }
  0x6a   : > { %v516_v45 = vmul.f32 %v4397_v38, %v5715_v18 }
  0x6e   : > { %5126 = vmatmul.mubr.bf16.gmra.mrb[28].mxu0 %v5282_v29 }
  0x6f   : > { %5129 = vmatprep.mubr.bf16.mxu0 %v5283_v30 }
  0x76   : > { %5130 = vmatmul.mubr.bf16.gmra.mrb[32].mxu0 %v5284_v31 }
  0x77   : > { %5133 = vmatprep.mubr.bf16.mxu0 %v5285_v32 }
  0x7e   : > { %5134 = vmatmul.mubr.bf16.gmra.mrb[36].mxu0 %v5286_v33  ;;  %v4400_v33 = vunpack.c.l.bf16 %v4532_v26 }
  0x7f   : > { %5137 = vmatprep.mubr.bf16.mxu0 %v5287_v34  ;;  %v4401_v34 = vunpack.c.h.bf16 %v4532_v26 }
  0x80   : > { %v517_v41 = vmul.f32 %v4400_v33, %v5715_v18 }
  0x81   : > { %v518_v42 = vmul.f32 %v4401_v34, %v5715_v18  ;;  %v525_v34 = vmul.f32 %v4416_v14, %v5715_v18 }
  0x86   : > { %5138 = vmatmul.mubr.bf16.gmra.mrb[40].mxu0 %v5288_v35 }
  0x87   : > { %5141 = vmatprep.mubr.bf16.mxu0 %v5289_v36 }
  0x8e   : > { %5142 = vmatmul.mubr.bf16.gmra.mrb[44].mxu0 %v5290_v43 }
  0x8f   : > { %5145 = vmatprep.mubr.bf16.mxu0 %v5291_v44  ;;  %v515_v44 = vmul.f32 %v4396_v37, %v5715_v18 }
  0x96   : > { %5146 = vmatmul.mubr.bf16.gmra.mrb[48].mxu0 %v5292_v53 }
  0x97   : > { %5149 = vmatprep.mubr.bf16.mxu0 %v5293_v54  ;;  %v4408_v54 = vunpack.c.l.bf16 %v4534_v46 }
  0x9e   : > { %5150 = vmatmul.mubr.bf16.gmra.mrb[52].mxu0 %v5294_v63 }
  0x9f   : > { %5153 = vmatprep.mubr.bf16.mxu0 %v5295_v0  ;;  %v521_v0 = vmul.f32 %v4408_v54, %v5715_v18 }
  0xa6   : > { %5154 = vmatmul.mubr.bf16.gmra.mrb[56].mxu0 %v5296_v6  ;;  %v519_v6 = vmul.f32 %v4404_v58, %v5715_v18 }
  0xa7   : > { %5157 = vmatprep.mubr.bf16.mxu0 %v5297_v7  ;;  %v520_v7 = vmul.f32 %v4405_v59, %v5715_v18  ;;  %v5340_v59 = vld [vmem:[%s6747_s4 + $0x90] sm:$0xff]  }
  0xae   : > { %5158 = vmatmul.mubr.bf16.gmra.mrb[60].mxu0 %v5298_v8 }
  0xaf   : > { %5161 = vmatprep.mubr.bf16.mxu0 %v5299_v9 }
  0xb6   : > { %5162 = vmatmul.mubr.bf16.gmra.mrb[64].mxu0 %v5300_v10 }
  0xb7   : > { %5165 = vmatprep.mubr.bf16.mxu0 %v5329_v11  ;;  %v4535_v11 = vld [vmem:[%s5703_s11 + $0x30] sm:$0xff]  }
  0xb8   : > { %v4412_v26 = vunpack.c.l.bf16 %v4535_v11 }
  0xbe   : > { %5166 = vmatmul.mubr.bf16.gmra.mrb[68].mxu0 %v5330_v12 }
 0x109   : > { %v5099_v23 = vpop.f32.mrb[0].mxu0 }
 0x10a   : > { %v881_v27 = vpop.f32.mrb[1].mxu0  ;;  %v890_v30 = vadd.f32 %v5099_v23, %v513_v21  ;;  %v5337_v23 = vld [vmem:[%s6747_s4 + $0xc8] sm:$0xff]  }
 0x10b   : > { %v5100_v29 = vpop.f32.mrb[2].mxu0  ;;  %v882_v35 = vadd.f32 %v881_v27, %v511_v24  ;;  %v4413_v27 = vunpack.c.h.bf16 %v4535_v11  ;;  %v5343_v11 = vld [vmem:[%s6747_s4 + $0xe0] sm:$0xff]  }
 0x10c   : > { %v893_v31 = vadd.f32 %v5100_v29, %v514_v22  ;;  %v884_v32 = vpop.f32.mrb[3].mxu0 }
 0x10d   : > { %v885_v36 = vadd.f32 %v884_v32, %v512_v25  ;;  %v5339_v32 = vld [vmem:[%s6747_s4 + $0xd0] sm:$0xff]   ;;  %v524_v46 = vmul.f32 %v4413_v27, %v5715_v18 }
 0x10e   : > { %v1169_v39 = vpack.c.bf16 %v893_v31, %v890_v30  ;;  %v4538_v30 = vld [vmem:[%s5703_s11 + $0x48] sm:$0xff]  }
 0x10f   : > { %v1168_v40 = vpack.c.bf16 %v885_v36, %v882_v35  ;;  %v5338_v31 = vld [vmem:[%s6747_s4 + $0x88] sm:$0xff]   ;;  %v526_v35 = vmul.f32 %v4417_v17, %v5715_v18  ;;  %v4425_v58 = vunpack.c.h.bf16 %v4538_v30 }
 0x110   : > { %1205 = vst [vmem:[#allocation2 + $0x8] sm:$0xff] %v1169_v39 }
 0x111   : > { %1204 = vst [vmem:[#allocation2] sm:$0xff] %v1168_v40  ;;  %v5103_v43 = vpop.f32.mrb[4].mxu0  ;;  %v1308_v49 = vshll.u32 %v1168_v40, 16  ;;  %v1306_v2 = vshrl.u32 %v1168_v40, 16  ;;  %v530_v14 = vmul.f32 %v4425_v58, %v5715_v18 }
 0x112   : > { %v897_v47 = vpop.f32.mrb[5].mxu0  ;;  %v906_v51 = vadd.f32 %v5103_v43, %v517_v41 }
 0x113   : > { %v5104_v50 = vpop.f32.mrb[6].mxu0  ;;  %v898_v56 = vadd.f32 %v897_v47, %v515_v44  ;;  %v1310_v61 = vrot.slane %v1308_v49, 1 }
 0x114   : > { %v909_v52 = vadd.f32 %v5104_v50, %v518_v42  ;;  %v900_v53 = vpop.f32.mrb[7].mxu0 }
 0x115   : > { %v901_v57 = vadd.f32 %v900_v53, %v516_v45  ;;  %v1311_v9 = vor.u32 %v1310_v61, %v1306_v2  ;;  %v523_v45 = vmul.f32 %v4412_v26, %v5715_v18  ;;  %v5341_v2 = vld [vmem:[%s6747_s4 + $0xd8] sm:$0xff]  }
 0x116   : > { %v1171_v60 = vpack.c.bf16 %v909_v52, %v906_v51  ;;  %v4537_v52 = vld [vmem:[%s5703_s11 + $0x40] sm:$0xff]  }
 0x117   : > { %v5730_v62 = vpack.c.bf16 %v901_v57, %v898_v56  ;;  %v1273_v63 = vld [vmem:[#allocation2 + $0x8] sm:$0x1]  ;;  %v4424_v57 = vunpack.c.l.bf16 %v4538_v30 }
 0x118   : > { %1207 = vst [vmem:[#allocation2 + $0x18] sm:$0xff] %v1171_v60  ;;  %v1313_v3 = vshll.u32 %v1273_v63, 16  ;;  %v5350_v60 = vld [vmem:[%s6747_s4 + $0x208] sm:$0xff]  }
 0x119   : > { %1206 = vst [vmem:[#allocation2 + $0x10] sm:$0xff] %v5730_v62  ;;  %v5107_v5 = vpop.f32.mrb[8].mxu0  ;;  %v1320_v12 = vshll.u32 %v5730_v62, 16  ;;  %v1318_v41 = vshrl.u32 %v5730_v62, 16 }
 0x11a   : > { %v913_v8 = vpop.f32.mrb[9].mxu0  ;;  %v1315_v10 = vrot.slane %v1313_v3, 1  ;;  %v922_v19 = vadd.f32 %v5107_v5, %v521_v0  ;;  %v4420_v5 = vunpack.c.l.bf16 %v4537_v52 }
 0x11b   : > { %v5108_v13 = vpop.f32.mrb[10].mxu0  ;;  %v914_v24 = vadd.f32 %v913_v8, %v519_v6  ;;  %v1322_v29 = vrot.slane %v1320_v12, 1  ;;  %v4421_v6 = vunpack.c.h.bf16 %v4537_v52  ;;  %v5352_v12 = vld [vmem:[%s6747_s4 + $0x210] sm:$0xff]  }
 0x11c   : > { %v925_v20 = vadd.f32 %v5108_v13, %v522_v1  ;;  %v916_v21 = vpop.f32.mrb[11].mxu0  ;;  %v1316_v22 = vsel %vm1304_vm0, %v1311_v9, %v1315_v10  ;;  %v5778_v9 = vld [vmem:[%s5703_s11 + $0x58] sm:$0xff]  }
 0x11d   : > { %v917_v25 = vadd.f32 %v916_v21, %v520_v7  ;;  %3298 = vmatprep.mubr.bf16.mxu1 %v1316_v22  ;;  %v1323_v49 = vor.u32 %v1322_v29, %v1318_v41  ;;  %v5342_v10 = vld [vmem:[%s6747_s4 + $0x98] sm:$0xff]   ;;  %v528_v26 = vmul.f32 %v4421_v6, %v5715_v18 }
 0x11e   : > { %v1173_v28 = vpack.c.bf16 %v925_v20, %v922_v19  ;;  %3299 = vmatmul.mubr.bf16.vlgmr.msra.gmra.mrb[0].mxu1 %v1168_v40  ;;  %v5354_v41 = vld [vmem:[%s6747_s4 + $0x218] sm:$0xff]  }
 0x11f   : > { %v5754_v33 = vpack.c.bf16 %v917_v25, %v914_v24  ;;  %4722 = vmatpush3.bf16.msra.mxu1 %v5333_v16  ;;  %v1964_v36 = vld [vmem:[#allocation2 + $0x18] sm:$0x1]  ;;  %v527_v25 = vmul.f32 %v4420_v5, %v5715_v18 }
 0x120   : > { %v1275_v37 = vld [vmem:[#allocation2 + $0x18] sm:$0x1]  ;;  %1209 = vst [vmem:[#allocation2 + $0x28] sm:$0xff] %v1173_v28  ;;  %v1963_v39 = vld [vmem:[#allocation2 + $0x10] sm:$0xfe]  ;;  %v2028_v40 = vrot.slane %v1964_v36, 1  ;;  %4723 = vmatprep.subr.bf16.mxu1 %v5337_v23 }
 0x121   : > { %v1708_v38 = vld [vmem:[#allocation2 + $0x18] sm:$0x1]  ;;  %v1325_v42 = vshll.u32 %v1275_v37, 16  ;;  %1208 = vst [vmem:[#allocation2 + $0x20] sm:$0xff] %v5754_v33  ;;  %v5111_v44 = vpop.f32.mrb[12].mxu0  ;;  %v2027_v47 = vrot.slane %v1963_v39, 1  ;;  %v4433_v39 = vunpack.c.h.bf16 %v5778_v9 }
 0x122   : > { %v1747_v43 = vshll.u32 %v1708_v38, 16  ;;  %v929_v48 = vpop.f32.mrb[13].mxu0  ;;  %v1332_v53 = vshll.u32 %v5754_v33, 16  ;;  %v938_v54 = vadd.f32 %v5111_v44, %v525_v34  ;;  %v4432_v38 = vunpack.c.l.bf16 %v5778_v9 }
 0x123   : > { %v1327_v50 = vrot.slane %v1325_v42, 1  ;;  %v5112_v55 = vpop.f32.mrb[14].mxu0  ;;  %v2029_v56 = vsel %vm1593_vm1, %v2027_v47, %v2028_v40  ;;  %4724 = vmatpush3.bf16.msra.mxu1 %v5338_v31  ;;  %v930_v3 = vadd.f32 %v929_v48, %v523_v45  ;;  %v5344_v40 = vld [vmem:[%s6747_s4 + $0xa0] sm:$0xff]   ;;  %v534_v58 = vmul.f32 %v4433_v39, %v5715_v18 }
 0x124   : > { %v1749_v51 = vrot.slane %v1747_v43, 1  ;;  %v941_v61 = vadd.f32 %v5112_v55, %v526_v35  ;;  %v932_v63 = vpop.f32.mrb[15].mxu0  ;;  %3620 = vmatprep.mubr.bf16.mxu0 %v2029_v56  ;;  %4725 = vmatprep.subr.bf16.mxu1 %v5339_v32  ;;  %v1334_v8 = vrot.slane %v1332_v53, 1  ;;  %v4539_v32 = vld [vmem:[%s5703_s11 + $0x50] sm:$0xff]   ;;  %v5816_v53 = vld [vmem:[%s5703_s11 + $0x68] sm:$0xff]   ;;  %v5355_v56 = vld [vmem:[%s6747_s4 + $0x220] sm:$0xff]  }
 0x125   : > { %v1328_v0 = vsel %vm1304_vm0, %v1323_v49, %v1327_v50  ;;  %v933_v4 = vadd.f32 %v932_v63, %v524_v46  ;;  %v5345_v46 = vld [vmem:[%s6747_s4 + $0xe8] sm:$0xff]   ;;  %v4429_v50 = vunpack.c.h.bf16 %v4539_v32  ;;  %v5347_v55 = vld [vmem:[%s6747_s4 + $0xf0] sm:$0xff]  }
 0x126   : > { %v1750_v1 = vsel %vm1304_vm0, %v1323_v49, %v1749_v51  ;;  %3306 = vmatprep.mubr.bf16.mxu1 %v1328_v0  ;;  %v1175_v7 = vpack.c.bf16 %v941_v61, %v938_v54  ;;  %v4428_v49 = vunpack.c.l.bf16 %v4539_v32  ;;  %v5346_v54 = vld [vmem:[%s6747_s4 + $0xa8] sm:$0xff]  }
 0x127   : > { %3621 = vmatmul.mubr.bf16.vlgmr.msra.gmra.mrb[72].mxu0 %v1750_v1  ;;  %3307 = vmatmul.mubr.bf16.gmra.mrb[4].mxu1 %v5730_v62  ;;  %v5790_v13 = vpack.c.bf16 %v933_v4, %v930_v3  ;;  %v529_v62 = vmul.f32 %v4424_v57, %v5715_v18  ;;  %v1966_v16 = vld [vmem:[#allocation2 + $0x28] sm:$0x1]  ;;  %v532_v6 = vmul.f32 %v4429_v50, %v5715_v18 }
 0x128   : > { %5170 = vmatpush3.bf16.msra.mxu0 %v5710_v15  ;;  %v1277_v17 = vld [vmem:[#allocation2 + $0x28] sm:$0x1]  ;;  %4726 = vmatpush3.bf16.msra.mxu1 %v5340_v59  ;;  %1211 = vst [vmem:[#allocation2 + $0x38] sm:$0xff] %v1175_v7  ;;  %v1965_v20 = vld [vmem:[#allocation2 + $0x20] sm:$0xfe]  ;;  %v2031_v21 = vrot.slane %v1966_v16, 1  ;;  %v531_v5 = vmul.f32 %v4428_v49, %v5715_v18 }
 0x129   : > { %v1710_v19 = vld [vmem:[#allocation2 + $0x28] sm:$0x1]  ;;  %5171 = vmatprep.subr.bf16.mxu0 %v5350_v60  ;;  %v1330_v15 = vshrl.u32 %v5754_v33, 16  ;;  %v1337_v22 = vshll.u32 %v1277_v17, 16  ;;  %4727 = vmatprep.subr.bf16.mxu1 %v5341_v2  ;;  %1210 = vst [vmem:[#allocation2 + $0x30] sm:$0xff] %v5790_v13  ;;  %v5115_v24 = vpop.f32.mrb[16].mxu0 }
 0x12a   : > { %v1759_v23 = vshll.u32 %v1710_v19, 16  ;;  %v2030_v27 = vrot.slane %v1965_v20, 1  ;;  %v945_v28 = vpop.f32.mrb[17].mxu0  ;;  %v1344_v34 = vshll.u32 %v5790_v13, 16  ;;  %v954_v35 = vadd.f32 %v5115_v24, %v529_v62 }
 0x12b   : > { %v1335_v29 = vor.u32 %v1334_v8, %v1330_v15  ;;  %v1339_v30 = vrot.slane %v1337_v22, 1  ;;  %v5116_v36 = vpop.f32.mrb[18].mxu0  ;;  %v946_v47 = vadd.f32 %v945_v28, %v527_v25  ;;  %v1342_v1 = vshrl.u32 %v5790_v13, 16  ;;  %v5356_v15 = vld [vmem:[%s6747_s4 + $0x228] sm:$0xff]  }
 0x12c   : > { %v1761_v31 = vrot.slane %v1759_v23, 1  ;;  %5172 = vmatpush3.bf16.msra.mxu0 %v5350_v60  ;;  %v2032_v37 = vsel %vm1593_vm1, %v2030_v27, %v2031_v21  ;;  %4728 = vmatpush3.bf16.msra.mxu1 %v5342_v10  ;;  %v957_v42 = vadd.f32 %v5116_v36, %v530_v14  ;;  %v948_v43 = vpop.f32.mrb[19].mxu0  ;;  %v1346_v52 = vrot.slane %v1344_v34, 1  ;;  %v5348_v21 = vld [vmem:[%s6747_s4 + $0xb0] sm:$0xff]   ;;  %v4544_v34 = vld [vmem:[%s5703_s11 + $0x78] sm:$0xff]   ;;  %v5357_v36 = vld [vmem:[%s6747_s4 + $0x1c0] sm:$0xff]  }
 0x12d   : > { %5173 = vmatprep.subr.bf16.mxu0 %v5352_v12  ;;  %3628 = vmatprep.mubr.bf16.mxu0 %v2032_v37  ;;  %v1340_v44 = vsel %vm1304_vm0, %v1335_v29, %v1339_v30  ;;  %v949_v48 = vadd.f32 %v948_v43, %v528_v26  ;;  %v4440_v19 = vunpack.c.l.bf16 %v5816_v53  ;;  %v4441_v20 = vunpack.c.h.bf16 %v5816_v53  ;;  %v5351_v26 = vld [vmem:[%s6747_s4 + $0xf8] sm:$0xff]   ;;  %v5358_v37 = vld [vmem:[%s6747_s4 + $0x230] sm:$0xff]  }
 0x12e   : > { %v1762_v45 = vsel %vm1304_vm0, %v1335_v29, %v1761_v31  ;;  %4729 = vmatprep.subr.bf16.mxu1 %v5343_v11  ;;  %3314 = vmatprep.mubr.bf16.mxu1 %v1340_v44  ;;  %v1177_v51 = vpack.c.bf16 %v957_v42, %v954_v35  ;;  %v1347_v9 = vor.u32 %v1346_v52, %v1342_v1  ;;  %v5353_v35 = vld [vmem:[%s6747_s4 + $0xb8] sm:$0xff]  }
 0x12f   : > { %3629 = vmatmul.mubr.bf16.gmra.mrb[76].mxu0 %v1762_v45  ;;  %3315 = vmatmul.mubr.bf16.gmra.mrb[8].mxu1 %v5754_v33  ;;  %v5827_v57 = vpack.c.bf16 %v949_v48, %v946_v47  ;;  %v533_v33 = vmul.f32 %v4432_v38, %v5715_v18  ;;  %v1968_v59 = vld [vmem:[#allocation2 + $0x38] sm:$0x1]  ;;  %v537_v39 = vmul.f32 %v4440_v19, %v5715_v18 }
 0x130   : > { %5174 = vmatpush3.bf16.msra.mxu0 %v5352_v12  ;;  %v1279_v60 = vld [vmem:[#allocation2 + $0x38] sm:$0x1]  ;;  %4730 = vmatpush3.bf16.msra.mxu1 %v5344_v40  ;;  %1213 = vst [vmem:[#allocation2 + $0x48] sm:$0xff] %v1177_v51  ;;  %v1967_v63 = vld [vmem:[#allocation2 + $0x30] sm:$0xfe]  ;;  %v2034_v0 = vrot.slane %v1968_v59, 1 }
 0x131   : > { %v1712_v61 = vld [vmem:[#allocation2 + $0x38] sm:$0x1]  ;;  %5175 = vmatprep.subr.bf16.mxu0 %v5354_v41  ;;  %v1349_v2 = vshll.u32 %v1279_v60, 16  ;;  %4731 = vmatprep.subr.bf16.mxu1 %v5345_v46  ;;  %1212 = vst [vmem:[#allocation2 + $0x40] sm:$0xff] %v5827_v57  ;;  %v5119_v4 = vpop.f32.mrb[20].mxu0  ;;  %v2033_v7 = vrot.slane %v1967_v63, 1  ;;  %v4449_v63 = vunpack.c.h.bf16 %v4544_v34 }
 0x132   : > { %v1771_v3 = vshll.u32 %v1712_v61, 16  ;;  %v961_v8 = vpop.f32.mrb[21].mxu0  ;;  %v4541_v12 = vld [vmem:[%s5703_s11 + $0x60] sm:$0xff]   ;;  %v1356_v62 = vshll.u32 %v5827_v57, 16  ;;  %v970_v14 = vadd.f32 %v5119_v4, %v533_v33  ;;  %v1354_v45 = vshrl.u32 %v5827_v57, 16 }
 0x133   : > { %v1351_v10 = vrot.slane %v1349_v2, 1  ;;  %v5120_v16 = vpop.f32.mrb[22].mxu0  ;;  %v2035_v17 = vsel %vm1593_vm1, %v2033_v7, %v2034_v0  ;;  %v962_v27 = vadd.f32 %v961_v8, %v531_v5  ;;  %v4436_v29 = vunpack.c.l.bf16 %v4541_v12  ;;  %v5360_v0 = vld [vmem:[%s6747_s4 + $0x238] sm:$0xff]  }
 0x134   : > { %v1773_v11 = vrot.slane %v1771_v3, 1  ;;  %5176 = vmatpush3.bf16.msra.mxu0 %v5354_v41  ;;  %4732 = vmatpush3.bf16.msra.mxu1 %v5346_v54  ;;  %v973_v22 = vadd.f32 %v5120_v16, %v534_v58  ;;  %v964_v23 = vpop.f32.mrb[23].mxu0  ;;  %v4437_v30 = vunpack.c.h.bf16 %v4541_v12  ;;  %v1358_v32 = vrot.slane %v1356_v62, 1 }
 0x135   : > { %5177 = vmatprep.subr.bf16.mxu0 %v5355_v56  ;;  %3636 = vmatprep.mubr.bf16.mxu0 %v2035_v17  ;;  %v1352_v24 = vsel %vm1304_vm0, %v1347_v9, %v1351_v10  ;;  %v965_v28 = vadd.f32 %v964_v23, %v532_v6  ;;  %v535_v49 = vmul.f32 %v4436_v29, %v5715_v18  ;;  %v4448_v61 = vunpack.c.l.bf16 %v4544_v34 }
 0x136   : > { %v1774_v25 = vsel %vm1304_vm0, %v1347_v9, %v1773_v11  ;;  %4733 = vmatprep.subr.bf16.mxu1 %v5347_v55  ;;  %3322 = vmatprep.mubr.bf16.mxu1 %v1352_v24  ;;  %v1179_v31 = vpack.c.bf16 %v973_v22, %v970_v14  ;;  %v536_v50 = vmul.f32 %v4437_v30, %v5715_v18  ;;  %v4546_v11 = vld [vmem:[%s5703_s11 + $0x88] sm:$0xff]  }
 0x137   : > { %3637 = vmatmul.mubr.bf16.gmra.mrb[80].mxu0 %v1774_v25  ;;  %3323 = vmatmul.mubr.bf16.gmra.mrb[12].mxu1 %v5790_v13  ;;  %v5862_v38 = vpack.c.bf16 %v965_v28, %v962_v27  ;;  %v538_v13 = vmul.f32 %v4441_v20, %v5715_v18  ;;  %v1970_v40 = vld [vmem:[#allocation2 + $0x48] sm:$0x1]  ;;  %v1359_v53 = vor.u32 %v1358_v32, %v1354_v45 }
 0x138   : > { %5178 = vmatpush3.bf16.msra.mxu0 %v5355_v56  ;;  %v1281_v41 = vld [vmem:[#allocation2 + $0x48] sm:$0x1]  ;;  %4734 = vmatpush3.bf16.msra.mxu1 %v5348_v21  ;;  %1215 = vst [vmem:[#allocation2 + $0x58] sm:$0xff] %v1179_v31  ;;  %v1969_v43 = vld [vmem:[#allocation2 + $0x40] sm:$0xfe]  ;;  %v2037_v44 = vrot.slane %v1970_v40, 1  ;;  %v541_v62 = vmul.f32 %v4448_v61, %v5715_v18  ;;  %v542_v14 = vmul.f32 %v4449_v63, %v5715_v18 }
 0x139   : > { %v1714_v42 = vld [vmem:[#allocation2 + $0x48] sm:$0x1]  ;;  %5179 = vmatprep.subr.bf16.mxu0 %v5356_v15  ;;  %v1361_v46 = vshll.u32 %v1281_v41, 16  ;;  %4735 = vmatprep.subr.bf16.mxu1 %v5351_v26  ;;  %1214 = vst [vmem:[#allocation2 + $0x50] sm:$0xff] %v5862_v38  ;;  %v5123_v48 = vpop.f32.mrb[24].mxu0  ;;  %v2036_v51 = vrot.slane %v1969_v43, 1 }
 0x13a   : > { %v1783_v47 = vshll.u32 %v1714_v42, 16  ;;  %v977_v52 = vpop.f32.mrb[25].mxu0  ;;  %v4543_v56 = vld [vmem:[%s5703_s11 + $0x70] sm:$0xff]   ;;  %v1368_v33 = vshll.u32 %v5862_v38, 16  ;;  %v986_v58 = vadd.f32 %v5123_v48, %v537_v39  ;;  %v4545_v31 = vld [vmem:[%s5703_s11 + $0x80] sm:$0xff]  }
 0x13b   : > { %v1363_v54 = vrot.slane %v1361_v46, 1  ;;  %v5124_v59 = vpop.f32.mrb[26].mxu0  ;;  %v2038_v60 = vsel %vm1593_vm1, %v2036_v51, %v2037_v44  ;;  %v978_v5 = vadd.f32 %v977_v52, %v535_v49  ;;  %v4444_v7 = vunpack.c.l.bf16 %v4543_v56  ;;  %v4548_v49 = vld [vmem:[%s5703_s11 + $0x98] sm:$0xff]  }
 0x13c   : > { %v1785_v55 = vrot.slane %v1783_v47, 1  ;;  %5180 = vmatpush3.bf16.msra.mxu0 %v5356_v15  ;;  %4736 = vmatpush3.bf16.msra.mxu1 %v5353_v35  ;;  %v989_v1 = vadd.f32 %v5124_v59, %v538_v13  ;;  %v980_v2 = vpop.f32.mrb[27].mxu0  ;;  %v4445_v8 = vunpack.c.h.bf16 %v4543_v56  ;;  %v1370_v10 = vrot.slane %v1368_v33, 1 }
 0x13d   : > { %5181 = vmatprep.subr.bf16.mxu0 %v5358_v37  ;;  %3644 = vmatprep.mubr.bf16.mxu0 %v2038_v60  ;;  %v1364_v3 = vsel %vm1304_vm0, %v1359_v53, %v1363_v54  ;;  %v981_v6 = vadd.f32 %v980_v2, %v536_v50  ;;  %v1366_v15 = vshrl.u32 %v5862_v38, 16  ;;  %v539_v24 = vmul.f32 %v4444_v7, %v5715_v18 }
 0x13e   : > { %v1786_v4 = vsel %vm1304_vm0, %v1359_v53, %v1785_v55  ;;  %4945 = vmatprep.subr.bf16.mxu1 %v5357_v36  ;;  %3330 = vmatprep.mubr.bf16.mxu1 %v1364_v3  ;;  %v1181_v9 = vpack.c.bf16 %v989_v1, %v986_v58  ;;  %v540_v25 = vmul.f32 %v4445_v8, %v5715_v18  ;;  %v4456_v36 = vunpack.c.l.bf16 %v4546_v11 }
 0x13f   : > { %3645 = vmatmul.mubr.bf16.gmra.mrb[84].mxu0 %v1786_v4  ;;  %3331 = vmatmul.mubr.bf16.gmra.mrb[16].mxu1 %v5827_v57  ;;  %v5880_v12 = vpack.c.bf16 %v981_v6, %v978_v5  ;;  %v1972_v16 = vld [vmem:[#allocation2 + $0x58] sm:$0x1]  ;;  %v1371_v28 = vor.u32 %v1370_v10, %v1366_v15  ;;  %v4452_v45 = vunpack.c.l.bf16 %v4545_v31  ;;  %v4453_v46 = vunpack.c.h.bf16 %v4545_v31  ;;  %v4547_v5 = vld [vmem:[%s5703_s11 + $0x90] sm:$0xff]  }
 0x140   : > { %5182 = vmatpush3.bf16.msra.mxu0 %v5358_v37  ;;  %v1283_v17 = vld [vmem:[#allocation2 + $0x58] sm:$0x1]  ;;  %1217 = vst [vmem:[#allocation2 + $0x68] sm:$0xff] %v1181_v9  ;;  %v1971_v20 = vld [vmem:[#allocation2 + $0x50] sm:$0xfe]  ;;  %v2040_v21 = vrot.slane %v1972_v16, 1  ;;  %v4457_v37 = vunpack.c.h.bf16 %v4546_v11  ;;  %v545_v51 = vmul.f32 %v4456_v36, %v5715_v18  ;;  %v4464_v9 = vunpack.c.l.bf16 %v4548_v49 }
 0x141   : > { %v1716_v19 = vld [vmem:[#allocation2 + $0x58] sm:$0x1]  ;;  %5183 = vmatprep.subr.bf16.mxu0 %v5360_v0  ;;  %v1373_v57 = vshll.u32 %v1283_v17, 16  ;;  %1216 = vst [vmem:[#allocation2 + $0x60] sm:$0xff] %v5880_v12  ;;  %v5127_v23 = vpop.f32.mrb[28].mxu0  ;;  %v2039_v26 = vrot.slane %v1971_v20, 1  ;;  %v543_v61 = vmul.f32 %v4452_v45, %v5715_v18  ;;  %v544_v63 = vmul.f32 %v4453_v46, %v5715_v18 }
 0x142   : > { %v1795_v22 = vshll.u32 %v1716_v19, 16  ;;  %v993_v27 = vpop.f32.mrb[29].mxu0  ;;  %v1380_v32 = vshll.u32 %v5880_v12, 16  ;;  %v1002_v39 = vadd.f32 %v5127_v23, %v541_v62  ;;  %v546_v52 = vmul.f32 %v4457_v37, %v5715_v18  ;;  %v4550_v23 = vld [vmem:[%s5703_s11 + $0xa8] sm:$0xff]  }
 0x143   : > { %v1375_v29 = vrot.slane %v1373_v57, 1  ;;  %v5128_v34 = vpop.f32.mrb[30].mxu0  ;;  %v2041_v35 = vsel %vm1593_vm1, %v2039_v26, %v2040_v21  ;;  %v994_v43 = vadd.f32 %v993_v27, %v539_v24  ;;  %v1378_v58 = vshrl.u32 %v5880_v12, 16 }
 0x144   : > { %v1797_v30 = vrot.slane %v1795_v22, 1  ;;  %5184 = vmatpush3.bf16.msra.mxu0 %v5360_v0  ;;  %v1005_v13 = vadd.f32 %v5128_v34, %v542_v14  ;;  %v996_v40 = vpop.f32.mrb[31].mxu0  ;;  %3652 = vmatprep.mubr.bf16.mxu0 %v2041_v35  ;;  %v1382_v48 = vrot.slane %v1380_v32, 1  ;;  %v4465_v10 = vunpack.c.h.bf16 %v4548_v49 }
 0x145   : > { %v1376_v41 = vsel %vm1304_vm0, %v1371_v28, %v1375_v29  ;;  %v997_v44 = vadd.f32 %v996_v40, %v540_v25  ;;  %v4460_v21 = vunpack.c.l.bf16 %v4547_v5  ;;  %v4461_v15 = vunpack.c.h.bf16 %v4547_v5 }
 0x146   : > { %v1798_v42 = vsel %vm1304_vm0, %v1371_v28, %v1797_v30  ;;  %3338 = vmatprep.mubr.bf16.mxu1 %v1376_v41  ;;  %v1183_v47 = vpack.c.bf16 %v1005_v13, %v1002_v39  ;;  %v1383_v2 = vor.u32 %v1382_v48, %v1378_v58  ;;  %v549_v25 = vmul.f32 %v4464_v9, %v5715_v18 }
 0x147   : > { %3653 = vmatmul.mubr.bf16.gmra.mrb[88].mxu0 %v1798_v42  ;;  %3339 = vmatmul.mubr.bf16.gmra.mrb[20].mxu1 %v5862_v38  ;;  %v5895_v50 = vpack.c.bf16 %v997_v44, %v994_v43  ;;  %v1974_v53 = vld [vmem:[#allocation2 + $0x68] sm:$0x1]  ;;  %v550_v26 = vmul.f32 %v4465_v10, %v5715_v18  ;;  %v547_v36 = vmul.f32 %v4460_v21, %v5715_v18  ;;  %v4549_v43 = vld [vmem:[%s5703_s11 + $0xa0] sm:$0xff]   ;;  %v4473_v48 = vunpack.c.h.bf16 %v4550_v23 }
 0x148   : > { %v1285_v54 = vld [vmem:[#allocation2 + $0x68] sm:$0x1]  ;;  %1219 = vst [vmem:[#allocation2 + $0x78] sm:$0xff] %v1183_v47  ;;  %v1973_v56 = vld [vmem:[#allocation2 + $0x60] sm:$0xfe]  ;;  %v2043_v33 = vrot.slane %v1974_v53, 1  ;;  %v548_v37 = vmul.f32 %v4461_v15, %v5715_v18  ;;  %v4472_v47 = vunpack.c.l.bf16 %v4550_v23  ;;  %v4469_v58 = vunpack.c.h.bf16 %v4549_v43 }
 0x149   : > { %v1718_v55 = vld [vmem:[#allocation2 + $0x68] sm:$0x1]  ;;  %v1385_v59 = vshll.u32 %v1285_v54, 16  ;;  %1218 = vst [vmem:[#allocation2 + $0x70] sm:$0xff] %v5895_v50  ;;  %v5131_v38 = vpop.f32.mrb[32].mxu0  ;;  %v2042_v0 = vrot.slane %v1973_v56, 1 }
 0x14a   : > { %v1807_v60 = vshll.u32 %v1718_v55, 16  ;;  %v1009_v1 = vpop.f32.mrb[33].mxu0  ;;  %v1392_v6 = vshll.u32 %v5895_v50, 16  ;;  %v1018_v11 = vadd.f32 %v5131_v38, %v545_v51  ;;  %v1390_v32 = vshrl.u32 %v5895_v50, 16  ;;  %v4552_v38 = vld [vmem:[%s5703_s11 + $0xb8] sm:$0xff]  }
 0x14b   : > { %v1387_v3 = vrot.slane %v1385_v59, 1  ;;  %v5132_v7 = vpop.f32.mrb[34].mxu0  ;;  %v2044_v8 = vsel %vm1593_vm1, %v2042_v0, %v2043_v33  ;;  %v1010_v19 = vadd.f32 %v1009_v1, %v543_v61  ;;  %v4468_v33 = vunpack.c.l.bf16 %v4549_v43 }
 0x14c   : > { %v1809_v4 = vrot.slane %v1807_v60, 1  ;;  %v1021_v62 = vadd.f32 %v5132_v7, %v546_v52  ;;  %v1012_v14 = vpop.f32.mrb[35].mxu0  ;;  %3660 = vmatprep.mubr.bf16.mxu0 %v2044_v8  ;;  %v1394_v22 = vrot.slane %v1392_v6, 1  ;;  %v554_v0 = vmul.f32 %v4473_v48, %v5715_v18 }
 0x14d   : > { %v1388_v16 = vsel %vm1304_vm0, %v1383_v2, %v1387_v3  ;;  %v1013_v20 = vadd.f32 %v1012_v14, %v544_v63  ;;  %v553_v63 = vmul.f32 %v4472_v47, %v5715_v18  ;;  %v551_v9 = vmul.f32 %v4468_v33, %v5715_v18 }
 0x14e   : > { %v1810_v17 = vsel %vm1304_vm0, %v1383_v2, %v1809_v4  ;;  %3346 = vmatprep.mubr.bf16.mxu1 %v1388_v16  ;;  %v1185_v57 = vpack.c.bf16 %v1021_v62, %v1018_v11  ;;  %v1395_v40 = vor.u32 %v1394_v22, %v1390_v32  ;;  %v552_v10 = vmul.f32 %v4469_v58, %v5715_v18 }
 0x14f   : > { %3661 = vmatmul.mubr.bf16.gmra.mrb[92].mxu0 %v1810_v17  ;;  %3347 = vmatmul.mubr.bf16.gmra.mrb[24].mxu1 %v5880_v12  ;;  %v5910_v24 = vpack.c.bf16 %v1013_v20, %v1010_v19  ;;  %v1976_v27 = vld [vmem:[#allocation2 + $0x78] sm:$0x1]  ;;  %v4551_v19 = vld [vmem:[%s5703_s11 + $0xb0] sm:$0xff]   ;;  %v4481_v22 = vunpack.c.h.bf16 %v4552_v38 }
 0x150   : > { %v1287_v28 = vld [vmem:[#allocation2 + $0x78] sm:$0x1]  ;;  %1221 = vst [vmem:[#allocation2 + $0x88] sm:$0xff] %v1185_v57  ;;  %v1975_v30 = vld [vmem:[#allocation2 + $0x70] sm:$0xfe]  ;;  %v2046_v31 = vrot.slane %v1976_v27, 1  ;;  %v4480_v57 = vunpack.c.l.bf16 %v4552_v38  ;;  %v4477_v32 = vunpack.c.h.bf16 %v4551_v19 }
 0x151   : > { %v1720_v29 = vld [vmem:[#allocation2 + $0x78] sm:$0x1]  ;;  %v1397_v34 = vshll.u32 %v1287_v28, 16  ;;  %1220 = vst [vmem:[#allocation2 + $0x80] sm:$0xff] %v5910_v24  ;;  %v5135_v12 = vpop.f32.mrb[36].mxu0  ;;  %v2045_v39 = vrot.slane %v1975_v30, 1 }
 0x152   : > { %v1819_v35 = vshll.u32 %v1720_v29, 16  ;;  %v1025_v13 = vpop.f32.mrb[37].mxu0  ;;  %v1404_v44 = vshll.u32 %v5910_v24, 16  ;;  %v1034_v49 = vadd.f32 %v5135_v12, %v549_v25  ;;  %v1402_v6 = vshrl.u32 %v5910_v24, 16  ;;  %v4554_v12 = vld [vmem:[%s5703_s11 + $0xc8] sm:$0xff]  }
 0x153   : > { %v1399_v41 = vrot.slane %v1397_v34, 1  ;;  %v5136_v45 = vpop.f32.mrb[38].mxu0  ;;  %v2047_v46 = vsel %vm1593_vm1, %v2045_v39, %v2046_v31  ;;  %v1026_v55 = vadd.f32 %v1025_v13, %v547_v36  ;;  %v4476_v31 = vunpack.c.l.bf16 %v4551_v19 }
 0x154   : > { %v1821_v42 = vrot.slane %v1819_v35, 1  ;;  %v1037_v51 = vadd.f32 %v5136_v45, %v550_v26  ;;  %v1028_v52 = vpop.f32.mrb[39].mxu0  ;;  %3668 = vmatprep.mubr.bf16.mxu0 %v2047_v46  ;;  %v1406_v60 = vrot.slane %v1404_v44, 1  ;;  %v558_v39 = vmul.f32 %v4481_v22, %v5715_v18 }
 0x155   : > { %v1400_v53 = vsel %vm1304_vm0, %v1395_v40, %v1399_v41  ;;  %v1029_v56 = vadd.f32 %v1028_v52, %v548_v37  ;;  %v557_v37 = vmul.f32 %v4480_v57, %v5715_v18  ;;  %v555_v47 = vmul.f32 %v4476_v31, %v5715_v18 }
 0x156   : > { %v1822_v54 = vsel %vm1304_vm0, %v1395_v40, %v1821_v42  ;;  %3354 = vmatprep.mubr.bf16.mxu1 %v1400_v53  ;;  %v1187_v59 = vpack.c.bf16 %v1037_v51, %v1034_v49  ;;  %v1407_v14 = vor.u32 %v1406_v60, %v1402_v6  ;;  %v556_v48 = vmul.f32 %v4477_v32, %v5715_v18 }
 0x157   : > { %3669 = vmatmul.mubr.bf16.gmra.mrb[96].mxu0 %v1822_v54  ;;  %3355 = vmatmul.mubr.bf16.gmra.mrb[28].mxu1 %v5895_v50  ;;  %v5925_v61 = vpack.c.bf16 %v1029_v56, %v1026_v55  ;;  %v1978_v1 = vld [vmem:[#allocation2 + $0x88] sm:$0x1]  ;;  %v4553_v55 = vld [vmem:[%s5703_s11 + $0xc0] sm:$0xff]   ;;  %v4489_v60 = vunpack.c.h.bf16 %v4554_v12 }
 0x158   : > { %v1289_v2 = vld [vmem:[#allocation2 + $0x88] sm:$0x1]  ;;  %1223 = vst [vmem:[#allocation2 + $0x98] sm:$0xff] %v1187_v59  ;;  %v1977_v4 = vld [vmem:[#allocation2 + $0x80] sm:$0xfe]  ;;  %v2049_v5 = vrot.slane %v1978_v1, 1  ;;  %v4488_v59 = vunpack.c.l.bf16 %v4554_v12 }
 0x159   : > { %v1722_v3 = vld [vmem:[#allocation2 + $0x88] sm:$0x1]  ;;  %v1409_v7 = vshll.u32 %v1289_v2, 16  ;;  %1222 = vst [vmem:[#allocation2 + $0x90] sm:$0xff] %v5925_v61  ;;  %v5139_v50 = vpop.f32.mrb[40].mxu0  ;;  %v2048_v11 = vrot.slane %v1977_v4, 1  ;;  %v4484_v4 = vunpack.c.l.bf16 %v4553_v55 }
 0x15a   : > { %v1831_v8 = vshll.u32 %v1722_v3, 16  ;;  %v1041_v62 = vpop.f32.mrb[41].mxu0  ;;  %v1416_v20 = vshll.u32 %v5925_v61, 16  ;;  %v1050_v23 = vadd.f32 %v5139_v50, %v553_v63  ;;  %v1414_v44 = vshrl.u32 %v5925_v61, 16 }
 0x15b   : > { %v1411_v16 = vrot.slane %v1409_v7, 1  ;;  %v5140_v21 = vpop.f32.mrb[42].mxu0  ;;  %v2050_v15 = vsel %vm1593_vm1, %v2048_v11, %v2049_v5  ;;  %v1042_v29 = vadd.f32 %v1041_v62, %v551_v9  ;;  %v4485_v5 = vunpack.c.h.bf16 %v4553_v55  ;;  %v5960_v9 = vld [vmem:[%s6746_s3] ss:$0 sm:$0xff] }
 0x15c   : > { %v1833_v17 = vrot.slane %v1831_v8, 1  ;;  %v1053_v25 = vadd.f32 %v5140_v21, %v554_v0  ;;  %v1044_v26 = vpop.f32.mrb[43].mxu0  ;;  %3676 = vmatprep.mubr.bf16.mxu0 %v2050_v15  ;;  %v1418_v35 = vrot.slane %v1416_v20, 1  ;;  %v4556_v8 = vld [vmem:[%s5703_s11 + $0xd8] sm:$0xff]   ;;  %v562_v11 = vmul.f32 %v5960_v9, %v4489_v60 }
 0x15d   : > { %v1412_v27 = vsel %vm1304_vm0, %v1407_v14, %v1411_v16  ;;  %v1045_v30 = vadd.f32 %v1044_v26, %v552_v10  ;;  %v561_v10 = vmul.f32 %v5960_v9, %v4488_v59  ;;  %v559_v57 = vmul.f32 %v5960_v9, %v4484_v4 }
 0x15e   : > { %v1834_v28 = vsel %vm1304_vm0, %v1407_v14, %v1833_v17  ;;  %3362 = vmatprep.mubr.bf16.mxu1 %v1412_v27  ;;  %v1189_v34 = vpack.c.bf16 %v1053_v25, %v1050_v23  ;;  %v1419_v52 = vor.u32 %v1418_v35, %v1414_v44  ;;  %v560_v22 = vmul.f32 %v5960_v9, %v4485_v5 }
 0x15f   : > { %3677 = vmatmul.mubr.bf16.gmra.mrb[100].mxu0 %v1834_v28  ;;  %3363 = vmatmul.mubr.bf16.gmra.mrb[32].mxu1 %v5910_v24  ;;  %v5940_v36 = vpack.c.bf16 %v1045_v30, %v1042_v29  ;;  %v1980_v13 = vld [vmem:[#allocation2 + $0x98] sm:$0x1]  ;;  %v4555_v29 = vld [vmem:[%s5703_s11 + $0xd0] sm:$0xff]   ;;  %v4497_v35 = vunpack.c.h.bf16 %v4556_v8 }
 0x160   : > { %v1291_v40 = vld [vmem:[#allocation2 + $0x98] sm:$0x1]  ;;  %1225 = vst [vmem:[#allocation2 + $0xa8] sm:$0xff] %v1189_v34  ;;  %v1979_v42 = vld [vmem:[#allocation2 + $0x90] sm:$0xfe]  ;;  %v2052_v43 = vrot.slane %v1980_v13, 1  ;;  %v4496_v34 = vunpack.c.l.bf16 %v4556_v8  ;;  %v4493_v44 = vunpack.c.h.bf16 %v4555_v29 }
 0x161   : > { %v1724_v41 = vld [vmem:[#allocation2 + $0x98] sm:$0x1]  ;;  %v1421_v45 = vshll.u32 %v1291_v40, 16  ;;  %1224 = vst [vmem:[#allocation2 + $0xa0] sm:$0xff] %v5940_v36  ;;  %v5143_v24 = vpop.f32.mrb[44].mxu0  ;;  %v2051_v49 = vrot.slane %v1979_v42, 1 }
 0x162   : > { %v1843_v46 = vshll.u32 %v1724_v41, 16  ;;  %v1057_v51 = vpop.f32.mrb[45].mxu0  ;;  %v1428_v56 = vshll.u32 %v5940_v36, 16  ;;  %v1066_v38 = vadd.f32 %v5143_v24, %v557_v37  ;;  %v1426_v19 = vshrl.u32 %v5940_v36, 16  ;;  %v4558_v24 = vld [vmem:[%s5703_s11 + $0xe8] sm:$0xff]  }
 0x163   : > { %v1423_v53 = vrot.slane %v1421_v45, 1  ;;  %v5144_v33 = vpop.f32.mrb[46].mxu0  ;;  %v2053_v58 = vsel %vm1593_vm1, %v2051_v49, %v2052_v43  ;;  %v1058_v2 = vadd.f32 %v1057_v51, %v555_v47  ;;  %v4492_v43 = vunpack.c.l.bf16 %v4555_v29 }
 0x164   : > { %v1845_v54 = vrot.slane %v1843_v46, 1  ;;  %v1069_v63 = vadd.f32 %v5144_v33, %v558_v39  ;;  %v1060_v0 = vpop.f32.mrb[47].mxu0  ;;  %3684 = vmatprep.mubr.bf16.mxu0 %v2053_v58  ;;  %v1430_v7 = vrot.slane %v1428_v56, 1  ;;  %v566_v49 = vmul.f32 %v5960_v9, %v4497_v35 }
 0x165   : > { %v1424_v18 = vsel %vm1304_vm0, %v1419_v52, %v1423_v53  ;;  %v1061_v3 = vadd.f32 %v1060_v0, %v556_v48  ;;  %v565_v48 = vmul.f32 %v5960_v9, %v4496_v34  ;;  %v563_v59 = vmul.f32 %v5960_v9, %v4492_v43 }
 0x166   : > { %v1846_v1 = vsel %vm1304_vm0, %v1419_v52, %v1845_v54  ;;  %3370 = vmatprep.mubr.bf16.mxu1 %v1424_v18  ;;  %v1191_v6 = vpack.c.bf16 %v1069_v63, %v1066_v38  ;;  %v1431_v26 = vor.u32 %v1430_v7, %v1426_v19  ;;  %v564_v60 = vmul.f32 %v5960_v9, %v4493_v44 }
 0x167   : > { %3685 = vmatmul.mubr.bf16.gmra.mrb[104].mxu0 %v1846_v1  ;;  %3371 = vmatmul.mubr.bf16.gmra.mrb[36].mxu1 %v5925_v61  ;;  %v5955_v50 = vpack.c.bf16 %v1061_v3, %v1058_v2  ;;  %v1982_v62 = vld [vmem:[#allocation2 + $0xa8] sm:$0x1]  ;;  %v4557_v2 = vld [vmem:[%s5703_s11 + $0xe0] sm:$0xff]   ;;  %v4505_v7 = vunpack.c.h.bf16 %v4558_v24 }
 0x168   : > { %v1293_v14 = vld [vmem:[#allocation2 + $0xa8] sm:$0x1]  ;;  %1227 = vst [vmem:[#allocation2 + $0xb8] sm:$0xff] %v1191_v6  ;;  %v1981_v17 = vld [vmem:[#allocation2 + $0xa0] sm:$0xfe]  ;;  %v2055_v61 = vrot.slane %v1982_v62, 1  ;;  %v4504_v6 = vunpack.c.l.bf16 %v4558_v24  ;;  %v4501_v19 = vunpack.c.h.bf16 %v4557_v2 }
 0x169   : > { %v1726_v16 = vld [vmem:[#allocation2 + $0xa8] sm:$0x1]  ;;  %v1433_v20 = vshll.u32 %v1293_v14, 16  ;;  %1226 = vst [vmem:[#allocation2 + $0xb0] sm:$0xff] %v5955_v50  ;;  %v5147_v15 = vpop.f32.mrb[48].mxu0  ;;  %v2054_v23 = vrot.slane %v1981_v17, 1 }
 0x16a   : > { %v1855_v21 = vshll.u32 %v1726_v16, 16  ;;  %v1073_v25 = vpop.f32.mrb[49].mxu0  ;;  %v1440_v30 = vshll.u32 %v5955_v50, 16  ;;  %v1082_v12 = vadd.f32 %v5147_v15, %v561_v10  ;;  %v1438_v56 = vshrl.u32 %v5955_v50, 16  ;;  %v4560_v15 = vld [vmem:[%s5703_s11 + $0xf8] sm:$0xff]  }
 0x16b   : > { %v1435_v27 = vrot.slane %v1433_v20, 1  ;;  %v5148_v31 = vpop.f32.mrb[50].mxu0  ;;  %v2056_v32 = vsel %vm1593_vm1, %v2054_v23, %v2055_v61  ;;  %v1074_v41 = vadd.f32 %v1073_v25, %v559_v57  ;;  %v4500_v61 = vunpack.c.l.bf16 %v4557_v2 }
 0x16c   : > { %v1857_v28 = vrot.slane %v1855_v21, 1  ;;  %v1085_v37 = vadd.f32 %v5148_v31, %v562_v11  ;;  %v1076_v39 = vpop.f32.mrb[51].mxu0  ;;  %3692 = vmatprep.mubr.bf16.mxu0 %v2056_v32  ;;  %v1442_v46 = vrot.slane %v1440_v30, 1  ;;  %v570_v23 = vmul.f32 %v5960_v9, %v4505_v7 }
 0x16d   : > { %v1436_v13 = vsel %vm1304_vm0, %v1431_v26, %v1435_v27  ;;  %v1077_v42 = vadd.f32 %v1076_v39, %v560_v22  ;;  %v569_v22 = vmul.f32 %v5960_v9, %v4504_v6  ;;  %v567_v34 = vmul.f32 %v5960_v9, %v4500_v61 }
 0x16e   : > { %v1858_v40 = vsel %vm1304_vm0, %v1431_v26, %v1857_v28  ;;  %3378 = vmatprep.mubr.bf16.mxu1 %v1436_v13  ;;  %v1193_v45 = vpack.c.bf16 %v1085_v37, %v1082_v12  ;;  %v1443_v0 = vor.u32 %v1442_v46, %v1438_v56  ;;  %v568_v35 = vmul.f32 %v5960_v9, %v4501_v19 }
 0x16f   : > { %3693 = vmatmul.mubr.bf16.gmra.mrb[108].mxu0 %v1858_v40  ;;  %3379 = vmatmul.mubr.bf16.gmra.mrb[40].mxu1 %v5940_v36  ;;  %v5975_v47 = vpack.c.bf16 %v1077_v42, %v1074_v41  ;;  %v1984_v51 = vld [vmem:[#allocation2 + $0xb8] sm:$0x1]  ;;  %v4559_v41 = vld [vmem:[%s5703_s11 + $0xf0] sm:$0xff]   ;;  %v4513_v46 = vunpack.c.h.bf16 %v4560_v15 }
 0x170   : > { %v1295_v52 = vld [vmem:[#allocation2 + $0xb8] sm:$0x1]  ;;  %1229 = vst [vmem:[#allocation2 + $0xc8] sm:$0xff] %v1193_v45  ;;  %v1983_v54 = vld [vmem:[#allocation2 + $0xb0] sm:$0xfe]  ;;  %v2058_v55 = vrot.slane %v1984_v51, 1  ;;  %v4512_v45 = vunpack.c.l.bf16 %v4560_v15  ;;  %v4509_v56 = vunpack.c.h.bf16 %v4559_v41 }
 0x171   : > { %v1728_v53 = vld [vmem:[#allocation2 + $0xb8] sm:$0x1]  ;;  %v1445_v33 = vshll.u32 %v1295_v52, 16  ;;  %1228 = vst [vmem:[#allocation2 + $0xc0] sm:$0xff] %v5975_v47  ;;  %v5151_v36 = vpop.f32.mrb[52].mxu0  ;;  %v2057_v38 = vrot.slane %v1983_v54, 1 }
 0x172   : > { %v1867_v58 = vshll.u32 %v1728_v53, 16  ;;  %v1089_v63 = vpop.f32.mrb[53].mxu0  ;;  %v1452_v3 = vshll.u32 %v5975_v47, 16  ;;  %v1098_v8 = vadd.f32 %v5151_v36, %v565_v48  ;;  %v1450_v30 = vshrl.u32 %v5975_v47, 16  ;;  %v4562_v36 = vld [vmem:[%s5703_s11 + $0x108] sm:$0xff]  }
 0x173   : > { %v1447_v18 = vrot.slane %v1445_v33, 1  ;;  %v5152_v4 = vpop.f32.mrb[54].mxu0  ;;  %v2059_v5 = vsel %vm1593_vm1, %v2057_v38, %v2058_v55  ;;  %v1090_v16 = vadd.f32 %v1089_v63, %v563_v59  ;;  %v4508_v55 = vunpack.c.l.bf16 %v4559_v41  ;;  %v4561_v59 = vld [vmem:[%s5703_s11 + $0x100] sm:$0xff]  }
 0x174   : > { %v1869_v1 = vrot.slane %v1867_v58, 1  ;;  %v1101_v10 = vadd.f32 %v5152_v4, %v566_v49  ;;  %v1092_v11 = vpop.f32.mrb[55].mxu0  ;;  %3700 = vmatprep.mubr.bf16.mxu0 %v2059_v5  ;;  %v1454_v21 = vrot.slane %v1452_v3, 1  ;;  %v573_v38 = vmul.f32 %v5960_v9, %v4512_v45 }
 0x175   : > { %v1448_v62 = vsel %vm1304_vm0, %v1443_v0, %v1447_v18  ;;  %v1093_v17 = vadd.f32 %v1092_v11, %v564_v60  ;;  %v574_v63 = vmul.f32 %v5960_v9, %v4513_v46  ;;  %v571_v7 = vmul.f32 %v5960_v9, %v4508_v55  ;;  %v4563_v46 = vld [vmem:[%s5703_s11 + $0x110] sm:$0xff]  }
 0x176   : > { %v1870_v14 = vsel %vm1304_vm0, %v1443_v0, %v1869_v1  ;;  %3386 = vmatprep.mubr.bf16.mxu1 %v1448_v62  ;;  %v1195_v20 = vpack.c.bf16 %v1101_v10, %v1098_v8  ;;  %v1455_v39 = vor.u32 %v1454_v21, %v1450_v30  ;;  %v572_v8 = vmul.f32 %v5960_v9, %v4509_v56 }
 0x177   : > { %3701 = vmatmul.mubr.bf16.gmra.mrb[112].mxu0 %v1870_v14  ;;  %3387 = vmatmul.mubr.bf16.gmra.mrb[44].mxu1 %v5955_v50  ;;  %v5990_v57 = vpack.c.bf16 %v1093_v17, %v1090_v16  ;;  %v1986_v25 = vld [vmem:[#allocation2 + $0xc8] sm:$0x1]  ;;  %v4520_v61 = vunpack.c.l.bf16 %v4562_v36  ;;  %v4516_v21 = vunpack.c.l.bf16 %v4561_v59  ;;  %v4521_v15 = vunpack.c.h.bf16 %v4562_v36 }
 0x178   : > { %v1297_v26 = vld [vmem:[#allocation2 + $0xc8] sm:$0x1]  ;;  %1231 = vst [vmem:[#allocation2 + $0xd8] sm:$0xff] %v1195_v20  ;;  %v1985_v28 = vld [vmem:[#allocation2 + $0xc0] sm:$0xfe]  ;;  %v2061_v29 = vrot.slane %v1986_v25, 1  ;;  %v4517_v30 = vunpack.c.h.bf16 %v4561_v59  ;;  %v4524_v59 = vunpack.c.l.bf16 %v4563_v46 }
 0x179   : > { %v1730_v27 = vld [vmem:[#allocation2 + $0xc8] sm:$0x1]  ;;  %v1457_v31 = vshll.u32 %v1297_v26, 16  ;;  %1230 = vst [vmem:[#allocation2 + $0xd0] sm:$0xff] %v5990_v57  ;;  %v5155_v50 = vpop.f32.mrb[56].mxu0  ;;  %v2060_v12 = vrot.slane %v1985_v28, 1  ;;  %v578_v41 = vmul.f32 %v5960_v9, %v4521_v15 }
 0x17a   : > { %v1879_v32 = vshll.u32 %v1730_v27, 16  ;;  %v1105_v37 = vpop.f32.mrb[57].mxu0  ;;  %v1464_v42 = vshll.u32 %v5990_v57, 16  ;;  %v1114_v24 = vadd.f32 %v5155_v50, %v569_v22  ;;  %v1462_v4 = vshrl.u32 %v5990_v57, 16 }
 0x17b   : > { %v1459_v13 = vrot.slane %v1457_v31, 1  ;;  %v5156_v43 = vpop.f32.mrb[58].mxu0  ;;  %v2062_v44 = vsel %vm1593_vm1, %v2060_v12, %v2061_v29  ;;  %v1106_v53 = vadd.f32 %v1105_v37, %v567_v34  ;;  %v577_v50 = vmul.f32 %v5960_v9, %v4520_v61 }
 0x17c   : > { %v1881_v40 = vrot.slane %v1879_v32, 1  ;;  %v1117_v48 = vadd.f32 %v5156_v43, %v570_v23  ;;  %v1108_v49 = vpop.f32.mrb[59].mxu0  ;;  %3708 = vmatprep.mubr.bf16.mxu0 %v2062_v44  ;;  %v1466_v58 = vrot.slane %v1464_v42, 1  ;;  %v575_v37 = vmul.f32 %v5960_v9, %v4516_v21 }
 0x17d   : > { %v1460_v51 = vsel %vm1304_vm0, %v1455_v39, %v1459_v13  ;;  %v1109_v54 = vadd.f32 %v1108_v49, %v568_v35  ;;  %v4564_v35 = vld [vmem:[%s5703_s11 + $0x118] sm:$0xff]  }
 0x17e   : > { %v1882_v52 = vsel %vm1304_vm0, %v1455_v39, %v1881_v40  ;;  %3394 = vmatprep.mubr.bf16.mxu1 %v1460_v51  ;;  %v1197_v33 = vpack.c.bf16 %v1117_v48, %v1114_v24  ;;  %v1467_v14 = vor.u32 %v1466_v58, %v1462_v4  ;;  %v576_v24 = vmul.f32 %v5960_v9, %v4517_v30 }
 0x17f   : > { %3709 = vmatmul.mubr.bf16.gmra.mrb[116].mxu0 %v1882_v52  ;;  %3395 = vmatmul.mubr.bf16.gmra.mrb[48].mxu1 %v5975_v47  ;;  %v6006_v60 = vpack.c.bf16 %v1109_v54, %v1106_v53  ;;  %v1988_v0 = vld [vmem:[#allocation2 + $0xd8] sm:$0x1]  ;;  %v4528_v51 = vunpack.c.l.bf16 %v4564_v35 }
 0x180   : > { %v1299_v18 = vld [vmem:[#allocation2 + $0xd8] sm:$0x1]  ;;  %1233 = vst [vmem:[#allocation2 + $0xe8] sm:$0xff] %v1197_v33  ;;  %v1987_v2 = vld [vmem:[#allocation2 + $0xd0] sm:$0xfe]  ;;  %v2064_v3 = vrot.slane %v1988_v0, 1 }
 0x181   : > { %v1732_v1 = vld [vmem:[#allocation2 + $0xd8] sm:$0x1]  ;;  %v1469_v5 = vshll.u32 %v1299_v18, 16  ;;  %1232 = vst [vmem:[#allocation2 + $0xe0] sm:$0xff] %v6006_v60  ;;  %v5159_v47 = vpop.f32.mrb[60].mxu0  ;;  %v2063_v10 = vrot.slane %v1987_v2, 1 }
 0x182   : > { %v1891_v6 = vshll.u32 %v1732_v1, 16  ;;  %v1476_v11 = vshll.u32 %v6006_v60, 16  ;;  %v1121_v62 = vpop.f32.mrb[61].mxu0  ;;  %v1130_v22 = vadd.f32 %v5159_v47, %v573_v38  ;;  %v1474_v34 = vshrl.u32 %v6006_v60, 16 }
 0x183   : > { %v1471_v16 = vrot.slane %v1469_v5, 1  ;;  %v5160_v19 = vpop.f32.mrb[62].mxu0  ;;  %v2065_v20 = vsel %vm1593_vm1, %v2063_v10, %v2064_v3  ;;  %v1122_v28 = vadd.f32 %v1121_v62, %v571_v7  ;;  %v4529_v38 = vunpack.c.h.bf16 %v4564_v35 }
 0x184   : > { %v1893_v17 = vrot.slane %v1891_v6, 1  ;;  %v1133_v23 = vadd.f32 %v5160_v19, %v574_v63  ;;  %v1124_v25 = vpop.f32.mrb[63].mxu0  ;;  %3716 = vmatprep.mubr.bf16.mxu0 %v2065_v20  ;;  %v1478_v31 = vrot.slane %v1476_v11, 1  ;;  %v4525_v3 = vunpack.c.h.bf16 %v4563_v46 }
 0x185   : > { %v1472_v26 = vsel %vm1304_vm0, %v1467_v14, %v1471_v16  ;;  %v1125_v29 = vadd.f32 %v1124_v25, %v572_v8  ;;  %v581_v6 = vmul.f32 %v5960_v9, %v4528_v51  ;;  %v579_v11 = vmul.f32 %v5960_v9, %v4524_v59  ;;  %v1531_v59 = vld [vmem:[#allocation2 + $0x10] sm:$0xfe] }
 0x186   : > { %v1894_v27 = vsel %vm1304_vm0, %v1467_v14, %v1893_v17  ;;  %3402 = vmatprep.mubr.bf16.mxu1 %v1472_v26  ;;  %v1199_v32 = vpack.c.bf16 %v1133_v23, %v1130_v22  ;;  %v1479_v49 = vor.u32 %v1478_v31, %v1474_v34  ;;  %v582_v62 = vmul.f32 %v5960_v9, %v4529_v38  ;;  %v5361_v38 = vld [vmem:[%s6747_s4 + $0x1c8] sm:$0xff]  }
 0x187   : > { %3717 = vmatmul.mubr.bf16.gmra.mrb[120].mxu0 %v1894_v27  ;;  %3403 = vmatmul.mubr.bf16.gmra.mrb[52].mxu1 %v5990_v57  ;;  %v6022_v12 = vpack.c.bf16 %v1125_v29, %v1122_v28  ;;  %v1990_v39 = vld [vmem:[#allocation2 + $0xe8] sm:$0x1]  ;;  %v580_v15 = vmul.f32 %v5960_v9, %v4525_v3  ;;  %v1529_v9 = vld [vmem:[#allocation2] sm:$0xfe] }
 0x188   : > { %v1301_v13 = vld [vmem:[#allocation2 + $0xe8] sm:$0x1]  ;;  %1235 = vst [vmem:[#allocation2 + $0xf8] sm:$0xff] %v1199_v32  ;;  %v1989_v42 = vld [vmem:[#allocation2 + $0xe0] sm:$0xfe]  ;;  %v2067_v43 = vrot.slane %v1990_v39, 1 }
 0x189   : > { %v1734_v40 = vld [vmem:[#allocation2 + $0xe8] sm:$0x1]  ;;  %v1481_v44 = vshll.u32 %v1301_v13, 16  ;;  %1234 = vst [vmem:[#allocation2 + $0xf0] sm:$0xff] %v6022_v12  ;;  %v5163_v57 = vpop.f32.mrb[64].mxu0  ;;  %v2066_v48 = vrot.slane %v1989_v42, 1 }
 0x18a   : > { %v1903_v45 = vshll.u32 %v1734_v40, 16  ;;  %v1146_v52 = vadd.f32 %v5163_v57, %v577_v50  ;;  %v1137_v53 = vpop.f32.mrb[65].mxu0  ;;  %v1488_v56 = vshll.u32 %v6022_v12, 16  ;;  %v1486_v17 = vshrl.u32 %v6022_v12, 16  ;;  %v1530_v39 = vld [vmem:[#allocation2 + $0x8] sm:$0x1] }
 0x18b   : > { %v1483_v54 = vrot.slane %v1481_v44, 1  ;;  %v1138_v33 = vadd.f32 %v1137_v53, %v575_v37  ;;  %v5164_v58 = vpop.f32.mrb[66].mxu0  ;;  %v2068_v36 = vsel %vm1593_vm1, %v2066_v48, %v2067_v43  ;;  %v1675_v40 = vld [vmem:[#allocation2 + $0x10] sm:$0xff]  ;;  %v2397_v42 = vld [vmem:[#allocation2 + $0x28] sm:$0x1]  ;;  %v1595_v51 = vrot.slane %v1530_v39, 1 }
 0x18c   : > { %v1905_v55 = vrot.slane %v1903_v45, 1  ;;  %v1149_v63 = vadd.f32 %v5164_v58, %v578_v41  ;;  %v1140_v0 = vpop.f32.mrb[67].mxu0  ;;  %3724 = vmatprep.mubr.bf16.mxu0 %v2068_v36  ;;  %v1490_v5 = vrot.slane %v1488_v56, 1  ;;  %v2396_v41 = vld [vmem:[#allocation2 + $0x20] sm:$0xfe]  ;;  %v1594_v53 = vrot.slane %v1529_v9, 1 }
 0x18d   : > { %v1484_v18 = vsel %vm1304_vm0, %v1479_v49, %v1483_v54  ;;  %v1141_v2 = vadd.f32 %v1140_v0, %v576_v24  ;;  %v2460_v54 = vrot.slane %v2396_v41, 1  ;;  %v5359_v58 = vld [vmem:[%s6747_s4 + $0x180] sm:$0xff]   ;;  %v1535_v39 = vld [vmem:[#allocation2 + $0x30] sm:$0xfe] }
 0x18e   : > { %v1906_v1 = vsel %vm1304_vm0, %v1479_v49, %v1905_v55  ;;  %3410 = vmatprep.mubr.bf16.mxu1 %v1484_v18  ;;  %v1201_v4 = vpack.c.bf16 %v1149_v63, %v1146_v52  ;;  %v1491_v22 = vor.u32 %v1490_v5, %v1486_v17  ;;  %v2461_v55 = vrot.slane %v2397_v42, 1  ;;  %v2398_v18 = vld [vmem:[#allocation2 + $0x30] sm:$0xfe]  ;;  %v6058_v3 = vld [vmem:[#allocation2 + $0x20] sm:$0xff]  ;;  %v2401_v5 = vld [vmem:[#allocation2 + $0x48] sm:$0x1] }
 0x18f   : > { %3725 = vmatmul.mubr.bf16.gmra.mrb[124].mxu0 %v1906_v1  ;;  %3411 = vmatmul.mubr.bf16.gmra.mrb[56].mxu1 %v6006_v60  ;;  %v6035_v47 = vpack.c.bf16 %v1141_v2, %v1138_v33  ;;  %v1992_v7 = vld [vmem:[#allocation2 + $0xf8] sm:$0x1]  ;;  %v1596_v63 = vsel %vm1593_vm1, %v1594_v53, %v1595_v51  ;;  %v5364_v17 = vld [vmem:[%s6747_s4 + $0x190] sm:$0xff]  }
 0x190   : > { %v1303_v8 = vld [vmem:[#allocation2 + $0xf8] sm:$0x1]  ;;  %1237 = vst [vmem:[#allocation2 + $0x108] sm:$0xff] %v1201_v4  ;;  %v1991_v14 = vld [vmem:[#allocation2 + $0xf0] sm:$0xfe]  ;;  %v2070_v16 = vrot.slane %v1992_v7, 1  ;;  %v2462_v0 = vsel %vm1593_vm1, %v2460_v54, %v2461_v55 }
 0x191   : > { %v1736_v10 = vld [vmem:[#allocation2 + $0xf8] sm:$0x1]  ;;  %v1493_v61 = vshll.u32 %v1303_v8, 16  ;;  %1236 = vst [vmem:[#allocation2 + $0x100] sm:$0xff] %v6035_v47  ;;  %v2069_v60 = vrot.slane %v1991_v14, 1  ;;  %v1922_v20 = vshll.u32 %v6035_v47, 16 }
 0x192   : > { %v1915_v19 = vshll.u32 %v1736_v10, 16  ;;  %v5167_v21 = vpop.f32.mrb[68].mxu0  ;;  %v1920_v29 = vshrl.u32 %v6035_v47, 16  ;;  %v2399_v1 = vld [vmem:[#allocation2 + $0x38] sm:$0x1]  ;;  %v2463_v7 = vrot.slane %v2398_v18, 1 }
 0x193   : > { %v1495_v23 = vrot.slane %v1493_v61, 1  ;;  %v1162_v26 = vadd.f32 %v5167_v21, %v581_v6  ;;  %v1153_v27 = vpop.f32.mrb[69].mxu0  ;;  %v2071_v28 = vsel %vm1593_vm1, %v2069_v60, %v2070_v16  ;;  %v1924_v34 = vrot.slane %v1922_v20, 1  ;;  %v1532_v2 = vld [vmem:[#allocation2 + $0x18] sm:$0x1]  ;;  %v5362_v6 = vld [vmem:[%s6747_s4 + $0x188] sm:$0xff]  }
 0x194   : > { %v1917_v25 = vrot.slane %v1915_v19, 1  ;;  %v1154_v30 = vadd.f32 %v1153_v27, %v579_v11  ;;  %v5168_v31 = vpop.f32.mrb[70].mxu0  ;;  %3732 = vmatprep.mubr.bf16.mxu0 %v2071_v28  ;;  %v2400_v4 = vld [vmem:[#allocation2 + $0x40] sm:$0xfe]  ;;  %v2464_v8 = vrot.slane %v2399_v1, 1  ;;  %v5363_v10 = vld [vmem:[%s6747_s4 + $0x1d0] sm:$0xff]  }
 0x195   : > { %v1496_v32 = vsel %vm1304_vm0, %v1491_v22, %v1495_v23  ;;  %v1165_v35 = vadd.f32 %v5168_v31, %v582_v62  ;;  %v1156_v37 = vpop.f32.mrb[71].mxu0  ;;  %v1925_v48 = vor.u32 %v1924_v34, %v1920_v29  ;;  %v1597_v11 = vrot.slane %v1531_v59, 1  ;;  %v1533_v19 = vld [vmem:[#allocation2 + $0x20] sm:$0xfe]  ;;  %v5365_v60 = vld [vmem:[%s6747_s4 + $0x1d8] sm:$0xff]   ;;  %v5371_v51 = vld [vmem:[%s6747_s4 + $0x1f0] sm:$0xff]  }
 0x196   : > { %v1918_v50 = vsel %vm1304_vm0, %v1491_v22, %v1917_v25  ;;  %3418 = vmatprep.mubr.bf16.mxu1 %v1496_v32  ;;  %v1157_v13 = vadd.f32 %v1156_v37, %v580_v15  ;;  %v1598_v62 = vrot.slane %v1532_v2, 1  ;;  %v2466_v14 = vrot.slane %v2400_v4, 1  ;;  %v2402_v15 = vld [vmem:[#allocation2 + $0x50] sm:$0xfe]  ;;  %v2403_v22 = vld [vmem:[#allocation2 + $0x58] sm:$0x1] }
 0x197   : > { %3733 = vmatmul.mubr.bf16.gmra.mrb[128].mxu0 %v1918_v50  ;;  %3419 = vmatmul.mubr.bf16.gmra.mrb[60].mxu1 %v6022_v12  ;;  %v1203_v43 = vpack.c.bf16 %v1165_v35, %v1162_v26  ;;  %v1994_v44 = vld [vmem:[#allocation2 + $0x108] sm:$0x1]  ;;  %v2467_v16 = vrot.slane %v2401_v5, 1  ;;  %v2465_v61 = vsel %vm1593_vm1, %v2463_v7, %v2464_v8  ;;  %v6076_v25 = vld [vmem:[#allocation2 + $0x30] sm:$0xff]  ;;  %v2404_v26 = vld [vmem:[#allocation2 + $0x60] sm:$0xfe] }
 0x198   : > { %3459 = vmatprep.mubr.bf16.mxu1 %v1675_v40  ;;  %v1738_v45 = vld [vmem:[#allocation2 + $0x108] sm:$0x1]  ;;  %v1202_v46 = vpack.c.bf16 %v1157_v13, %v1154_v30  ;;  %v1993_v57 = vld [vmem:[#allocation2 + $0x100] sm:$0xfe]  ;;  %v2073_v24 = vrot.slane %v1994_v44, 1  ;;  %v1599_v20 = vsel %vm1593_vm1, %v1597_v11, %v1598_v62  ;;  %v5366_v28 = vld [vmem:[%s6747_s4 + $0x198] sm:$0xff]  }
 0x199   : > { %v1927_v49 = vshll.u32 %v1738_v45, 16  ;;  %1239 = vst [vmem:[#allocation2 + $0x118] sm:$0xff] %v1203_v43  ;;  %v2072_v52 = vrot.slane %v1993_v57, 1  ;;  %v2468_v21 = vsel %vm1593_vm1, %v2466_v14, %v2467_v16  ;;  %v1534_v23 = vld [vmem:[#allocation2 + $0x28] sm:$0x1]  ;;  %v2469_v29 = vrot.slane %v2402_v15, 1 }
 0x19a   : > { %1238 = vst [vmem:[#allocation2 + $0x110] sm:$0xff] %v1202_v46  ;;  %v2405_v27 = vld [vmem:[#allocation2 + $0x68] sm:$0x1]  ;;  %v2470_v30 = vrot.slane %v2403_v22, 1  ;;  %v5367_v31 = vld [vmem:[%s6747_s4 + $0x1e0] sm:$0xff]   ;;  %v1600_v32 = vrot.slane %v1533_v19, 1 }
 0x19b   : > { %v1929_v56 = vrot.slane %v1927_v49, 1  ;;  %v2074_v33 = vsel %vm1593_vm1, %v2072_v52, %v2073_v24  ;;  %v1601_v50 = vrot.slane %v1534_v23, 1  ;;  %v2472_v34 = vrot.slane %v2404_v26, 1  ;;  %v5368_v37 = vld [vmem:[%s6747_s4 + $0x1a0] sm:$0xff]   ;;  %v5369_v13 = vld [vmem:[%s6747_s4 + $0x1e8] sm:$0xff]   ;;  %v6112_v1 = vld [vmem:[#allocation2 + $0x50] sm:$0xff] }
 0x19c   : > { %3740 = vmatprep.mubr.bf16.mxu0 %v2074_v33  ;;  %v2473_v35 = vrot.slane %v2405_v27, 1  ;;  %v2471_v9 = vsel %vm1593_vm1, %v2469_v29, %v2470_v30  ;;  %v2406_v42 = vld [vmem:[#allocation2 + $0x70] sm:$0xfe]  ;;  %v2407_v43 = vld [vmem:[#allocation2 + $0x78] sm:$0x1]  ;;  %v6094_v45 = vld [vmem:[#allocation2 + $0x40] sm:$0xff] }
 0x19d   : > { %v1930_v36 = vsel %vm1304_vm0, %v1925_v48, %v1929_v56  ;;  %v1602_v40 = vsel %vm1593_vm1, %v1600_v32, %v1601_v50  ;;  %v1536_v44 = vld [vmem:[#allocation2 + $0x38] sm:$0x1]  ;;  %v2408_v46 = vld [vmem:[#allocation2 + $0x80] sm:$0xfe]  ;;  %v2409_v57 = vld [vmem:[#allocation2 + $0x88] sm:$0x1] }
 0x19e   : > { %v2474_v41 = vsel %vm1593_vm1, %v2472_v34, %v2473_v35  ;;  %v5370_v24 = vld [vmem:[%s6747_s4 + $0x1a8] sm:$0xff]   ;;  %v2475_v48 = vrot.slane %v2406_v42, 1  ;;  %v2476_v49 = vrot.slane %v2407_v43, 1  ;;  %v1603_v52 = vrot.slane %v1535_v39, 1  ;;  %v5372_v56 = vld [vmem:[%s6747_s4 + $0x1b0] sm:$0xff]   ;;  %v5374_v5 = vld [vmem:[%s6747_s4 + $0x1b8] sm:$0xff]  }
 0x19f   : > { %3741 = vmatmul.mubr.bf16.gmra.mrb[132].mxu0 %v1930_v36  ;;  %3460 = vmatmul.mubr.bf16.vlgmr.msra.gmra.mrb[64].mxu1 %v1596_v63  ;;  %v1604_v53 = vrot.slane %v1536_v44, 1  ;;  %v2478_v54 = vrot.slane %v2408_v46, 1  ;;  %v2479_v55 = vrot.slane %v2409_v57, 1  ;;  %v5373_v36 = vld [vmem:[%s6747_s4 + $0x1f8] sm:$0xff]   ;;  %v2410_v63 = vld [vmem:[#allocation2 + $0x90] sm:$0xfe] }
 0x1a0   : > { %5185 = vmatprep.mubr.bf16.mxu0 %v2462_v0  ;;  %4946 = vmatpush3.bf16.msra.mxu1 %v5359_v58  ;;  %v2477_v33 = vsel %vm1593_vm1, %v2475_v48, %v2476_v49  ;;  %v1537_v58 = vld [vmem:[#allocation2 + $0x40] sm:$0xfe]  ;;  %v2411_v0 = vld [vmem:[#allocation2 + $0x98] sm:$0x1]  ;;  %v1538_v18 = vld [vmem:[#allocation2 + $0x48] sm:$0x1] }
 0x1a1   : > { %3467 = vmatprep.mubr.bf16.mxu1 %v6058_v3  ;;  %4947 = vmatprep.subr.bf16.mxu1 %v5361_v38  ;;  %v1605_v59 = vsel %vm1593_vm1, %v1603_v52, %v1604_v53  ;;  %v2480_v38 = vsel %vm1593_vm1, %v2478_v54, %v2479_v55  ;;  %v2412_v2 = vld [vmem:[#allocation2 + $0xa0] sm:$0xfe]  ;;  %v2413_v4 = vld [vmem:[#allocation2 + $0xa8] sm:$0x1]  ;;  %v2482_v7 = vrot.slane %v2411_v0, 1  ;;  %v1606_v8 = vrot.slane %v1537_v58, 1 }
 0x1a2   : > { %v2484_v11 = vrot.slane %v2412_v2, 1  ;;  %v2485_v62 = vrot.slane %v2413_v4, 1  ;;  %v1539_v16 = vld [vmem:[#allocation2 + $0x50] sm:$0xfe]  ;;  %v2416_v15 = vld [vmem:[#allocation2 + $0xc0] sm:$0xfe] }
 0x1a3   : > { %v2414_v19 = vld [vmem:[#allocation2 + $0xb0] sm:$0xfe]  ;;  %v2417_v22 = vld [vmem:[#allocation2 + $0xc8] sm:$0x1]  ;;  %v1609_v27 = vrot.slane %v1539_v16, 1  ;;  %v2490_v29 = vrot.slane %v2416_v15, 1 }
 0x1a4   : > { %4948 = vmatpush3.bf16.msra.mxu1 %v5362_v6  ;;  %v2481_v6 = vrot.slane %v2410_v63, 1  ;;  %v2487_v23 = vrot.slane %v2414_v19, 1  ;;  %v2491_v30 = vrot.slane %v2417_v22, 1  ;;  %v1541_v32 = vld [vmem:[#allocation2 + $0x60] sm:$0xfe]  ;;  %v6127_v39 = vld [vmem:[#allocation2 + $0x70] sm:$0xff] }
 0x1a5   : > { %4949 = vmatprep.subr.bf16.mxu1 %v5363_v10  ;;  %v1607_v10 = vrot.slane %v1538_v18, 1  ;;  %v2418_v35 = vld [vmem:[#allocation2 + $0xd0] sm:$0xfe]  ;;  %v1612_v43 = vrot.slane %v1541_v32, 1  ;;  %v2424_v48 = vld [vmem:[#allocation2 + $0x100] sm:$0xfe] }
 0x1a6   : > { %v2483_v14 = vsel %vm1593_vm1, %v2481_v6, %v2482_v7  ;;  %v2492_v34 = vsel %vm1593_vm1, %v2490_v29, %v2491_v30  ;;  %v2425_v49 = vld [vmem:[#allocation2 + $0x108] sm:$0x1]  ;;  %v2422_v53 = vld [vmem:[#allocation2 + $0xf0] sm:$0xfe]  ;;  %v2423_v54 = vld [vmem:[#allocation2 + $0xf8] sm:$0x1] }
 0x1a7   : > { %5186 = vmatmul.mubr.bf16.vlgmr.msra.gmra.mrb[136].mxu0 %v2465_v61  ;;  %3468 = vmatmul.mubr.bf16.gmra.mrb[68].mxu1 %v1599_v20  ;;  %v2486_v61 = vsel %vm1593_vm1, %v2484_v11, %v2485_v62  ;;  %v1540_v20 = vld [vmem:[#allocation2 + $0x58] sm:$0x1]  ;;  %v6133_v55 = vld [vmem:[#allocation2 + $0x80] sm:$0xff]  ;;  %v2502_v58 = vrot.slane %v2424_v48, 1  ;;  %v1546_v7 = vld [vmem:[#allocation2 + $0x88] sm:$0x1] }
 0x1a8   : > { %5189 = vmatprep.mubr.bf16.mxu0 %v2468_v21  ;;  %3475 = vmatprep.mubr.bf16.mxu1 %v6076_v25  ;;  %v6121_v21 = vld [vmem:[#allocation2 + $0x60] sm:$0xff]  ;;  %v1548_v16 = vld [vmem:[#allocation2 + $0x98] sm:$0x1]  ;;  %v1550_v15 = vld [vmem:[#allocation2 + $0xa8] sm:$0x1] }
 0x1a9   : > { %4950 = vmatpush3.bf16.msra.mxu1 %v5364_v17  ;;  %v1608_v17 = vsel %vm1593_vm1, %v1606_v8, %v1607_v10  ;;  %v1545_v6 = vld [vmem:[#allocation2 + $0x80] sm:$0xfe]  ;;  %v1619_v10 = vrot.slane %v1546_v7, 1  ;;  %v1552_v29 = vld [vmem:[#allocation2 + $0xb8] sm:$0x1] }
 0x1aa   : > { %4951 = vmatprep.subr.bf16.mxu1 %v5365_v60  ;;  %v2415_v60 = vld [vmem:[#allocation2 + $0xb8] sm:$0x1]  ;;  %v1618_v8 = vrot.slane %v1545_v6, 1  ;;  %v6143_v62 = vld [vmem:[#allocation2 + $0xa0] sm:$0xff]  ;;  %v1628_v32 = vrot.slane %v1552_v29, 1 }
 0x1ab   : > { %v2488_v26 = vrot.slane %v2415_v60, 1  ;;  %v6147_v60 = vld [vmem:[#allocation2 + $0xb0] sm:$0xff] }
 0x1ac   : > { %v1620_v11 = vsel %vm1593_vm1, %v1618_v8, %v1619_v10 }
 0x1ad   : > { %4952 = vmatpush3.bf16.msra.mxu1 %v5366_v28  ;;  %v1610_v28 = vrot.slane %v1540_v20, 1  ;;  %v1549_v20 = vld [vmem:[#allocation2 + $0xa0] sm:$0xfe] }
 0x1ae   : > { %4953 = vmatprep.subr.bf16.mxu1 %v5367_v31  ;;  %v2489_v31 = vsel %vm1593_vm1, %v2487_v23, %v2488_v26  ;;  %v1624_v22 = vrot.slane %v1549_v20, 1  ;;  %v1625_v23 = vrot.slane %v1550_v15, 1  ;;  %v1557_v15 = vld [vmem:[#allocation2 + $0xe0] sm:$0xfe] }
 0x1af   : > { %5190 = vmatmul.mubr.bf16.gmra.mrb[140].mxu0 %v2471_v9  ;;  %3476 = vmatmul.mubr.bf16.gmra.mrb[72].mxu1 %v1602_v40  ;;  %v1611_v50 = vsel %vm1593_vm1, %v1609_v27, %v1610_v28  ;;  %v1542_v9 = vld [vmem:[#allocation2 + $0x68] sm:$0x1]  ;;  %v6151_v27 = vld [vmem:[#allocation2 + $0xc0] sm:$0xff]  ;;  %v1551_v28 = vld [vmem:[#allocation2 + $0xb0] sm:$0xfe]  ;;  %v1636_v29 = vrot.slane %v1557_v15, 1 }
 0x1b0   : > { %5193 = vmatprep.mubr.bf16.mxu0 %v2474_v41  ;;  %3483 = vmatprep.mubr.bf16.mxu1 %v6094_v45  ;;  %v2421_v40 = vld [vmem:[#allocation2 + $0xe8] sm:$0x1]  ;;  %v2493_v41 = vrot.slane %v2418_v35, 1  ;;  %v1613_v44 = vrot.slane %v1542_v9, 1  ;;  %v1626_v26 = vsel %vm1593_vm1, %v1624_v22, %v1625_v23 }
 0x1b1   : > { %4954 = vmatpush3.bf16.msra.mxu1 %v5368_v37  ;;  %v2419_v37 = vld [vmem:[#allocation2 + $0xd8] sm:$0x1]  ;;  %v2497_v57 = vrot.slane %v2421_v40, 1  ;;  %v6159_v40 = vld [vmem:[#allocation2 + $0xd0] sm:$0xff]  ;;  %v1558_v22 = vld [vmem:[#allocation2 + $0xe8] sm:$0x1] }
 0x1b2   : > { %4955 = vmatprep.subr.bf16.mxu1 %v5369_v13  ;;  %v2420_v13 = vld [vmem:[#allocation2 + $0xe0] sm:$0xfe]  ;;  %v2494_v42 = vrot.slane %v2419_v37, 1 }
 0x1b3   : > { %v2496_v46 = vrot.slane %v2420_v13, 1 }
 0x1b5   : > { %4956 = vmatpush3.bf16.msra.mxu1 %v5370_v24  ;;  %v2495_v24 = vsel %vm1593_vm1, %v2493_v41, %v2494_v42  ;;  %v2498_v52 = vsel %vm1593_vm1, %v2496_v46, %v2497_v57  ;;  %v1553_v41 = vld [vmem:[#allocation2 + $0xc0] sm:$0xfe]  ;;  %v1554_v42 = vld [vmem:[#allocation2 + $0xc8] sm:$0x1] }
 0x1b6   : > { %4957 = vmatprep.subr.bf16.mxu1 %v5371_v51  ;;  %v1614_v51 = vsel %vm1593_vm1, %v1612_v43, %v1613_v44  ;;  %v1630_v57 = vrot.slane %v1553_v41, 1 }
 0x1b7   : > { %5194 = vmatmul.mubr.bf16.gmra.mrb[144].mxu0 %v2477_v33  ;;  %3484 = vmatmul.mubr.bf16.gmra.mrb[76].mxu1 %v1605_v59  ;;  %v1544_v33 = vld [vmem:[#allocation2 + $0x78] sm:$0x1]  ;;  %v2499_v59 = vrot.slane %v2422_v53, 1 }
 0x1b8   : > { %5197 = vmatprep.mubr.bf16.mxu0 %v2480_v38  ;;  %3491 = vmatprep.mubr.bf16.mxu1 %v6112_v1  ;;  %v2500_v38 = vrot.slane %v2423_v54, 1  ;;  %v1616_v0 = vrot.slane %v1544_v33, 1 }
 0x1b9   : > { %4958 = vmatpush3.bf16.msra.mxu1 %v5372_v56  ;;  %v1543_v56 = vld [vmem:[#allocation2 + $0x70] sm:$0xfe] }
 0x1ba   : > { %4959 = vmatprep.subr.bf16.mxu1 %v5373_v36  ;;  %v2503_v36 = vrot.slane %v2425_v49, 1  ;;  %v1615_v63 = vrot.slane %v1543_v56, 1  ;;  %v2501_v2 = vsel %vm1593_vm1, %v2499_v59, %v2500_v38  ;;  %v6171_v59 = vld [vmem:[#allocation2 + $0xe0] sm:$0xff]  ;;  %v1555_v38 = vld [vmem:[#allocation2 + $0xd0] sm:$0xfe] }
 0x1bc   : > { %v2504_v18 = vsel %vm1593_vm1, %v2502_v58, %v2503_v36  ;;  %v1617_v4 = vsel %vm1593_vm1, %v1615_v63, %v1616_v0  ;;  %v1556_v63 = vld [vmem:[#allocation2 + $0xd8] sm:$0x1] }
 0x1bd   : > { %4960 = vmatpush3.bf16.msra.mxu1 %v5374_v5  ;;  %v6139_v5 = vld [vmem:[#allocation2 + $0x90] sm:$0xff]  ;;  %v1634_v6 = vrot.slane %v1556_v63, 1 }
 0x1bf   : > { %5198 = vmatmul.mubr.bf16.gmra.mrb[148].mxu0 %v2483_v14  ;;  %3492 = vmatmul.mubr.bf16.gmra.mrb[80].mxu1 %v1608_v17  ;;  %v1547_v14 = vld [vmem:[#allocation2 + $0x90] sm:$0xfe] }
 0x1c0   : > { %5201 = vmatprep.mubr.bf16.mxu0 %v2486_v61  ;;  %3499 = vmatprep.mubr.bf16.mxu1 %v6121_v21  ;;  %v1621_v17 = vrot.slane %v1547_v14, 1  ;;  %v1622_v61 = vrot.slane %v1548_v16, 1 }
 0x1c2   : > { %v1623_v19 = vsel %vm1593_vm1, %v1621_v17, %v1622_v61 }
 0x1c7   : > { %5202 = vmatmul.mubr.bf16.gmra.mrb[152].mxu0 %v2489_v31  ;;  %3500 = vmatmul.mubr.bf16.gmra.mrb[84].mxu1 %v1611_v50  ;;  %v1627_v31 = vrot.slane %v1551_v28, 1 }
 0x1c8   : > { %5205 = vmatprep.mubr.bf16.mxu0 %v2492_v34  ;;  %3507 = vmatprep.mubr.bf16.mxu1 %v6127_v39 }
 0x1c9   : > { %v1629_v13 = vsel %vm1593_vm1, %v1627_v31, %v1628_v32  ;;  %v2175_v31 = vshll.u32 %v6058_v3, 16 }
 0x1cf   : > { %5206 = vmatmul.mubr.bf16.gmra.mrb[156].mxu0 %v2495_v24  ;;  %3508 = vmatmul.mubr.bf16.gmra.mrb[88].mxu1 %v1614_v51  ;;  %v1631_v24 = vrot.slane %v1554_v42, 1 }
 0x1d0   : > { %5209 = vmatprep.mubr.bf16.mxu0 %v2498_v52  ;;  %3515 = vmatprep.mubr.bf16.mxu1 %v6133_v55 }
 0x1d1   : > { %v1632_v36 = vsel %vm1593_vm1, %v1630_v57, %v1631_v24  ;;  %v2177_v57 = vrot.slane %v2175_v31, 1  ;;  %v2426_v24 = vld [vmem:[#allocation2 + $0x110] sm:$0xfe] }
 0x1d7   : > { %5210 = vmatmul.mubr.bf16.gmra.mrb[160].mxu0 %v2501_v2  ;;  %3516 = vmatmul.mubr.bf16.gmra.mrb[92].mxu1 %v1617_v4  ;;  %v1633_v4 = vrot.slane %v1555_v38, 1  ;;  %v2173_v38 = vshrl.u32 %v6058_v3, 16 }
 0x1d8   : > { %5213 = vmatprep.mubr.bf16.mxu0 %v2504_v18  ;;  %3523 = vmatprep.mubr.bf16.mxu1 %v6139_v5 }
 0x1d9   : > { %v1635_v20 = vsel %vm1593_vm1, %v1633_v4, %v1634_v6 }
 0x1df   : > { %3524 = vmatmul.mubr.bf16.gmra.mrb[96].mxu1 %v1620_v11 }
 0x1e0   : > { %3531 = vmatprep.mubr.bf16.mxu1 %v6143_v62 }
 0x1e7   : > { %3532 = vmatmul.mubr.bf16.gmra.mrb[100].mxu1 %v1623_v19 }
 0x1e8   : > { %3539 = vmatprep.mubr.bf16.mxu1 %v6147_v60 }
 0x1ef   : > { %3540 = vmatmul.mubr.bf16.gmra.mrb[104].mxu1 %v1626_v26 }
 0x1f0   : > { %3547 = vmatprep.mubr.bf16.mxu1 %v6151_v27 }
 0x1f1   : > { %v4625_v30 = vpop.f32.mrb[0].mxu1 }
 0x1f2   : > { %v4626_v50 = vpop.f32.mrb[1].mxu1 }
 0x1f3   : > { %v6154_v34 = vadd.f32 %v4626_v50, %v4625_v30  ;;  %v4628_v35 = vpop.f32.mrb[2].mxu1  ;;  %v1637_v30 = vrot.slane %v1558_v22, 1 }
 0x1f4   : > { %v4629_v37 = vpop.f32.mrb[3].mxu1 }
 0x1f5   : > { %v6156_v9 = vadd.f32 %v4629_v37, %v4628_v35 }
 0x1f7   : > { %3548 = vmatmul.mubr.bf16.gmra.mrb[108].mxu1 %v1629_v13 }
 0x1f8   : > { %3555 = vmatprep.mubr.bf16.mxu1 %v6159_v40 }
 0x1fa   : > { %v4849_v43 = vpop.f32.mrb[72].mxu0  ;;  %v4631_v44 = vpop.f32.mrb[4].mxu1 }
 0x1fb   : > { %v4850_v46 = vpop.f32.mrb[73].mxu0  ;;  %v4632_v49 = vpop.f32.mrb[5].mxu1 }
 0x1fc   : > { %v6162_v48 = vadd.f32 %v4850_v46, %v4849_v43  ;;  %v4852_v51 = vpop.f32.mrb[74].mxu0  ;;  %v6164_v52 = vadd.f32 %v4632_v49, %v4631_v44  ;;  %v4634_v53 = vpop.f32.mrb[6].mxu1  ;;  %v2141_v44 = vld [vmem:[#allocation2 + $0x28] sm:$0x1]  ;;  %v1638_v46 = vsel %vm1593_vm1, %v1636_v29, %v1637_v30  ;;  %v2427_v49 = vld [vmem:[#allocation2 + $0x118] sm:$0x1] }
 0x1fd   : > { %v4853_v54 = vpop.f32.mrb[75].mxu0  ;;  %v4635_v33 = vpop.f32.mrb[7].mxu1  ;;  %v2180_v63 = vshll.u32 %v2141_v44, 16  ;;  %v2143_v30 = vld [vmem:[#allocation2 + $0x38] sm:$0x1] }
 0x1fe   : > { %v6166_v56 = vadd.f32 %v4853_v54, %v4852_v51  ;;  %v6168_v58 = vadd.f32 %v4635_v33, %v4634_v53  ;;  %v1559_v51 = vld [vmem:[#allocation2 + $0xf0] sm:$0xfe]  ;;  %v1560_v53 = vld [vmem:[#allocation2 + $0xf8] sm:$0x1]  ;;  %v2505_v54 = vrot.slane %v2426_v24, 1  ;;  %v2506_v33 = vrot.slane %v2427_v49, 1 }
 0x1ff   : > { %3556 = vmatmul.mubr.bf16.gmra.mrb[112].mxu1 %v1632_v36  ;;  %v1639_v4 = vrot.slane %v1559_v51, 1  ;;  %v1640_v6 = vrot.slane %v1560_v53, 1  ;;  %v2199_v51 = vshll.u32 %v6094_v45, 16 }
 0x200   : > { %3563 = vmatprep.mubr.bf16.mxu1 %v6171_v59 }
 0x201   : > { %v1641_v29 = vsel %vm1593_vm1, %v1639_v4, %v1640_v6  ;;  %v2201_v4 = vrot.slane %v2199_v51, 1 }
 0x202   : > { %v4855_v0 = vpop.f32.mrb[76].mxu0  ;;  %v4637_v18 = vpop.f32.mrb[8].mxu1 }
 0x203   : > { %v4856_v2 = vpop.f32.mrb[77].mxu0  ;;  %v4638_v8 = vpop.f32.mrb[9].mxu1 }
 0x204   : > { %v6174_v7 = vadd.f32 %v4856_v2, %v4855_v0  ;;  %v4858_v10 = vpop.f32.mrb[78].mxu0  ;;  %v6176_v11 = vadd.f32 %v4638_v8, %v4637_v18  ;;  %v4640_v14 = vpop.f32.mrb[10].mxu1  ;;  %v2507_v0 = vsel %vm1593_vm1, %v2505_v54, %v2506_v33 }
 0x205   : > { %v4859_v16 = vpop.f32.mrb[79].mxu0  ;;  %v4641_v61 = vpop.f32.mrb[11].mxu1  ;;  %5214 = vmatmul.mubr.bf16.gmra.mrb[164].mxu0 %v2507_v0 }
 0x206   : > { %v6178_v17 = vadd.f32 %v4859_v16, %v4858_v10  ;;  %v6180_v19 = vadd.f32 %v4641_v61, %v4640_v14  ;;  %v2178_v16 = vor.u32 %v2177_v57, %v2173_v38  ;;  %v2187_v61 = vshll.u32 %v6076_v25, 16 }
 0x207   : > { %3564 = vmatmul.mubr.bf16.gmra.mrb[116].mxu1 %v1635_v20 }
 0x208   : > { %3571 = vmatprep.mubr.bf16.mxu1 %v6022_v12 }
 0x20a   : > { %v4861_v23 = vpop.f32.mrb[80].mxu0  ;;  %v4643_v26 = vpop.f32.mrb[12].mxu1 }
 0x20b   : > { %v4862_v28 = vpop.f32.mrb[81].mxu0  ;;  %v4644_v50 = vpop.f32.mrb[13].mxu1 }
 0x20c   : > { %v6185_v32 = vadd.f32 %v4862_v28, %v4861_v23  ;;  %v4864_v35 = vpop.f32.mrb[82].mxu0  ;;  %v6187_v37 = vadd.f32 %v4644_v50, %v4643_v26  ;;  %v4646_v13 = vpop.f32.mrb[14].mxu1  ;;  %v2182_v26 = vrot.slane %v2180_v63, 1  ;;  %v2189_v50 = vrot.slane %v2187_v61, 1 }
 0x20d   : > { %v4865_v41 = vpop.f32.mrb[83].mxu0  ;;  %v4647_v43 = vpop.f32.mrb[15].mxu1 }
 0x20e   : > { %v6189_v42 = vadd.f32 %v4865_v41, %v4864_v35  ;;  %v6191_v12 = vadd.f32 %v4647_v43, %v4646_v13  ;;  %v2183_v31 = vsel %vm1304_vm0, %v2178_v16, %v2182_v26  ;;  %v2185_v13 = vshrl.u32 %v6076_v25, 16 }
 0x20f   : > { %3572 = vmatmul.mubr.bf16.gmra.mrb[120].mxu1 %v1638_v46  ;;  %v2192_v41 = vshll.u32 %v2143_v30, 16 }
 0x210   : > { %3579 = vmatprep.mubr.bf16.mxu1 %v6035_v47  ;;  %v2190_v49 = vor.u32 %v2189_v50, %v2185_v13 }
 0x211   : > { %v2194_v63 = vrot.slane %v2192_v41, 1 }
 0x212   : > { %v4867_v36 = vpop.f32.mrb[84].mxu0  ;;  %v4649_v18 = vpop.f32.mrb[16].mxu1 }
 0x213   : > { %v4868_v2 = vpop.f32.mrb[85].mxu0  ;;  %v4650_v10 = vpop.f32.mrb[17].mxu1 }
 0x214   : > { %v6197_v8 = vadd.f32 %v4868_v2, %v4867_v36  ;;  %v4870_v14 = vpop.f32.mrb[86].mxu0  ;;  %v6200_v20 = vadd.f32 %v4650_v10, %v4649_v18  ;;  %v4652_v47 = vpop.f32.mrb[18].mxu1  ;;  %v2145_v18 = vld [vmem:[#allocation2 + $0x48] sm:$0x1]  ;;  %v2195_v2 = vsel %vm1304_vm0, %v2190_v49, %v2194_v63  ;;  %v2197_v10 = vshrl.u32 %v6094_v45, 16 }
 0x215   : > { %v4871_v15 = vpop.f32.mrb[87].mxu0  ;;  %v4653_v23 = vpop.f32.mrb[19].mxu1  ;;  %v2209_v49 = vshrl.u32 %v6112_v1, 16 }
 0x216   : > { %v6202_v22 = vadd.f32 %v4871_v15, %v4870_v14  ;;  %v6204_v28 = vadd.f32 %v4653_v23, %v4652_v47  ;;  %v2204_v14 = vshll.u32 %v2145_v18, 16  ;;  %v2202_v26 = vor.u32 %v2201_v4, %v2197_v10 }
 0x217   : > { %3580 = vmatmul.mubr.bf16.gmra.mrb[124].mxu1 %v1641_v29  ;;  %v2211_v29 = vshll.u32 %v6112_v1, 16  ;;  %v2223_v4 = vshll.u32 %v6121_v21, 16 }
 0x218   : > { %3781 = vmatprep.mubr.bf16.mxu1 %v2183_v31  ;;  %v2206_v13 = vrot.slane %v2204_v14, 1 }
 0x21a   : > { %v4873_v35 = vpop.f32.mrb[88].mxu0  ;;  %v4655_v43 = vpop.f32.mrb[20].mxu1 }
 0x21b   : > { %v4874_v44 = vpop.f32.mrb[89].mxu0  ;;  %v4656_v57 = vpop.f32.mrb[21].mxu1 }
 0x21c   : > { %v6209_v46 = vadd.f32 %v4874_v44, %v4873_v35  ;;  %v4876_v24 = vpop.f32.mrb[90].mxu0  ;;  %v6212_v53 = vadd.f32 %v4656_v57, %v4655_v43  ;;  %v4658_v54 = vpop.f32.mrb[22].mxu1  ;;  %v2147_v43 = vld [vmem:[#allocation2 + $0x58] sm:$0x1]  ;;  %v2207_v44 = vsel %vm1304_vm0, %v2202_v26, %v2206_v13  ;;  %v2213_v57 = vrot.slane %v2211_v29, 1 }
 0x21d   : > { %v4877_v33 = vpop.f32.mrb[91].mxu0  ;;  %v4659_v38 = vpop.f32.mrb[23].mxu1  ;;  %v2216_v51 = vshll.u32 %v2147_v43, 16  ;;  %v2225_v29 = vrot.slane %v2223_v4, 1 }
 0x21e   : > { %v6214_v36 = vadd.f32 %v4877_v33, %v4876_v24  ;;  %v6216_v0 = vadd.f32 %v4659_v38, %v4658_v54 }
 0x21f   : > { %3782 = vmatmul.mubr.bf16.vlgmr.msra.gmra.mrb[128].mxu1 %v6058_v3 }
 0x220   : > { %3789 = vmatprep.mubr.bf16.mxu1 %v2195_v2  ;;  %v2214_v2 = vor.u32 %v2213_v57, %v2209_v49 }
 0x222   : > { %v4879_v6 = vpop.f32.mrb[92].mxu0  ;;  %v4661_v16 = vpop.f32.mrb[24].mxu1 }
 0x223   : > { %v4880_v61 = vpop.f32.mrb[93].mxu0  ;;  %v4662_v15 = vpop.f32.mrb[25].mxu1 }
 0x224   : > { %v6221_v47 = vadd.f32 %v4880_v61, %v4879_v6  ;;  %v4882_v23 = vpop.f32.mrb[94].mxu0  ;;  %v6224_v30 = vadd.f32 %v4662_v15, %v4661_v16  ;;  %v4664_v3 = vpop.f32.mrb[26].mxu1  ;;  %v2218_v61 = vrot.slane %v2216_v51, 1  ;;  %v2235_v51 = vshll.u32 %v6127_v39, 16 }
 0x225   : > { %v4883_v31 = vpop.f32.mrb[95].mxu0  ;;  %v4665_v35 = vpop.f32.mrb[27].mxu1 }
 0x226   : > { %v6226_v50 = vadd.f32 %v4883_v31, %v4882_v23  ;;  %v6228_v41 = vadd.f32 %v4665_v35, %v4664_v3  ;;  %v2149_v23 = vld [vmem:[#allocation2 + $0x68] sm:$0x1]  ;;  %v2219_v26 = vsel %vm1304_vm0, %v2214_v2, %v2218_v61  ;;  %v2221_v31 = vshrl.u32 %v6121_v21, 16 }
 0x227   : > { %3790 = vmatmul.mubr.bf16.gmra.mrb[132].mxu1 %v6076_v25  ;;  %v2228_v35 = vshll.u32 %v2149_v23, 16  ;;  %v2233_v23 = vshrl.u32 %v6127_v39, 16 }
 0x228   : > { %3797 = vmatprep.mubr.bf16.mxu1 %v2207_v44  ;;  %v2226_v49 = vor.u32 %v2225_v29, %v2221_v31 }
 0x229   : > { %v2230_v2 = vrot.slane %v2228_v35, 1 }
 0x22a   : > { %v4885_v24 = vpop.f32.mrb[96].mxu0  ;;  %v4667_v54 = vpop.f32.mrb[28].mxu1 }
 0x22b   : > { %v4886_v33 = vpop.f32.mrb[97].mxu0  ;;  %v4668_v63 = vpop.f32.mrb[29].mxu1 }
 0x22c   : > { %v6233_v38 = vadd.f32 %v4886_v33, %v4885_v24  ;;  %v4888_v18 = vpop.f32.mrb[98].mxu0  ;;  %v6236_v6 = vadd.f32 %v4668_v63, %v4667_v54  ;;  %v4670_v25 = vpop.f32.mrb[30].mxu1 }
 0x22d   : > { %v4889_v10 = vpop.f32.mrb[99].mxu0  ;;  %v4671_v16 = vpop.f32.mrb[31].mxu1 }
 0x22e   : > { %v6238_v14 = vadd.f32 %v4889_v10, %v4888_v18  ;;  %v6240_v15 = vadd.f32 %v4671_v16, %v4670_v25  ;;  %v2151_v25 = vld [vmem:[#allocation2 + $0x78] sm:$0x1]  ;;  %v2231_v10 = vsel %vm1304_vm0, %v2226_v49, %v2230_v2  ;;  %v2237_v16 = vrot.slane %v2235_v51, 1  ;;  %v2153_v2 = vld [vmem:[#allocation2 + $0x88] sm:$0x1] }
 0x22f   : > { %3798 = vmatmul.mubr.bf16.gmra.mrb[136].mxu1 %v6094_v45 }
 0x230   : > { %3805 = vmatprep.mubr.bf16.mxu1 %v2219_v26  ;;  %v2240_v26 = vshll.u32 %v2151_v25, 16  ;;  %v2238_v35 = vor.u32 %v2237_v16, %v2233_v23  ;;  %v2252_v23 = vshll.u32 %v2153_v2, 16  ;;  %v2155_v2 = vld [vmem:[#allocation2 + $0x98] sm:$0x1] }
 0x232   : > { %v4891_v3 = vpop.f32.mrb[100].mxu0  ;;  %v4673_v13 = vpop.f32.mrb[32].mxu1 }
 0x233   : > { %v4892_v43 = vpop.f32.mrb[101].mxu0  ;;  %v4674_v57 = vpop.f32.mrb[33].mxu1 }
 0x234   : > { %v6245_v44 = vadd.f32 %v4892_v43, %v4891_v3  ;;  %v4894_v24 = vpop.f32.mrb[102].mxu0  ;;  %v6248_v54 = vadd.f32 %v4674_v57, %v4673_v13  ;;  %v4676_v45 = vpop.f32.mrb[34].mxu1  ;;  %v2247_v57 = vshll.u32 %v6133_v55, 16 }
 0x235   : > { %v4895_v33 = vpop.f32.mrb[103].mxu0  ;;  %v4677_v18 = vpop.f32.mrb[35].mxu1 }
 0x236   : > { %v6250_v63 = vadd.f32 %v4895_v33, %v4894_v24  ;;  %v6252_v4 = vadd.f32 %v4677_v18, %v4676_v45  ;;  %v2242_v33 = vrot.slane %v2240_v26, 1 }
 0x237   : > { %3806 = vmatmul.mubr.bf16.gmra.mrb[140].mxu1 %v6112_v1 }
 0x238   : > { %3813 = vmatprep.mubr.bf16.mxu1 %v2231_v10  ;;  %v2243_v25 = vsel %vm1304_vm0, %v2238_v35, %v2242_v33  ;;  %v2249_v10 = vrot.slane %v2247_v57, 1  ;;  %v2254_v33 = vrot.slane %v2252_v23, 1 }
 0x23a   : > { %v4897_v61 = vpop.f32.mrb[104].mxu0  ;;  %v4679_v29 = vpop.f32.mrb[36].mxu1 }
 0x23b   : > { %v4898_v3 = vpop.f32.mrb[105].mxu0  ;;  %v4680_v13 = vpop.f32.mrb[37].mxu1 }
 0x23c   : > { %v6257_v31 = vadd.f32 %v4898_v3, %v4897_v61  ;;  %v4900_v43 = vpop.f32.mrb[106].mxu0  ;;  %v6260_v24 = vadd.f32 %v4680_v13, %v4679_v29  ;;  %v4682_v1 = vpop.f32.mrb[38].mxu1  ;;  %v2245_v61 = vshrl.u32 %v6133_v55, 16 }
 0x23d   : > { %v4901_v45 = vpop.f32.mrb[107].mxu0  ;;  %v4683_v51 = vpop.f32.mrb[39].mxu1 }
 0x23e   : > { %v6262_v49 = vadd.f32 %v4901_v45, %v4900_v43  ;;  %v6264_v18 = vadd.f32 %v4683_v51, %v4682_v1  ;;  %v2250_v26 = vor.u32 %v2249_v10, %v2245_v61  ;;  %v2259_v1 = vshll.u32 %v6139_v5, 16 }
 0x23f   : > { %3814 = vmatmul.mubr.bf16.gmra.mrb[144].mxu1 %v6121_v21  ;;  %v2257_v61 = vshrl.u32 %v6139_v5, 16 }
 0x240   : > { %6752 = vst [vmem:[#allocation7_spill] sm:$0xff] %v6264_v18  ;;  %3821 = vmatprep.mubr.bf16.mxu1 %v2243_v25 }
 0x242   : > { %v4903_v16 = vpop.f32.mrb[108].mxu0  ;;  %v4685_v29 = vpop.f32.mrb[40].mxu1 }
 0x243   : > { %v4904_v3 = vpop.f32.mrb[109].mxu0  ;;  %v4686_v43 = vpop.f32.mrb[41].mxu1 }
 0x244   : > { %v6269_v13 = vadd.f32 %v4904_v3, %v4903_v16  ;;  %v4906_v45 = vpop.f32.mrb[110].mxu0  ;;  %v6272_v51 = vadd.f32 %v4686_v43, %v4685_v29  ;;  %v4688_v21 = vpop.f32.mrb[42].mxu1  ;;  %v2255_v16 = vsel %vm1304_vm0, %v2250_v26, %v2254_v33  ;;  %v2261_v3 = vrot.slane %v2259_v1, 1 }
 0x245   : > { %v4907_v18 = vpop.f32.mrb[111].mxu0  ;;  %v4689_v57 = vpop.f32.mrb[43].mxu1  ;;  %v2264_v29 = vshll.u32 %v2155_v2, 16  ;;  %v2157_v2 = vld [vmem:[#allocation2 + $0xa8] sm:$0x1] }
 0x246   : > { %6753 = vst [vmem:[#allocation8_spill] sm:$0xff] %v6269_v13  ;;  %6754 = vst [vmem:[#allocation9_spill] sm:$0xff] %v6272_v51  ;;  %v6274_v35 = vadd.f32 %v4907_v18, %v4906_v45  ;;  %v6276_v25 = vadd.f32 %v4689_v57, %v4688_v21  ;;  %v2262_v23 = vor.u32 %v2261_v3, %v2257_v61  ;;  %v2271_v21 = vshll.u32 %v6143_v62, 16 }
 0x247   : > { %3822 = vmatmul.mubr.bf16.gmra.mrb[148].mxu1 %v6127_v39  ;;  %v2266_v33 = vrot.slane %v2264_v29, 1  ;;  %v2269_v61 = vshrl.u32 %v6143_v62, 16 }
 0x248   : > { %6755 = vst [vmem:[#allocation10_spill] sm:$0xff] %v6276_v25  ;;  %3829 = vmatprep.mubr.bf16.mxu1 %v2255_v16 }
 0x24a   : > { %v4909_v10 = vpop.f32.mrb[112].mxu0  ;;  %v4691_v43 = vpop.f32.mrb[44].mxu1 }
 0x24b   : > { %v4910_v51 = vpop.f32.mrb[113].mxu0  ;;  %v4692_v18 = vpop.f32.mrb[45].mxu1 }
 0x24c   : > { %v6281_v13 = vadd.f32 %v4910_v51, %v4909_v10  ;;  %v4912_v45 = vpop.f32.mrb[114].mxu0  ;;  %v6284_v57 = vadd.f32 %v4692_v18, %v4691_v43  ;;  %v4694_v39 = vpop.f32.mrb[46].mxu1  ;;  %v2267_v51 = vsel %vm1304_vm0, %v2262_v23, %v2266_v33  ;;  %v2273_v10 = vrot.slane %v2271_v21, 1 }
 0x24d   : > { %v4913_v25 = vpop.f32.mrb[115].mxu0  ;;  %v4695_v1 = vpop.f32.mrb[47].mxu1  ;;  %v2276_v43 = vshll.u32 %v2157_v2, 16  ;;  %v2159_v2 = vld [vmem:[#allocation2 + $0xb8] sm:$0x1] }
 0x24e   : > { %6756 = vst [vmem:[#allocation11_spill] sm:$0xff] %v6281_v13  ;;  %6757 = vst [vmem:[#allocation12_spill] sm:$0xff] %v6284_v57  ;;  %v6286_v26 = vadd.f32 %v4913_v25, %v4912_v45  ;;  %v6288_v16 = vadd.f32 %v4695_v1, %v4694_v39  ;;  %v2274_v29 = vor.u32 %v2273_v10, %v2269_v61  ;;  %v2283_v39 = vshll.u32 %v6147_v60, 16 }
 0x24f   : > { %3830 = vmatmul.mubr.bf16.gmra.mrb[152].mxu1 %v6133_v55  ;;  %v2278_v33 = vrot.slane %v2276_v43, 1  ;;  %v2281_v61 = vshrl.u32 %v6147_v60, 16 }
 0x250   : > { %6758 = vst [vmem:[#allocation13_spill] sm:$0xff] %v6288_v16  ;;  %3837 = vmatprep.mubr.bf16.mxu1 %v2267_v51 }
 0x252   : > { %v4915_v3 = vpop.f32.mrb[116].mxu0  ;;  %v4697_v18 = vpop.f32.mrb[48].mxu1 }
 0x253   : > { %v4916_v57 = vpop.f32.mrb[117].mxu0  ;;  %v4698_v25 = vpop.f32.mrb[49].mxu1 }
 0x254   : > { %v6293_v13 = vadd.f32 %v4916_v57, %v4915_v3  ;;  %v4918_v45 = vpop.f32.mrb[118].mxu0  ;;  %v6296_v1 = vadd.f32 %v4698_v25, %v4697_v18  ;;  %v4700_v55 = vpop.f32.mrb[50].mxu1  ;;  %v2279_v57 = vsel %vm1304_vm0, %v2274_v29, %v2278_v33  ;;  %v2285_v3 = vrot.slane %v2283_v39, 1 }
 0x255   : > { %v4919_v16 = vpop.f32.mrb[119].mxu0  ;;  %v4701_v21 = vpop.f32.mrb[51].mxu1  ;;  %v2288_v18 = vshll.u32 %v2159_v2, 16  ;;  %v2161_v2 = vld [vmem:[#allocation2 + $0xc8] sm:$0x1] }
 0x256   : > { %6759 = vst [vmem:[#allocation14_spill] sm:$0xff] %v6293_v13  ;;  %6760 = vst [vmem:[#allocation15_spill] sm:$0xff] %v6296_v1  ;;  %v6298_v23 = vadd.f32 %v4919_v16, %v4918_v45  ;;  %v6300_v51 = vadd.f32 %v4701_v21, %v4700_v55  ;;  %v2286_v43 = vor.u32 %v2285_v3, %v2281_v61  ;;  %v2295_v55 = vshll.u32 %v6151_v27, 16 }
 0x257   : > { %3838 = vmatmul.mubr.bf16.gmra.mrb[156].mxu1 %v6139_v5  ;;  %v2290_v33 = vrot.slane %v2288_v18, 1  ;;  %v2293_v61 = vshrl.u32 %v6151_v27, 16 }
 0x258   : > { %6761 = vst [vmem:[#allocation16_spill] sm:$0xff] %v6300_v51  ;;  %3845 = vmatprep.mubr.bf16.mxu1 %v2279_v57 }
 0x25a   : > { %v4921_v10 = vpop.f32.mrb[120].mxu0  ;;  %v4703_v25 = vpop.f32.mrb[52].mxu1 }
 0x25b   : > { %v4922_v1 = vpop.f32.mrb[121].mxu0  ;;  %v4704_v16 = vpop.f32.mrb[53].mxu1 }
 0x25c   : > { %v6305_v13 = vadd.f32 %v4922_v1, %v4921_v10  ;;  %v4924_v45 = vpop.f32.mrb[122].mxu0  ;;  %v6308_v21 = vadd.f32 %v4704_v16, %v4703_v25  ;;  %v4706_v5 = vpop.f32.mrb[54].mxu1  ;;  %v2291_v1 = vsel %vm1304_vm0, %v2286_v43, %v2290_v33  ;;  %v2297_v10 = vrot.slane %v2295_v55, 1 }
 0x25d   : > { %v4925_v51 = vpop.f32.mrb[123].mxu0  ;;  %v4707_v39 = vpop.f32.mrb[55].mxu1  ;;  %v2300_v25 = vshll.u32 %v2161_v2, 16  ;;  %v2163_v2 = vld [vmem:[#allocation2 + $0xd8] sm:$0x1] }
 0x25e   : > { %6762 = vst [vmem:[#allocation17_spill] sm:$0xff] %v6305_v13  ;;  %6763 = vst [vmem:[#allocation18_spill] sm:$0xff] %v6308_v21  ;;  %v6310_v29 = vadd.f32 %v4925_v51, %v4924_v45  ;;  %v6312_v57 = vadd.f32 %v4707_v39, %v4706_v5  ;;  %v2298_v18 = vor.u32 %v2297_v10, %v2293_v61  ;;  %v2307_v5 = vshll.u32 %v6159_v40, 16 }
 0x25f   : > { %3846 = vmatmul.mubr.bf16.gmra.mrb[160].mxu1 %v6143_v62  ;;  %v2302_v33 = vrot.slane %v2300_v25, 1  ;;  %v2305_v61 = vshrl.u32 %v6159_v40, 16 }
 0x260   : > { %6764 = vst [vmem:[#allocation19_spill] sm:$0xff] %v6310_v29  ;;  %6765 = vst [vmem:[#allocation20_spill] sm:$0xff] %v6312_v57  ;;  %3853 = vmatprep.mubr.bf16.mxu1 %v2291_v1 }
 0x262   : > { %v4927_v3 = vpop.f32.mrb[124].mxu0  ;;  %v4709_v16 = vpop.f32.mrb[56].mxu1 }
 0x263   : > { %v4928_v21 = vpop.f32.mrb[125].mxu0  ;;  %v4710_v51 = vpop.f32.mrb[57].mxu1 }
 0x264   : > { %v6317_v13 = vadd.f32 %v4928_v21, %v4927_v3  ;;  %v4930_v45 = vpop.f32.mrb[126].mxu0  ;;  %v6320_v39 = vadd.f32 %v4710_v51, %v4709_v16  ;;  %v4712_v62 = vpop.f32.mrb[58].mxu1  ;;  %v2303_v21 = vsel %vm1304_vm0, %v2298_v18, %v2302_v33  ;;  %v2309_v3 = vrot.slane %v2307_v5, 1 }
 0x265   : > { %v4931_v57 = vpop.f32.mrb[127].mxu0  ;;  %v4713_v55 = vpop.f32.mrb[59].mxu1  ;;  %v2312_v16 = vshll.u32 %v2163_v2, 16  ;;  %v2165_v2 = vld [vmem:[#allocation2 + $0xe8] sm:$0x1] }
 0x266   : > { %6766 = vst [vmem:[#allocation21_spill] sm:$0xff] %v6317_v13  ;;  %6767 = vst [vmem:[#allocation22_spill] sm:$0xff] %v6320_v39  ;;  %v6322_v43 = vadd.f32 %v4931_v57, %v4930_v45  ;;  %v6324_v1 = vadd.f32 %v4713_v55, %v4712_v62  ;;  %v2310_v25 = vor.u32 %v2309_v3, %v2305_v61  ;;  %v2319_v62 = vshll.u32 %v6171_v59, 16  ;;  %v6340_v3 = vld [vmem:[#allocation2 + $0xf0] sm:$0xff]  ;;  %v6345_v61 = vld [vmem:[%s6748_s5] ss:$0 sm:$0xff] }
 0x267   : > { %3854 = vmatmul.mubr.bf16.gmra.mrb[164].mxu1 %v6147_v60  ;;  %v2314_v33 = vrot.slane %v2312_v16, 1  ;;  %v2324_v16 = vshll.u32 %v2165_v2, 16  ;;  %v3304_v2 = vadd.f32 %v6156_v9, %v6345_v61 }
 0x268   : > { %6768 = vst [vmem:[#allocation23_spill] sm:$0xff] %v6322_v43  ;;  %6769 = vst [vmem:[#allocation24_spill] sm:$0xff] %v6324_v1  ;;  %3861 = vmatprep.mubr.bf16.mxu1 %v2303_v21 }
 0x269   : > { %v2326_v43 = vrot.slane %v2324_v16, 1  ;;  %v2329_v16 = vshrl.u32 %v6340_v3, 16 }
 0x26a   : > { %v4933_v10 = vpop.f32.mrb[128].mxu0  ;;  %v4715_v51 = vpop.f32.mrb[60].mxu1 }
 0x26b   : > { %v4934_v39 = vpop.f32.mrb[129].mxu0  ;;  %v4716_v57 = vpop.f32.mrb[61].mxu1 }
 0x26c   : > { %v6329_v13 = vadd.f32 %v4934_v39, %v4933_v10  ;;  %v4936_v45 = vpop.f32.mrb[130].mxu0  ;;  %v6332_v55 = vadd.f32 %v4716_v57, %v4715_v51  ;;  %v4718_v60 = vpop.f32.mrb[62].mxu1  ;;  %v2315_v39 = vsel %vm1304_vm0, %v2310_v25, %v2314_v33  ;;  %v2321_v10 = vrot.slane %v2319_v62, 1 }
 0x26d   : > { %v4937_v1 = vpop.f32.mrb[131].mxu0  ;;  %v4719_v5 = vpop.f32.mrb[63].mxu1  ;;  %v2317_v51 = vshrl.u32 %v6171_v59, 16  ;;  %v2331_v62 = vshll.u32 %v6340_v3, 16  ;;  %v3301_v33 = vadd.f32 %v6154_v34, %v6345_v61  ;;  %v6359_v34 = vld [vmem:[#allocation2 + $0x100] sm:$0xff] }
 0x26e   : > { %6770 = vst [vmem:[#allocation25_spill] sm:$0xff] %v6329_v13  ;;  %6771 = vst [vmem:[#allocation26_spill] sm:$0xff] %v6332_v55  ;;  %v6334_v18 = vadd.f32 %v4937_v1, %v4936_v45  ;;  %v6336_v21 = vadd.f32 %v4719_v5, %v4718_v60 }
 0x26f   : > { %3862 = vmatmul.mubr.bf16.gmra.mrb[168].mxu1 %v6151_v27  ;;  %v2322_v25 = vor.u32 %v2321_v10, %v2317_v51  ;;  %v2333_v51 = vrot.slane %v2331_v62, 1 }
 0x270   : > { %6772 = vst [vmem:[#allocation27_spill] sm:$0xff] %v6334_v18  ;;  %6773 = vst [vmem:[#allocation28_spill] sm:$0xff] %v6336_v21  ;;  %3869 = vmatprep.mubr.bf16.mxu1 %v2315_v39 }
 0x271   : > { %v2327_v10 = vsel %vm1304_vm0, %v2322_v25, %v2326_v43  ;;  %v2343_v25 = vshll.u32 %v6359_v34, 16 }
 0x272   : > { %v4939_v1 = vpop.f32.mrb[132].mxu0  ;;  %v4737_v57 = vpop.f32.mrb[64].mxu1 }
 0x273   : > { %v4940_v45 = vpop.f32.mrb[133].mxu0  ;;  %v4738_v60 = vpop.f32.mrb[65].mxu1 }
 0x274   : > { %v6348_v5 = vadd.f32 %v4940_v45, %v4939_v1  ;;  %v4942_v27 = vpop.f32.mrb[134].mxu0  ;;  %v4739_v39 = vadd.f32 %v4738_v60, %v4737_v57  ;;  %v4740_v21 = vpop.f32.mrb[66].mxu1  ;;  %v2167_v45 = vld [vmem:[#allocation2 + $0xf8] sm:$0x1] }
 0x275   : > { %v4943_v55 = vpop.f32.mrb[135].mxu0  ;;  %v4741_v18 = vpop.f32.mrb[67].mxu1  ;;  %v2336_v9 = vshll.u32 %v2167_v45, 16 }
 0x276   : > { %6774 = vst [vmem:[#allocation29_spill] sm:$0xff] %v6348_v5  ;;  %v6353_v13 = vadd.f32 %v4943_v55, %v4942_v27  ;;  %v3462_v29 = vadd.f32 %v4739_v39, %v3301_v33  ;;  %v4742_v1 = vadd.f32 %v4741_v18, %v4740_v21  ;;  %v2334_v27 = vor.u32 %v2333_v51, %v2329_v16  ;;  %v2169_v39 = vld [vmem:[#allocation2 + $0x108] sm:$0x1] }
 0x277   : > { %3870 = vmatmul.mubr.bf16.gmra.mrb[172].mxu1 %v6159_v40  ;;  %v2341_v51 = vshrl.u32 %v6359_v34, 16  ;;  %v2345_v16 = vrot.slane %v2343_v25, 1  ;;  %v5376_v25 = vld [vmem:[#allocation2 + $0x110] sm:$0xff] }
 0x278   : > { %v3465_v5 = vadd.f32 %v4742_v1, %v3304_v2  ;;  %3877 = vmatprep.mubr.bf16.mxu1 %v2327_v10  ;;  %v6362_v57 = vadd.f32 %v6162_v48, %v3462_v29  ;;  %v3309_v48 = vadd.f32 %v6164_v52, %v6345_v61  ;;  %v2338_v1 = vrot.slane %v2336_v9, 1 }
 0x279   : > { %v2348_v52 = vshll.u32 %v2169_v39, 16  ;;  %v3317_v39 = vadd.f32 %v6176_v11, %v6345_v61 }
 0x27a   : > { %v6364_v55 = vpop.f32.mrb[136].mxu0  ;;  %v4743_v60 = vpop.f32.mrb[68].mxu1  ;;  %v6370_v40 = vadd.f32 %v6166_v56, %v3465_v5  ;;  %v3312_v56 = vadd.f32 %v6168_v58, %v6345_v61  ;;  %v2339_v10 = vsel %vm1304_vm0, %v2334_v27, %v2338_v1  ;;  %v2346_v27 = vor.u32 %v2345_v16, %v2341_v51 }
 0x27b   : > { %6775 = vst [vmem:[#allocation30_spill] sm:$0xff] %v6364_v55  ;;  %v6367_v18 = vpop.f32.mrb[137].mxu0  ;;  %v4744_v43 = vpop.f32.mrb[69].mxu1  ;;  %v2353_v16 = vshrl.u32 %v5376_v25, 16 }
 0x27c   : > { %v6372_v21 = vpop.f32.mrb[138].mxu0  ;;  %v4745_v29 = vadd.f32 %v4744_v43, %v4743_v60  ;;  %v4746_v62 = vpop.f32.mrb[70].mxu1 }
 0x27d   : > { %6776 = vst [vmem:[#allocation31_spill] sm:$0xff] %v6372_v21  ;;  %v6377_v33 = vpop.f32.mrb[139].mxu0  ;;  %v4747_v2 = vpop.f32.mrb[71].mxu1 }
 0x27e   : > { %v3470_v5 = vadd.f32 %v4745_v29, %v3309_v48  ;;  %v4748_v45 = vadd.f32 %v4747_v2, %v4746_v62  ;;  %v2350_v29 = vrot.slane %v2348_v52, 1  ;;  %v2355_v62 = vshll.u32 %v5376_v25, 16 }
 0x27f   : > { %3878 = vmatmul.mubr.bf16.gmra.mrb[176].mxu1 %v6171_v59  ;;  %v3325_v25 = vadd.f32 %v6187_v37, %v6345_v61 }
 0x280   : > { %v3473_v60 = vadd.f32 %v4748_v45, %v3312_v56  ;;  %3885 = vmatprep.mubr.bf16.mxu1 %v2339_v10  ;;  %v6385_v43 = vadd.f32 %v6174_v7, %v3470_v5  ;;  %v2171_v56 = vld [vmem:[#allocation2 + $0x118] sm:$0x1]  ;;  %v2351_v51 = vsel %vm1304_vm0, %v2346_v27, %v2350_v29  ;;  %v2357_v52 = vrot.slane %v2355_v62, 1 }
 0x282   : > { %v6387_v21 = vpop.f32.mrb[140].mxu0  ;;  %v4749_v9 = vpop.f32.mrb[72].mxu1  ;;  %v6392_v58 = vadd.f32 %v6178_v17, %v3473_v60  ;;  %v3320_v17 = vadd.f32 %v6180_v19, %v6345_v61  ;;  %v2360_v60 = vshll.u32 %v2171_v56, 16  ;;  %v2358_v27 = vor.u32 %v2357_v52, %v2353_v16 }
 0x283   : > { %6777 = vst [vmem:[#allocation32_spill] sm:$0xff] %v6387_v21  ;;  %v6389_v55 = vpop.f32.mrb[141].mxu0  ;;  %v4750_v59 = vpop.f32.mrb[73].mxu1  ;;  %v3328_v56 = vadd.f32 %v6191_v12, %v6345_v61 }
 0x284   : > { %v6394_v48 = vpop.f32.mrb[142].mxu0  ;;  %v4751_v7 = vadd.f32 %v4750_v59, %v4749_v9  ;;  %v4752_v2 = vpop.f32.mrb[74].mxu1  ;;  %v2362_v29 = vrot.slane %v2360_v60, 1 }
 0x285   : > { %6778 = vst [vmem:[#allocation33_spill] sm:$0xff] %v6394_v48  ;;  %v6398_v1 = vpop.f32.mrb[143].mxu0  ;;  %v4753_v5 = vpop.f32.mrb[75].mxu1 }
 0x286   : > { %v3478_v45 = vadd.f32 %v4751_v7, %v3317_v39  ;;  %v4754_v10 = vadd.f32 %v4753_v5, %v4752_v2 }
 0x287   : > { %3886 = vmatmul.mubr.bf16.gmra.mrb[180].mxu1 %v6340_v3 }
 0x288   : > { %v3481_v48 = vadd.f32 %v4754_v10, %v3320_v17  ;;  %3893 = vmatprep.mubr.bf16.mxu1 %v2351_v51  ;;  %v6405_v11 = vadd.f32 %v6185_v32, %v3478_v45 }
 0x28a   : > { %v6407_v9 = vpop.f32.mrb[144].mxu0  ;;  %v4755_v59 = vpop.f32.mrb[76].mxu1  ;;  %v6412_v19 = vadd.f32 %v6189_v42, %v3481_v48  ;;  %v2363_v42 = vsel %vm1304_vm0, %v2358_v27, %v2362_v29  ;;  %v3336_v27 = vadd.f32 %v6204_v28, %v6345_v61  ;;  %v3341_v28 = vadd.f32 %v6212_v53, %v6345_v61 }
 0x28b   : > { %v6409_v21 = vpop.f32.mrb[145].mxu0  ;;  %v4756_v39 = vpop.f32.mrb[77].mxu1 }
 0x28c   : > { %v6414_v3 = vpop.f32.mrb[146].mxu0  ;;  %v4757_v62 = vadd.f32 %v4756_v39, %v4755_v59  ;;  %v4758_v7 = vpop.f32.mrb[78].mxu1 }
 0x28d   : > { %v6418_v32 = vpop.f32.mrb[147].mxu0  ;;  %v4759_v2 = vpop.f32.mrb[79].mxu1 }
 0x28e   : > { %v3486_v5 = vadd.f32 %v4757_v62, %v3325_v25  ;;  %v4760_v17 = vadd.f32 %v4759_v2, %v4758_v7  ;;  %v2123_v62 = vld [vmem:[#allocation2 + $0x110] sm:$0xff] }
 0x28f   : > { %3894 = vmatmul.mubr.bf16.gmra.mrb[184].mxu1 %v6359_v34  ;;  %v3333_v34 = vadd.f32 %v6200_v20, %v6345_v61 }
 0x290   : > { %v3489_v48 = vadd.f32 %v4760_v17, %v3328_v56  ;;  %3901 = vmatprep.mubr.bf16.mxu1 %v2363_v42  ;;  %v6425_v45 = vadd.f32 %v6197_v8, %v3486_v5 }
 0x292   : > { %v6427_v37 = vpop.f32.mrb[148].mxu0  ;;  %v4761_v10 = vpop.f32.mrb[80].mxu1  ;;  %v6432_v16 = vadd.f32 %v6202_v22, %v3489_v48 }
 0x293   : > { %v6429_v51 = vpop.f32.mrb[149].mxu0  ;;  %v4762_v12 = vpop.f32.mrb[81].mxu1 }
 0x294   : > { %v6434_v52 = vpop.f32.mrb[150].mxu0  ;;  %v4763_v60 = vadd.f32 %v4762_v12, %v4761_v10  ;;  %v4764_v59 = vpop.f32.mrb[82].mxu1 }
 0x295   : > { %v6438_v39 = vpop.f32.mrb[151].mxu0  ;;  %v4765_v8 = vpop.f32.mrb[83].mxu1 }
 0x296   : > { %v3494_v29 = vadd.f32 %v4763_v60, %v3333_v34  ;;  %v4766_v25 = vadd.f32 %v4765_v8, %v4764_v59  ;;  %v3344_v34 = vadd.f32 %v6216_v0, %v6345_v61  ;;  %v3349_v0 = vadd.f32 %v6224_v30, %v6345_v61 }
 0x297   : > { %3902 = vmatmul.mubr.bf16.gmra.mrb[188].mxu1 %v2123_v62 }
 0x298   : > { %v3497_v22 = vadd.f32 %v4766_v25, %v3336_v27  ;;  %v6443_v7 = vadd.f32 %v6209_v46, %v3494_v29 }
 0x29a   : > { %v6445_v2 = vpop.f32.mrb[152].mxu0  ;;  %v4767_v56 = vpop.f32.mrb[84].mxu1  ;;  %v6450_v5 = vadd.f32 %v6214_v36, %v3497_v22 }
 0x29b   : > { %v6447_v20 = vpop.f32.mrb[153].mxu0  ;;  %v4768_v17 = vpop.f32.mrb[85].mxu1 }
 0x29c   : > { %v6452_v42 = vpop.f32.mrb[154].mxu0  ;;  %v4769_v48 = vadd.f32 %v4768_v17, %v4767_v56  ;;  %v4770_v10 = vpop.f32.mrb[86].mxu1 }
 0x29d   : > { %v6456_v12 = vpop.f32.mrb[155].mxu0  ;;  %v4771_v46 = vpop.f32.mrb[87].mxu1 }
 0x29e   : > { %v3502_v60 = vadd.f32 %v4769_v48, %v3341_v28  ;;  %v4772_v59 = vadd.f32 %v4771_v46, %v4770_v10  ;;  %v3352_v48 = vadd.f32 %v6228_v41, %v6345_v61  ;;  %v3357_v41 = vadd.f32 %v6236_v6, %v6345_v61 }
 0x29f   : > { %v3365_v6 = vadd.f32 %v6248_v54, %v6345_v61  ;;  %v3373_v54 = vadd.f32 %v6260_v24, %v6345_v61 }
 0x2a0   : > { %v3505_v8 = vadd.f32 %v4772_v59, %v3344_v34  ;;  %v6461_v36 = vadd.f32 %v6221_v47, %v3502_v60 }
 0x2a2   : > { %v6463_v27 = vpop.f32.mrb[156].mxu0  ;;  %v4773_v29 = vpop.f32.mrb[88].mxu1  ;;  %v6468_v53 = vadd.f32 %v6226_v50, %v3505_v8 }
 0x2a3   : > { %6779 = vst [vmem:[#allocation34_spill] sm:$0xff] %v6463_v27  ;;  %v6465_v25 = vpop.f32.mrb[157].mxu0  ;;  %v4774_v62 = vpop.f32.mrb[89].mxu1  ;;  %v6801_v27 = vld [vmem:[#allocation20_spill] sm:$0xff] }
 0x2a4   : > { %v6470_v22 = vpop.f32.mrb[158].mxu0  ;;  %v4775_v56 = vadd.f32 %v4774_v62, %v4773_v29  ;;  %v4776_v17 = vpop.f32.mrb[90].mxu1 }
 0x2a5   : > { %6780 = vst [vmem:[#allocation35_spill] sm:$0xff] %v6470_v22  ;;  %v6474_v28 = vpop.f32.mrb[159].mxu0  ;;  %v4777_v47 = vpop.f32.mrb[91].mxu1  ;;  %v6795_v22 = vld [vmem:[#allocation16_spill] sm:$0xff] }
 0x2a6   : > { %v3510_v10 = vadd.f32 %v4775_v56, %v3349_v0  ;;  %v4778_v46 = vadd.f32 %v4777_v47, %v4776_v17  ;;  %v3360_v47 = vadd.f32 %v6240_v15, %v6345_v61  ;;  %v3368_v15 = vadd.f32 %v6252_v4, %v6345_v61 }
 0x2a8   : > { %v3513_v34 = vadd.f32 %v4778_v46, %v3352_v48  ;;  %v6479_v50 = vadd.f32 %v6233_v38, %v3510_v10 }
 0x2aa   : > { %v6481_v60 = vpop.f32.mrb[160].mxu0  ;;  %v4779_v59 = vpop.f32.mrb[92].mxu1  ;;  %v6486_v30 = vadd.f32 %v6238_v14, %v3513_v34 }
 0x2ab   : > { %6781 = vst [vmem:[#allocation36_spill] sm:$0xff] %v6481_v60  ;;  %v6483_v8 = vpop.f32.mrb[161].mxu0  ;;  %v4780_v29 = vpop.f32.mrb[93].mxu1 }
 0x2ac   : > { %6782 = vst [vmem:[#allocation37_spill] sm:$0xff] %v6483_v8  ;;  %v6488_v62 = vpop.f32.mrb[162].mxu0  ;;  %v4781_v0 = vadd.f32 %v4780_v29, %v4779_v59  ;;  %v4782_v56 = vpop.f32.mrb[94].mxu1  ;;  %v6791_v8 = vld [vmem:[#allocation13_spill] sm:$0xff] }
 0x2ad   : > { %6783 = vst [vmem:[#allocation38_spill] sm:$0xff] %v6488_v62  ;;  %v6492_v17 = vpop.f32.mrb[163].mxu0  ;;  %v4783_v38 = vpop.f32.mrb[95].mxu1 }
 0x2ae   : > { %6784 = vst [vmem:[#allocation39_spill] sm:$0xff] %v6492_v17  ;;  %v3518_v48 = vadd.f32 %v4781_v0, %v3357_v41  ;;  %v4784_v10 = vadd.f32 %v4783_v38, %v4782_v56 }
 0x2b0   : > { %v3521_v46 = vadd.f32 %v4784_v10, %v3360_v47  ;;  %v6497_v14 = vadd.f32 %v6245_v44, %v3518_v48 }
 0x2b2   : > { %v4785_v34 = vpop.f32.mrb[96].mxu1  ;;  %v6500_v62 = vadd.f32 %v6250_v63, %v3521_v46  ;;  %v6785_v46 = vld [vmem:[#allocation7_spill] sm:$0xff] }
 0x2b3   : > { %v4786_v60 = vpop.f32.mrb[97].mxu1  ;;  %v3376_v4 = vadd.f32 %v6785_v46, %v6345_v61 }
 0x2b4   : > { %v4787_v59 = vadd.f32 %v4786_v60, %v4785_v34  ;;  %v4788_v29 = vpop.f32.mrb[98].mxu1 }
 0x2b5   : > { %v4789_v17 = vpop.f32.mrb[99].mxu1 }
 0x2b6   : > { %v3526_v41 = vadd.f32 %v4787_v59, %v3365_v6  ;;  %v4790_v0 = vadd.f32 %v4789_v17, %v4788_v29  ;;  %v6786_v59 = vld [vmem:[#allocation8_spill] sm:$0xff] }
 0x2b8   : > { %v3529_v56 = vadd.f32 %v4790_v0, %v3368_v15  ;;  %v6507_v44 = vadd.f32 %v6257_v31, %v3526_v41  ;;  %v6787_v41 = vld [vmem:[#allocation9_spill] sm:$0xff] }
 0x2b9   : > { %v3381_v24 = vadd.f32 %v6787_v41, %v6345_v61 }
 0x2ba   : > { %v4791_v38 = vpop.f32.mrb[100].mxu1  ;;  %v6510_v63 = vadd.f32 %v6262_v49, %v3529_v56 }
 0x2bb   : > { %v4792_v47 = vpop.f32.mrb[101].mxu1 }
 0x2bc   : > { %v4793_v60 = vadd.f32 %v4792_v47, %v4791_v38  ;;  %v4794_v48 = vpop.f32.mrb[102].mxu1  ;;  %v6788_v47 = vld [vmem:[#allocation10_spill] sm:$0xff] }
 0x2bd   : > { %v4795_v10 = vpop.f32.mrb[103].mxu1  ;;  %v3384_v46 = vadd.f32 %v6788_v47, %v6345_v61  ;;  %v3392_v47 = vadd.f32 %v6791_v8, %v6345_v61  ;;  %v3400_v8 = vadd.f32 %v6795_v22, %v6345_v61  ;;  %v3408_v22 = vadd.f32 %v6801_v27, %v6345_v61 }
 0x2be   : > { %v3534_v34 = vadd.f32 %v4793_v60, %v3373_v54  ;;  %v4796_v17 = vadd.f32 %v4795_v10, %v4794_v48  ;;  %v6789_v10 = vld [vmem:[#allocation11_spill] sm:$0xff] }
 0x2c0   : > { %v3537_v6 = vadd.f32 %v4796_v17, %v3376_v4  ;;  %v6517_v31 = vadd.f32 %v6786_v59, %v3534_v34 }
 0x2c2   : > { %v4797_v29 = vpop.f32.mrb[104].mxu1  ;;  %v6520_v49 = vadd.f32 %v6274_v35, %v3537_v6  ;;  %v6790_v6 = vld [vmem:[#allocation12_spill] sm:$0xff] }
 0x2c3   : > { %v4798_v15 = vpop.f32.mrb[105].mxu1  ;;  %v3389_v59 = vadd.f32 %v6790_v6, %v6345_v61 }
 0x2c4   : > { %v4799_v0 = vadd.f32 %v4798_v15, %v4797_v29  ;;  %v4800_v56 = vpop.f32.mrb[106].mxu1 }
 0x2c5   : > { %v4801_v38 = vpop.f32.mrb[107].mxu1 }
 0x2c6   : > { %v3542_v54 = vadd.f32 %v4799_v0, %v3381_v24  ;;  %v4802_v60 = vadd.f32 %v4801_v38, %v4800_v56  ;;  %v6792_v38 = vld [vmem:[#allocation14_spill] sm:$0xff] }
 0x2c8   : > { %v3545_v48 = vadd.f32 %v4802_v60, %v3384_v46  ;;  %v6527_v4 = vadd.f32 %v6789_v10, %v3542_v54 }
 0x2ca   : > { %v4803_v34 = vpop.f32.mrb[108].mxu1  ;;  %v6530_v35 = vadd.f32 %v6286_v26, %v3545_v48  ;;  %v6794_v48 = vld [vmem:[#allocation15_spill] sm:$0xff] }
 0x2cb   : > { %v4804_v17 = vpop.f32.mrb[109].mxu1  ;;  %v3397_v10 = vadd.f32 %v6794_v48, %v6345_v61 }
 0x2cc   : > { %v4805_v29 = vadd.f32 %v4804_v17, %v4803_v34  ;;  %v4806_v15 = vpop.f32.mrb[110].mxu1 }
 0x2cd   : > { %v4807_v41 = vpop.f32.mrb[111].mxu1 }
 0x2ce   : > { %v3550_v24 = vadd.f32 %v4805_v29, %v3389_v59  ;;  %v4808_v0 = vadd.f32 %v4807_v41, %v4806_v15  ;;  %v6796_v41 = vld [vmem:[#allocation17_spill] sm:$0xff] }
 0x2d0   : > { %v3553_v56 = vadd.f32 %v4808_v0, %v3392_v47  ;;  %v6537_v46 = vadd.f32 %v6792_v38, %v3550_v24  ;;  %v6798_v0 = vld [vmem:[#allocation19_spill] sm:$0xff]  ;;  %v6800_v38 = vld [vmem:[#allocation18_spill] sm:$0xff] }
 0x2d1   : > { %v3405_v48 = vadd.f32 %v6800_v38, %v6345_v61 }
 0x2d2   : > { %v4809_v54 = vpop.f32.mrb[112].mxu1  ;;  %v6540_v26 = vadd.f32 %v6298_v23, %v3553_v56 }
 0x2d3   : > { %v4810_v60 = vpop.f32.mrb[113].mxu1 }
 0x2d4   : > { %6793 = vst [vmem:[#allocation7_spill] sm:$0xff] %v6540_v26  ;;  %v4811_v34 = vadd.f32 %v4810_v60, %v4809_v54  ;;  %v4812_v17 = vpop.f32.mrb[114].mxu1 }
 0x2d5   : > { %v4813_v6 = vpop.f32.mrb[115].mxu1 }
 0x2d6   : > { %v3558_v59 = vadd.f32 %v4811_v34, %v3397_v10  ;;  %v4814_v29 = vadd.f32 %v4813_v6, %v4812_v17  ;;  %v6802_v6 = vld [vmem:[#allocation21_spill] sm:$0xff] }
 0x2d8   : > { %v3561_v15 = vadd.f32 %v4814_v29, %v3400_v8  ;;  %v6547_v47 = vadd.f32 %v6796_v41, %v3558_v59  ;;  %v6803_v29 = vld [vmem:[#allocation23_spill] sm:$0xff] }
 0x2da   : > { %6797 = vst [vmem:[#allocation8_spill] sm:$0xff] %v6547_v47  ;;  %v4815_v24 = vpop.f32.mrb[116].mxu1  ;;  %v6550_v23 = vadd.f32 %v6798_v0, %v3561_v15  ;;  %v6804_v0 = vld [vmem:[#allocation22_spill] sm:$0xff]  ;;  %v6805_v47 = vld [vmem:[#allocation24_spill] sm:$0xff] }
 0x2db   : > { %v4816_v56 = vpop.f32.mrb[117].mxu1  ;;  %v3413_v38 = vadd.f32 %v6804_v0, %v6345_v61  ;;  %v3416_v27 = vadd.f32 %v6805_v47, %v6345_v61  ;;  %v6814_v47 = vld [vmem:[#allocation26_spill] sm:$0xff] }
 0x2dc   : > { %6799 = vst [vmem:[#allocation9_spill] sm:$0xff] %v6550_v23  ;;  %v4817_v54 = vadd.f32 %v4816_v56, %v4815_v24  ;;  %v4818_v60 = vpop.f32.mrb[118].mxu1 }
 0x2dd   : > { %v4819_v26 = vpop.f32.mrb[119].mxu1 }
 0x2de   : > { %v3566_v10 = vadd.f32 %v4817_v54, %v3405_v48  ;;  %v4820_v34 = vadd.f32 %v4819_v26, %v4818_v60  ;;  %v6566_v60 = vpop.f32.mrb[164].mxu0 }
 0x2df   : > { %6806 = vst [vmem:[#allocation10_spill] sm:$0xff] %v6566_v60  ;;  %v6816_v60 = vld [vmem:[#allocation29_spill] sm:$0xff] }
 0x2e0   : > { %v3569_v17 = vadd.f32 %v4820_v34, %v3408_v22  ;;  %v6557_v8 = vadd.f32 %v6802_v6, %v3566_v10  ;;  %v6807_v22 = vld [vmem:[#allocation25_spill] sm:$0xff]  ;;  %v6571_v34 = vpop.f32.mrb[165].mxu0 }
 0x2e1   : > { %6809 = vst [vmem:[#allocation12_spill] sm:$0xff] %v6571_v34  ;;  %v6573_v6 = vpop.f32.mrb[166].mxu0 }
 0x2e2   : > { %v4821_v59 = vpop.f32.mrb[120].mxu1  ;;  %v6560_v15 = vadd.f32 %v6803_v29, %v3569_v17  ;;  %6810 = vst [vmem:[#allocation13_spill] sm:$0xff] %v6573_v6  ;;  %v6811_v29 = vld [vmem:[#allocation27_spill] sm:$0xff]  ;;  %v6578_v0 = vpop.f32.mrb[167].mxu0 }
 0x2e3   : > { %v4822_v41 = vpop.f32.mrb[121].mxu1  ;;  %6813 = vst [vmem:[#allocation15_spill] sm:$0xff] %v6578_v0 }
 0x2e4   : > { %v4823_v24 = vadd.f32 %v4822_v41, %v4821_v59  ;;  %v4824_v56 = vpop.f32.mrb[122].mxu1 }
 0x2e5   : > { %v4825_v23 = vpop.f32.mrb[123].mxu1 }
 0x2e6   : > { %v3574_v48 = vadd.f32 %v4823_v24, %v3413_v38  ;;  %v4826_v26 = vadd.f32 %v4825_v23, %v4824_v56  ;;  %v3421_v23 = vadd.f32 %v6814_v47, %v6345_v61 }
 0x2e8   : > { %v3577_v54 = vadd.f32 %v4826_v26, %v3416_v27  ;;  %v6569_v10 = vadd.f32 %v6807_v22, %v3574_v48  ;;  %v6815_v27 = vld [vmem:[#allocation28_spill] sm:$0xff] }
 0x2e9   : > { %v3424_v48 = vadd.f32 %v6815_v27, %v6345_v61 }
 0x2ea   : > { %6808 = vst [vmem:[#allocation11_spill] sm:$0xff] %v6569_v10  ;;  %v4827_v17 = vpop.f32.mrb[124].mxu1  ;;  %v6576_v59 = vadd.f32 %v6811_v29, %v3577_v54 }
 0x2eb   : > { %v4828_v41 = vpop.f32.mrb[125].mxu1 }
 0x2ec   : > { %6812 = vst [vmem:[#allocation14_spill] sm:$0xff] %v6576_v59  ;;  %v4829_v38 = vadd.f32 %v4828_v41, %v4827_v17  ;;  %v4830_v24 = vpop.f32.mrb[126].mxu1 }
 0x2ed   : > { %v4831_v56 = vpop.f32.mrb[127].mxu1 }
 0x2ee   : > { %v3582_v26 = vadd.f32 %v4829_v38, %v3421_v23  ;;  %v4832_v22 = vadd.f32 %v4831_v56, %v4830_v24 }
 0x2f0   : > { %v3585_v6 = vadd.f32 %v4832_v22, %v3424_v48  ;;  %v6585_v54 = vadd.f32 %v6816_v60, %v3582_v26  ;;  %v6818_v22 = vld [vmem:[#allocation31_spill] sm:$0xff] }
 0x2f2   : > { %v4961_v29 = vpop.f32.mrb[128].mxu1  ;;  %v6588_v59 = vadd.f32 %v6353_v13, %v3585_v6 }
 0x2f3   : > { %v4962_v0 = vpop.f32.mrb[129].mxu1 }
 0x2f4   : > { %v4963_v34 = vadd.f32 %v4962_v0, %v4961_v29  ;;  %v4964_v47 = vpop.f32.mrb[130].mxu1 }
 0x2f5   : > { %v4965_v17 = vpop.f32.mrb[131].mxu1 }
 0x2f6   : > { %v3784_v41 = vadd.f32 %v4963_v34, %v6362_v57  ;;  %v4966_v10 = vadd.f32 %v4965_v17, %v4964_v47 }
 0x2f8   : > { %v3945_v61 = vadd.f32 %v6367_v18, %v3784_v41  ;;  %v3787_v23 = vadd.f32 %v4966_v10, %v6370_v40  ;;  %v6817_v10 = vld [vmem:[#allocation30_spill] sm:$0xff] }
 0x2fa   : > { %v4071_v60 = vmax.f32 %v3945_v61, 0.0  ;;  %v3948_v38 = vadd.f32 %v6377_v33, %v3787_v23  ;;  %v4967_v24 = vpop.f32.mrb[132].mxu1 }
 0x2fb   : > { %v4968_v13 = vpop.f32.mrb[133].mxu1 }
 0x2fc   : > { %v4103_v6 = vmin.f32 %v4071_v60, 6.0  ;;  %v4072_v56 = vmax.f32 %v3948_v38, 0.0  ;;  %v4969_v0 = vadd.f32 %v4968_v13, %v4967_v24  ;;  %v4970_v27 = vpop.f32.mrb[134].mxu1 }
 0x2fd   : > { %v4971_v48 = vpop.f32.mrb[135].mxu1 }
 0x2fe   : > { %4135 = vst [vmem:[%s6597_s10] sm:$0xff] %v4103_v6  ;;  %v4104_v57 = vmin.f32 %v4072_v56, 6.0  ;;  %v3792_v18 = vadd.f32 %v4969_v0, %v6385_v43  ;;  %v4972_v40 = vadd.f32 %v4971_v48, %v4970_v27 }
 0x300   : > { %4136 = vst [vmem:[%s6597_s10 + $0x8] sm:$0xff] %v4104_v57  ;;  %v3953_v33 = vadd.f32 %v6817_v10, %v3792_v18  ;;  %v3795_v34 = vadd.f32 %v4972_v40, %v6392_v58 }
 0x302   : > { %v4073_v26 = vmax.f32 %v3953_v33, 0.0  ;;  %v3956_v29 = vadd.f32 %v6818_v22, %v3795_v34  ;;  %v4973_v47 = vpop.f32.mrb[136].mxu1 }
 0x303   : > { %v4974_v17 = vpop.f32.mrb[137].mxu1 }
 0x304   : > { %v4105_v41 = vmin.f32 %v4073_v26, 6.0  ;;  %v4074_v61 = vmax.f32 %v3956_v29, 0.0  ;;  %v4975_v23 = vadd.f32 %v4974_v17, %v4973_v47  ;;  %v4976_v60 = vpop.f32.mrb[138].mxu1  ;;  %v6820_v29 = vld [vmem:[#allocation33_spill] sm:$0xff] }
 0x305   : > { %v4977_v38 = vpop.f32.mrb[139].mxu1 }
 0x306   : > { %4137 = vst [vmem:[%s6597_s10 + $0x10] sm:$0xff] %v4105_v41  ;;  %v4106_v43 = vmin.f32 %v4074_v61, 6.0  ;;  %v3800_v24 = vadd.f32 %v4975_v23, %v6405_v11  ;;  %v4978_v13 = vadd.f32 %v4977_v38, %v4976_v60 }
 0x308   : > { %4138 = vst [vmem:[%s6597_s10 + $0x18] sm:$0xff] %v4106_v43  ;;  %v3961_v58 = vadd.f32 %v6389_v55, %v3800_v24  ;;  %v3803_v6 = vadd.f32 %v4978_v13, %v6412_v19  ;;  %v6819_v55 = vld [vmem:[#allocation32_spill] sm:$0xff] }
 0x30a   : > { %v4075_v56 = vmax.f32 %v3961_v58, 0.0  ;;  %v3964_v0 = vadd.f32 %v6398_v1, %v3803_v6  ;;  %v4979_v27 = vpop.f32.mrb[140].mxu1 }
 0x30b   : > { %v4980_v48 = vpop.f32.mrb[141].mxu1 }
 0x30c   : > { %v4107_v57 = vmin.f32 %v4075_v56, 6.0  ;;  %v4076_v18 = vmax.f32 %v3964_v0, 0.0  ;;  %v4981_v40 = vadd.f32 %v4980_v48, %v4979_v27  ;;  %v4982_v10 = vpop.f32.mrb[142].mxu1 }
 0x30d   : > { %v4983_v33 = vpop.f32.mrb[143].mxu1 }
 0x30e   : > { %4139 = vst [vmem:[%s6597_s10 + $0x20] sm:$0xff] %v4107_v57  ;;  %v4108_v11 = vmin.f32 %v4076_v18, 6.0  ;;  %v3808_v34 = vadd.f32 %v4981_v40, %v6425_v45  ;;  %v4984_v26 = vadd.f32 %v4983_v33, %v4982_v10 }
 0x310   : > { %4140 = vst [vmem:[%s6597_s10 + $0x28] sm:$0xff] %v4108_v11  ;;  %v3969_v19 = vadd.f32 %v6819_v55, %v3808_v34  ;;  %v3811_v22 = vadd.f32 %v4984_v26, %v6432_v16 }
 0x312   : > { %v4077_v1 = vmax.f32 %v3969_v19, 0.0  ;;  %v3972_v47 = vadd.f32 %v6820_v29, %v3811_v22  ;;  %v4985_v17 = vpop.f32.mrb[144].mxu1 }
 0x313   : > { %v4986_v41 = vpop.f32.mrb[145].mxu1 }
 0x314   : > { %v4109_v61 = vmin.f32 %v4077_v1, 6.0  ;;  %v4078_v23 = vmax.f32 %v3972_v47, 0.0  ;;  %v4987_v60 = vadd.f32 %v4986_v41, %v4985_v17  ;;  %v4988_v38 = vpop.f32.mrb[146].mxu1 }
 0x315   : > { %v4989_v43 = vpop.f32.mrb[147].mxu1 }
 0x316   : > { %4141 = vst [vmem:[%s6597_s10 + $0x30] sm:$0xff] %v4109_v61  ;;  %v4110_v45 = vmin.f32 %v4078_v23, 6.0  ;;  %v3816_v24 = vadd.f32 %v4987_v60, %v6443_v7  ;;  %v4990_v13 = vadd.f32 %v4989_v43, %v4988_v38 }
 0x318   : > { %4142 = vst [vmem:[%s6597_s10 + $0x38] sm:$0xff] %v4110_v45  ;;  %v3977_v16 = vadd.f32 %v6409_v21, %v3816_v24  ;;  %v3819_v58 = vadd.f32 %v4990_v13, %v6450_v5 }
 0x31a   : > { %v4079_v6 = vmax.f32 %v3977_v16, 0.0  ;;  %v3980_v56 = vadd.f32 %v6418_v32, %v3819_v58  ;;  %v4991_v0 = vpop.f32.mrb[148].mxu1 }
 0x31b   : > { %v4992_v27 = vpop.f32.mrb[149].mxu1 }
 0x31c   : > { %v4111_v48 = vmin.f32 %v4079_v6, 6.0  ;;  %v4080_v57 = vmax.f32 %v3980_v56, 0.0  ;;  %v4993_v18 = vadd.f32 %v4992_v27, %v4991_v0  ;;  %v4994_v40 = vpop.f32.mrb[150].mxu1 }
 0x31d   : > { %v4995_v10 = vpop.f32.mrb[151].mxu1 }
 0x31e   : > { %4143 = vst [vmem:[%s6597_s10 + $0x40] sm:$0xff] %v4111_v48  ;;  %v4112_v7 = vmin.f32 %v4080_v57, 6.0  ;;  %v3824_v33 = vadd.f32 %v4993_v18, %v6461_v36  ;;  %v4996_v11 = vadd.f32 %v4995_v10, %v4994_v40 }
 0x320   : > { %4144 = vst [vmem:[%s6597_s10 + $0x48] sm:$0xff] %v4112_v7  ;;  %v3985_v21 = vadd.f32 %v6407_v9, %v3824_v33  ;;  %v3827_v5 = vadd.f32 %v4996_v11, %v6468_v53 }
 0x322   : > { %v4081_v32 = vmax.f32 %v3985_v21, 0.0  ;;  %v3988_v34 = vadd.f32 %v6414_v3, %v3827_v5  ;;  %v4997_v26 = vpop.f32.mrb[152].mxu1 }
 0x323   : > { %v4998_v55 = vpop.f32.mrb[153].mxu1 }
 0x324   : > { %v4113_v19 = vmin.f32 %v4081_v32, 6.0  ;;  %v4082_v22 = vmax.f32 %v3988_v34, 0.0  ;;  %v4999_v1 = vadd.f32 %v4998_v55, %v4997_v26  ;;  %v5000_v29 = vpop.f32.mrb[154].mxu1 }
 0x325   : > { %v5001_v47 = vpop.f32.mrb[155].mxu1 }
 0x326   : > { %4145 = vst [vmem:[%s6597_s10 + $0x50] sm:$0xff] %v4113_v19  ;;  %v4114_v36 = vmin.f32 %v4082_v22, 6.0  ;;  %v3832_v17 = vadd.f32 %v4999_v1, %v6479_v50  ;;  %v5002_v41 = vadd.f32 %v5001_v47, %v5000_v29 }
 0x328   : > { %4146 = vst [vmem:[%s6597_s10 + $0x58] sm:$0xff] %v4114_v36  ;;  %v3993_v9 = vadd.f32 %v6429_v51, %v3832_v17  ;;  %v3835_v53 = vadd.f32 %v5002_v41, %v6486_v30 }
 0x32a   : > { %v4083_v3 = vmax.f32 %v3993_v9, 0.0  ;;  %v3996_v61 = vadd.f32 %v6438_v39, %v3835_v53  ;;  %v5003_v23 = vpop.f32.mrb[156].mxu1 }
 0x32b   : > { %v5004_v60 = vpop.f32.mrb[157].mxu1 }
 0x32c   : > { %v4115_v38 = vmin.f32 %v4083_v3, 6.0  ;;  %v4084_v43 = vmax.f32 %v3996_v61, 0.0  ;;  %v5005_v45 = vadd.f32 %v5004_v60, %v5003_v23  ;;  %v5006_v24 = vpop.f32.mrb[158].mxu1 }
 0x32d   : > { %v5007_v13 = vpop.f32.mrb[159].mxu1 }
 0x32e   : > { %4147 = vst [vmem:[%s6597_s10 + $0x60] sm:$0xff] %v4115_v38  ;;  %v4116_v50 = vmin.f32 %v4084_v43, 6.0  ;;  %v3840_v16 = vadd.f32 %v5005_v45, %v6497_v14  ;;  %v5008_v58 = vadd.f32 %v5007_v13, %v5006_v24 }
 0x330   : > { %4148 = vst [vmem:[%s6597_s10 + $0x68] sm:$0xff] %v4116_v50  ;;  %v4001_v51 = vadd.f32 %v6427_v37, %v3840_v16  ;;  %v3843_v30 = vadd.f32 %v5008_v58, %v6500_v62 }
 0x332   : > { %v4085_v39 = vmax.f32 %v4001_v51, 0.0  ;;  %v4004_v6 = vadd.f32 %v6434_v52, %v3843_v30  ;;  %v5009_v56 = vpop.f32.mrb[160].mxu1  ;;  %v6822_v51 = vld [vmem:[#allocation7_spill] sm:$0xff] }
 0x333   : > { %v5010_v0 = vpop.f32.mrb[161].mxu1 }
 0x334   : > { %v4117_v27 = vmin.f32 %v4085_v39, 6.0  ;;  %v4086_v48 = vmax.f32 %v4004_v6, 0.0  ;;  %v5011_v57 = vadd.f32 %v5010_v0, %v5009_v56  ;;  %v5012_v18 = vpop.f32.mrb[162].mxu1  ;;  %v6823_v39 = vld [vmem:[#allocation35_spill] sm:$0xff] }
 0x335   : > { %v5013_v40 = vpop.f32.mrb[163].mxu1 }
 0x336   : > { %4149 = vst [vmem:[%s6597_s10 + $0x70] sm:$0xff] %v4117_v27  ;;  %v4118_v14 = vmin.f32 %v4086_v48, 6.0  ;;  %v3848_v10 = vadd.f32 %v5011_v57, %v6507_v44  ;;  %v5014_v7 = vadd.f32 %v5013_v40, %v5012_v18 }
 0x338   : > { %4150 = vst [vmem:[%s6597_s10 + $0x78] sm:$0xff] %v4118_v14  ;;  %v4009_v37 = vadd.f32 %v6447_v20, %v3848_v10  ;;  %v3851_v62 = vadd.f32 %v5014_v7, %v6510_v63  ;;  %v6824_v14 = vld [vmem:[#allocation8_spill] sm:$0xff] }
 0x33a   : > { %v4087_v52 = vmax.f32 %v4009_v37, 0.0  ;;  %v4012_v33 = vadd.f32 %v6456_v12, %v3851_v62  ;;  %v5015_v11 = vpop.f32.mrb[164].mxu1  ;;  %v6825_v37 = vld [vmem:[#allocation37_spill] sm:$0xff] }
 0x33b   : > { %v5016_v21 = vpop.f32.mrb[165].mxu1 }
 0x33c   : > { %v4119_v5 = vmin.f32 %v4087_v52, 6.0  ;;  %v4088_v32 = vmax.f32 %v4012_v33, 0.0  ;;  %v5017_v34 = vadd.f32 %v5016_v21, %v5015_v11  ;;  %v5018_v26 = vpop.f32.mrb[166].mxu1  ;;  %v6826_v52 = vld [vmem:[#allocation9_spill] sm:$0xff]  ;;  %v6827_v21 = vld [vmem:[#allocation39_spill] sm:$0xff] }
 0x33d   : > { %v5019_v55 = vpop.f32.mrb[167].mxu1 }
 0x33e   : > { %4151 = vst [vmem:[%s6597_s10 + $0x80] sm:$0xff] %v4119_v5  ;;  %v4120_v44 = vmin.f32 %v4088_v32, 6.0  ;;  %v3856_v19 = vadd.f32 %v5017_v34, %v6517_v31  ;;  %v5020_v22 = vadd.f32 %v5019_v55, %v5018_v26 }
 0x340   : > { %4152 = vst [vmem:[%s6597_s10 + $0x88] sm:$0xff] %v4120_v44  ;;  %v4017_v20 = vadd.f32 %v6445_v2, %v3856_v19  ;;  %v3859_v63 = vadd.f32 %v5020_v22, %v6520_v49 }
 0x342   : > { %v4089_v12 = vmax.f32 %v4017_v20, 0.0  ;;  %v4020_v1 = vadd.f32 %v6452_v42, %v3859_v63  ;;  %v5021_v29 = vpop.f32.mrb[168].mxu1 }
 0x343   : > { %v5022_v47 = vpop.f32.mrb[169].mxu1 }
 0x344   : > { %v4121_v36 = vmin.f32 %v4089_v12, 6.0  ;;  %v4090_v17 = vmax.f32 %v4020_v1, 0.0  ;;  %v5023_v41 = vadd.f32 %v5022_v47, %v5021_v29  ;;  %v5024_v9 = vpop.f32.mrb[170].mxu1  ;;  %v6828_v1 = vld [vmem:[#allocation36_spill] sm:$0xff] }
 0x345   : > { %v5025_v53 = vpop.f32.mrb[171].mxu1 }
 0x346   : > { %4153 = vst [vmem:[%s6597_s10 + $0x90] sm:$0xff] %v4121_v36  ;;  %v4122_v31 = vmin.f32 %v4090_v17, 6.0  ;;  %v3864_v3 = vadd.f32 %v5023_v41, %v6527_v4  ;;  %v5026_v61 = vadd.f32 %v5025_v53, %v5024_v9  ;;  %v6829_v17 = vld [vmem:[#allocation38_spill] sm:$0xff] }
 0x348   : > { %4154 = vst [vmem:[%s6597_s10 + $0x98] sm:$0xff] %v4122_v31  ;;  %v4025_v2 = vadd.f32 %v6465_v25, %v3864_v3  ;;  %v3867_v49 = vadd.f32 %v5026_v61, %v6530_v35  ;;  %v6821_v25 = vld [vmem:[#allocation34_spill] sm:$0xff] }
 0x34a   : > { %v4091_v42 = vmax.f32 %v4025_v2, 0.0  ;;  %v4028_v23 = vadd.f32 %v6474_v28, %v3867_v49  ;;  %v5027_v60 = vpop.f32.mrb[172].mxu1 }
 0x34b   : > { %v5028_v38 = vpop.f32.mrb[173].mxu1 }
 0x34c   : > { %v4123_v43 = vmin.f32 %v4091_v42, 6.0  ;;  %v4092_v45 = vmax.f32 %v4028_v23, 0.0  ;;  %v5029_v24 = vadd.f32 %v5028_v38, %v5027_v60  ;;  %v5030_v13 = vpop.f32.mrb[174].mxu1  ;;  %v6830_v42 = vld [vmem:[#allocation11_spill] sm:$0xff]  ;;  %v6831_v38 = vld [vmem:[#allocation12_spill] sm:$0xff] }
 0x34d   : > { %v5031_v50 = vpop.f32.mrb[175].mxu1 }
 0x34e   : > { %4155 = vst [vmem:[%s6597_s10 + $0xa0] sm:$0xff] %v4123_v43  ;;  %v4124_v4 = vmin.f32 %v4092_v45, 6.0  ;;  %v3872_v16 = vadd.f32 %v5029_v24, %v6537_v46  ;;  %v5032_v58 = vadd.f32 %v5031_v50, %v5030_v13  ;;  %v6832_v43 = vld [vmem:[#allocation14_spill] sm:$0xff]  ;;  %v6833_v13 = vld [vmem:[#allocation15_spill] sm:$0xff] }
 0x350   : > { %4156 = vst [vmem:[%s6597_s10 + $0xa8] sm:$0xff] %v4124_v4  ;;  %v4033_v35 = vadd.f32 %v6821_v25, %v3872_v16  ;;  %v3875_v30 = vadd.f32 %v5032_v58, %v6822_v51 }
 0x352   : > { %v4093_v28 = vmax.f32 %v4033_v35, 0.0  ;;  %v4036_v6 = vadd.f32 %v6823_v39, %v3875_v30  ;;  %v5033_v56 = vpop.f32.mrb[176].mxu1 }
 0x353   : > { %v5034_v0 = vpop.f32.mrb[177].mxu1 }
 0x354   : > { %v4125_v27 = vmin.f32 %v4093_v28, 6.0  ;;  %v4094_v48 = vmax.f32 %v4036_v6, 0.0  ;;  %v5035_v57 = vadd.f32 %v5034_v0, %v5033_v56  ;;  %v5036_v18 = vpop.f32.mrb[178].mxu1  ;;  %v6834_v56 = vld [vmem:[#allocation10_spill] sm:$0xff] }
 0x355   : > { %v5037_v40 = vpop.f32.mrb[179].mxu1 }
 0x356   : > { %4157 = vst [vmem:[%s6597_s10 + $0xb0] sm:$0xff] %v4125_v27  ;;  %v4126_v46 = vmin.f32 %v4094_v48, 6.0  ;;  %v3880_v10 = vadd.f32 %v5035_v57, %v6824_v14  ;;  %v5038_v7 = vadd.f32 %v5037_v40, %v5036_v18  ;;  %v6835_v57 = vld [vmem:[#allocation13_spill] sm:$0xff] }
 0x358   : > { %4158 = vst [vmem:[%s6597_s10 + $0xb8] sm:$0xff] %v4126_v46  ;;  %v4041_v62 = vadd.f32 %v6825_v37, %v3880_v10  ;;  %v3883_v33 = vadd.f32 %v5038_v7, %v6826_v52 }
 0x35a   : > { %v4095_v11 = vmax.f32 %v4041_v62, 0.0  ;;  %v4044_v5 = vadd.f32 %v6827_v21, %v3883_v33  ;;  %v5039_v32 = vpop.f32.mrb[180].mxu1 }
 0x35b   : > { %v5040_v34 = vpop.f32.mrb[181].mxu1 }
 0x35c   : > { %v4127_v26 = vmin.f32 %v4095_v11, 6.0  ;;  %v4096_v55 = vmax.f32 %v4044_v5, 0.0  ;;  %v5041_v44 = vadd.f32 %v5040_v34, %v5039_v32  ;;  %v5042_v19 = vpop.f32.mrb[182].mxu1 }
 0x35d   : > { %v5043_v22 = vpop.f32.mrb[183].mxu1 }
 0x35e   : > { %4159 = vst [vmem:[%s6597_s10 + $0xc0] sm:$0xff] %v4127_v26  ;;  %v4128_v20 = vmin.f32 %v4096_v55, 6.0  ;;  %v3888_v63 = vadd.f32 %v5041_v44, %v6557_v8  ;;  %v5044_v12 = vadd.f32 %v5043_v22, %v5042_v19 }
 0x360   : > { %4160 = vst [vmem:[%s6597_s10 + $0xc8] sm:$0xff] %v4128_v20  ;;  %v4049_v29 = vadd.f32 %v6828_v1, %v3888_v63  ;;  %v3891_v47 = vadd.f32 %v5044_v12, %v6560_v15 }
 0x362   : > { %v4097_v36 = vmax.f32 %v4049_v29, 0.0  ;;  %v4052_v41 = vadd.f32 %v6829_v17, %v3891_v47  ;;  %v5045_v9 = vpop.f32.mrb[184].mxu1 }
 0x363   : > { %v5046_v53 = vpop.f32.mrb[185].mxu1 }
 0x364   : > { %v4129_v31 = vmin.f32 %v4097_v36, 6.0  ;;  %v4098_v3 = vmax.f32 %v4052_v41, 0.0  ;;  %v5047_v61 = vadd.f32 %v5046_v53, %v5045_v9  ;;  %v5048_v2 = vpop.f32.mrb[186].mxu1 }
 0x365   : > { %v5049_v49 = vpop.f32.mrb[187].mxu1 }
 0x366   : > { %4161 = vst [vmem:[%s6597_s10 + $0xd0] sm:$0xff] %v4129_v31  ;;  %v4130_v8 = vmin.f32 %v4098_v3, 6.0  ;;  %v3896_v23 = vadd.f32 %v5047_v61, %v6830_v42  ;;  %v5050_v60 = vadd.f32 %v5049_v49, %v5048_v2 }
 0x368   : > { %4162 = vst [vmem:[%s6597_s10 + $0xd8] sm:$0xff] %v4130_v8  ;;  %v4057_v15 = vadd.f32 %v6831_v38, %v3896_v23  ;;  %v3899_v45 = vadd.f32 %v5050_v60, %v6832_v43 }
 0x36a   : > { %v4099_v24 = vmax.f32 %v4057_v15, 0.0  ;;  %v4060_v50 = vadd.f32 %v6833_v13, %v3899_v45  ;;  %v5051_v4 = vpop.f32.mrb[188].mxu1 }
 0x36b   : > { %v5052_v16 = vpop.f32.mrb[189].mxu1 }
 0x36c   : > { %v4131_v58 = vmin.f32 %v4099_v24, 6.0  ;;  %v4100_v25 = vmax.f32 %v4060_v50, 0.0  ;;  %v5053_v35 = vadd.f32 %v5052_v16, %v5051_v4  ;;  %v5054_v51 = vpop.f32.mrb[190].mxu1 }
 0x36d   : > { %v5055_v30 = vpop.f32.mrb[191].mxu1 }
 0x36e   : > { %4163 = vst [vmem:[%s6597_s10 + $0xe0] sm:$0xff] %v4131_v58  ;;  %v4132_v28 = vmin.f32 %v4100_v25, 6.0  ;;  %v3904_v39 = vadd.f32 %v5053_v35, %v6585_v54  ;;  %v5056_v6 = vadd.f32 %v5055_v30, %v5054_v51 }
 0x370   : > { %4164 = vst [vmem:[%s6597_s10 + $0xe8] sm:$0xff] %v4132_v28  ;;  %v4065_v0 = vadd.f32 %v6834_v56, %v3904_v39  ;;  %v3907_v27 = vadd.f32 %v5056_v6, %v6588_v59 }
 0x372   : > { %v4101_v48 = vmax.f32 %v4065_v0, 0.0  ;;  %v4068_v18 = vadd.f32 %v6835_v57, %v3907_v27 }
 0x374   : > { %v4133_v40 = vmin.f32 %v4101_v48, 6.0  ;;  %v4102_v46 = vmax.f32 %v4068_v18, 0.0 }
 0x376   : > { %4165 = vst [vmem:[%s6597_s10 + $0xf0] sm:$0xff] %v4133_v40  ;;  %v4134_v54 = vmin.f32 %v4102_v46, 6.0 }
 0x378   : > { %4166 = vst [vmem:[%s6597_s10 + $0xf8] sm:$0xff] %v4134_v54 }
 0x379   : > { %5390 = shalt.err (!%p5387_p3)
}
 0x37a   : > { %s5391_s26 = scalar_lea.hbm %s6694_s16, 4096  ;;  %s5395_s29 = scalar_lea.hbm %s6749_s6, 8192 }
 0x37b   : > { %p5392_p4 = scmp.ne.s32.totalorder %s6694_s16, %s5391_s26  ;;  %p5396_p9 = scmp.lt.u32.totalorder %s6694_s16, %s6749_s6 }
 0x37c   : > { %p5397_p10 = scmp.lt.u32.totalorder %s5395_s29, %s5391_s26  ;;  %p5399_p12 = scmp.lt.u32.totalorder %s5391_s26, %s6694_s16 }
 0x37d   : > { %p5393_p7 = pnand %p5392_p4, %p5517_p5 }
 0x37e   : > { %p5398_p11 = por %p5397_p10, %p5396_p9 }
 0x37f   : > { %p5394_p8 = pneg %p5393_p7 }
 0x380   : > { %p5400_p13 = por %p5399_p12, %p5398_p11 }
 0x382   : > { %p5401_p0 = pnand %p5400_p13, %p5394_p8 }
 0x384   : > { %5404 = shalt.err (!%p5401_p0)
}
 0x385   : > { %s5442_s12 = smov 128   ;;  %s5443_s19 = smov 8  }
 0x386   : > { %5218 = dma.vmem_to_hbm [thread:$0]  (%p5517_p5), %s6696_s14, 4096, %s6694_s16, %s6702_s15, %s5442_s12, %s5442_s12, %s5443_s19  }
 0x387 PF: > { %p5224_p1 = scmp.ge.s32.totalorder %s5439_s24, 2  ;;  %s4196_s13 = sand.u32 1, %s5427_s21  }
 0x388   : > { %s4197_s25 = scalar_lea.sflag [#allocation5], %s4196_s13 }
 0x389   : > { %p5221_p2 = pnand %p5224_p1, %p5521_p6 }
 0x38b   : > { %5422 = dma.done.wait (!%p5221_p2), %s4197_s25, 4096  }
 0x38c   : > { %5424 = vsyncadd (!%p5221_p2), %s4197_s25, 4294963200  ;;  %p16_p3 = scmp.ge.s32.totalorder %s5504_s27, 4   ;;  %s6836_s21 = smov %s5431_s22 }
 0x38d   : > { %s6837_s22 = smov %s5435_s23  ;;  %s6838_s23 = smov %s5515_s30 }
 0x38e   : > { %s6839_s24 = smov %s5504_s27  ;;  %18 = sbr.rel (!%p16_p3) target bundleno = 3 (0x3), region = 84 }
 0x395   :  { %4202 = vsyncpa [#allocation5], 1 }
 0x396   :  { %4204 = vsyncpa [#allocation5 + $0x1], 1 }

</bundles_post_ra>
